<compile_context>
chip_gen: v5e
topology: v5e:2x2
jax: 0.10.0
libtpu: 0.0.40
codegen_flags: <defaults>
</compile_context>

<pallas_src>
import functools
import numpy as np
import jax
import jax.numpy as jnp
from jax.experimental import pallas as pl
from jax.experimental.pallas import tpu as pltpu

# ----------------------- configuration (small synthetic sizes) -----------------------
CLASS_NUM = 4
PRED_CHANNEL = 32
CHANNEL_LIST = [8, 16, 24, 32, 40]   # 5 scales -> exercises every branch of forward()
SK_L = 64
SK_R = 16
BATCH = 2
IN_CH = 3
SPATIAL = 16

LANE = 128                           # TPU lane width; every kernel output is this wide
LP = LANE // PRED_CHANNEL            # pixels packed per 128-lane row
NEG_INF = -1e30


def _round8(n):
    return ((n + 7) // 8) * 8


def _cdiv(a, b):
    return -(-a // b)


def _num_tensorcores():
    """Best-effort TensorCore count (2 on v7x megacore); falls back to 1."""
    try:
        dev = jax.devices()[0]
        for attr in ("num_cores", "core_count"):
            v = getattr(dev, attr, None)
            if isinstance(v, int) and v > 0:
                return v
    except Exception:
        pass
    return 1


_NUM_CORES = _num_tensorcores()


def _pick_tile(n_rows, bytes_per_row, budget=3 << 20, cap=512, min_steps=1):
    """Largest row tile that divides n_rows, is a multiple of 8, fits `budget`
    (double-buffer estimate) and still yields at least `min_steps` grid steps."""
    if n_rows % 8 != 0:
        return n_rows                 # full-extent block (small inputs)
    limit = min(n_rows, cap, max(8, budget // max(1, bytes_per_row)))
    limit = max(8, (limit // 8) * 8)
    best, t = 8, 8
    while t <= limit:
        if n_rows % t == 0:
            best = t
        t += 8
    while min_steps > 1 and n_rows // best < min_steps and best > 8:
        t = best - 8
        while t >= 8 and n_rows % t != 0:
            t -= 8
        if t < 8:
            break
        best = t
    return best


def _enc_row_tile(rp0):
    """Row tile for the ragged encoder batch: grows with resolution (MXU occupancy),
    stays small at tiny sizes so per-scale padding (< tile rows) is negligible."""
    if rp0 >= 16384:
        return 512
    if rp0 >= 4096:
        return 256
    if rp0 >= 1024:
        return 64
    if rp0 >= 256:
        return 16
    return 8


# --------------------------------- Pallas kernels -------------------------------------
def _enc_up_kernel(sid_ref, x_ref, w1_ref, w2_ref, o_ref):
    """Fused 1x1 encoder conv + ReLU + 1x1 up conv (BN folded), one ragged row tile per
    grid step.  The scalar-prefetched per-tile scale id selects which scale's weights are
    DMA'd, so no scale is padded to the full-resolution row count.  bf16 operands,
    f32 accumulation, bf16 store."""
    del sid_ref
    h = jnp.dot(x_ref[...], w1_ref[0], preferred_element_type=jnp.float32)
    h = jnp.maximum(h, 0.0)
    y = jnp.dot(h.astype(jnp.bfloat16), w2_ref[0], preferred_element_type=jnp.float32)
    o_ref[...] = y.astype(o_ref.dtype)


def _heads_kernel(x_ref, w_ref, b_ref, o_ref, *, n_feas):
    """All prediction heads of one stage.  Features stay in the stacked packed layout
    (no lane->sublane repack); the block-diagonal head matmul becomes a short sum of
    per-feature 128x128 bf16 matmuls into one f32 accumulator; lane-dense bf16 store."""
    acc = jnp.zeros(o_ref.shape, jnp.float32)
    for m in range(n_feas):
        acc = acc + jnp.dot(x_ref[m], w_ref[m], preferred_element_type=jnp.float32)
    o_ref[...] = (acc + b_ref[...]).astype(o_ref.dtype)


def _gap_kernel(f_ref, o_ref, *, inv_rows):
    """Per-feature global average pool, accumulated over HW tiles (last grid axis)."""
    @pl.when(pl.program_id(1) == 0)
    def _():
        o_ref[...] = jnp.zeros_like(o_ref)
    x = f_ref[0].astype(jnp.float32)                      # (B, thw, 128)
    o_ref[0] += jnp.sum(x, axis=1) * inv_rows


def _sk_attn_kernel(gl_ref, wfc_ref, bfc_ref, wfcs_ref, bfcs_ref, attn_ref, *, m_max):
    """SKConv attention for one group: squeeze fc + ReLU, per-branch fcs, softmax over
    branches.  Padded branches carry a -1e30 logit bias (weight exactly 0); one EUP
    reciprocal replaces per-branch divides.  Tiny (B x lanes) data stays f32."""
    z = jnp.dot(gl_ref[...], wfc_ref[0], preferred_element_type=jnp.float32) + bfc_ref[0]
    z = jnp.maximum(z, 0.0)                               # (B, d)
    logits = [jnp.dot(z, wfcs_ref[m], preferred_element_type=jnp.float32) + bfcs_ref[m]
              for m in range(m_max)]                      # each (B, 128), lane-tiled
    mx = logits[0]
    for m in range(1, m_max):
        mx = jnp.maximum(mx, logits[m])
    exps = [jnp.exp(l - mx) for l in logits]
    den = exps[0]
    for m in range(1, m_max):
        den = den + exps[m]
    inv = pl.reciprocal(den, approx=True)
    for m in range(m_max):
        attn_ref[0, m] = exps[m] * inv


def _sk_apply_kernel(tbl_ref, f_ref, a_ref, o_ref, acc_ref):
    """HW-tiled weighted branch sum.  Branch slot is the last (arbitrary) grid axis; the
    scalar-prefetched table gathers each branch's feature block straight from the stacked
    feature array (no duplicated / zero branch blocks in HBM)."""
    del tbl_ref
    m = pl.program_id(2)

    @pl.when(m == 0)
    def _():
        acc_ref[...] = jnp.zeros_like(acc_ref)

    w = a_ref[0, 0]                                       # (B, 128) branch attention
    acc_ref[...] += f_ref[0].astype(jnp.float32) * w[:, None, :]

    @pl.when(m == pl.num_programs(2) - 1)
    def _():
        o_ref[0] = acc_ref[...].astype(o_ref.dtype)


# ------------------------------ kernel call wrappers -----------------------------------
def encoder_and_up(params, x_nhwc):
    """All 5 (pool -> encoder conv+ReLU -> up conv+BN) paths in ONE ragged pallas_call."""
    B, H, W, cin = x_nhwc.shape
    S = len(CHANNEL_LIST)
    w1, w2 = params['enc_up_w1'], params['enc_up_w2']
    k1p, k2p = w1.shape[1], w1.shape[2]

    trp = _enc_row_tile(_cdiv(B * H * W, LP))
    xs, sids, meta = [], [], []
    for i in range(S):
        kp = 2 ** i
        Hi, Wi = H // kp, W // kp
        xi = x_nhwc if kp == 1 else x_nhwc.reshape(B, Hi, kp, Wi, kp, cin).mean(axis=(2, 4))
        ni = B * Hi * Wi
        rp = _cdiv(ni, LP)
        rpad = _cdiv(rp, trp) * trp
        xi = xi.reshape(ni, cin)
        xi = jnp.pad(xi, ((0, rpad * LP - ni), (0, 0)))    # only < tile rows of junk
        xi = xi.reshape(rpad, LP * cin)
        xi = jnp.concatenate(
            [xi, jnp.ones((rpad, 1), xi.dtype),            # constant-1 column -> folded bias
             jnp.zeros((rpad, k1p - LP * cin - 1), xi.dtype)], axis=-1)
        xs.append(xi)
        sids += [i] * (rpad // trp)
        meta.append((Hi, Wi, ni, rp, rpad))
    xp = jnp.concatenate(xs, axis=0).astype(jnp.bfloat16)  # (Rtot, k1p) bf16, ragged pack
    sid = jnp.asarray(sids, jnp.int32)
    rtot = xp.shape[0]

    flops = 2 * rtot * (k1p * k2p + k2p * LANE)
    bytes_acc = (rtot * (k1p + LANE) + S * (k1p * k2p + k2p * LANE)) * 2
    y = pl.pallas_call(
        _enc_up_kernel,
        out_shape=jax.ShapeDtypeStruct((rtot, LANE), jnp.bfloat16),
        grid_spec=pltpu.PrefetchScalarGridSpec(
            num_scalar_prefetch=1,
            grid=(rtot // trp,),
            in_specs=[
                pl.BlockSpec((trp, k1p), lambda r, s: (r, 0)),
                pl.BlockSpec((1, k1p, k2p), lambda r, s: (s[r], 0, 0)),
                pl.BlockSpec((1, k2p, LANE), lambda r, s: (s[r], 0, 0)),
            ],
            out_specs=pl.BlockSpec((trp, LANE), lambda r, s: (r, 0)),
        ),
        compiler_params=pltpu.CompilerParams(dimension_semantics=("parallel",)),
        cost_estimate=pl.CostEstimate(flops=flops, transcendentals=0,
                                      bytes_accessed=bytes_acc),
    )(sid, xp, w1, w2)

    HWp = (H * W) // LP
    feas, off = [], 0
    for i in range(S):
        Hi, Wi, ni, rp, rpad = meta[i]
        if i == 0:
            # full-resolution scale is already in the packed layout: zero-copy reshape
            feas.append(y[off:off + rp].reshape(B, HWp, LANE))
        else:
            yi = y[off:off + rp].reshape(rp * LP, PRED_CHANNEL)[:ni]
            yi = yi.reshape(B, Hi, Wi, PRED_CHANNEL).astype(jnp.float32)
            fi = bilinear_upsample_nhwc(yi, 2 ** i)        # (B, H, W, P)
            feas.append(fi.reshape(B, HWp, LANE).astype(jnp.bfloat16))
        off += rpad
    return jnp.stack(feas, axis=0)                          # (S, B, HWp, 128) bf16


def heads_forward(stacked, w, b, B, H, W):
    """All prediction heads of one stage in one lane-dense pallas_call over stacked feas."""
    n, _, HWp, _ = stacked.shape
    R = B * HWp
    x = stacked.reshape(n, R, LANE)                         # free reshape (lane dim intact)
    min_steps = 2 if _NUM_CORES >= 2 else 1
    tr = _pick_tile(R, (n + 1) * LANE * 2 * 2, cap=512, min_steps=min_steps)
    flops = 2 * R * n * LANE * LANE
    bytes_acc = (R * (n + 1) * LANE + n * LANE * LANE) * 2
    y = pl.pallas_call(
        functools.partial(_heads_kernel, n_feas=n),
        out_shape=jax.ShapeDtypeStruct((R, LANE), jnp.bfloat16),
        grid=(R // tr,),
        in_specs=[pl.BlockSpec((n, tr, LANE), lambda r: (0, r, 0)),
                  pl.BlockSpec((n, LANE, LANE), lambda r: (0, 0, 0)),
                  pl.BlockSpec((1, LANE), lambda r: (0, 0))],
        out_specs=pl.BlockSpec((tr, LANE), lambda r: (r, 0)),
        compiler_params=pltpu.CompilerParams(dimension_semantics=("parallel",)),
        cost_estimate=pl.CostEstimate(flops=flops, transcendentals=0,
                                      bytes_accessed=bytes_acc),
    )(x, w, b)
    lanes = LP * n * CLASS_NUM
    y = y[:, :lanes].astype(jnp.float32)
    y = y.reshape(B, HWp, LP, n, CLASS_NUM).reshape(B, H, W, n, CLASS_NUM)
    return [jnp.transpose(y[..., m, :], (0, 3, 1, 2)) for m in range(n)]   # NCHW outputs


def _group_branches(n_feas, n_groups):
    """Which feature maps feed each SK group (mirrors the PyTorch forward)."""
    groups = []
    for i in range(n_groups):
        if n_groups == 1:
            groups.append([0, 1, 2])
        elif i == 0:
            groups.append([2 * i, 2 * i + 1])
        elif i == n_groups - 1:
            groups.append([2 * i - 1, 2 * i])
        else:
            groups.append([2 * i - 1, 2 * i, 2 * i + 1])
    assert all(max(g) < n_feas for g in groups)
    return groups


def sk_stage(stacked, skp, B, HWp):
    """One fuse stage = per-feature GAP + per-group attention + HW-tiled weighted apply."""
    n = stacked.shape[0]
    G = skp['wfc'].shape[0]
    d = skp['wfc'].shape[2]
    mmax = skp['wfcs'].shape[0] // G

    # --- (a) per-feature GAP over HW tiles (reads each feature exactly once) ---
    thw_g = _pick_tile(HWp, B * LANE * 2 * 2, cap=2048)
    gaps = pl.pallas_call(
        functools.partial(_gap_kernel, inv_rows=1.0 / HWp),
        out_shape=jax.ShapeDtypeStruct((n, B, LANE), jnp.float32),
        grid=(n, HWp // thw_g),
        in_specs=[pl.BlockSpec((1, B, thw_g, LANE), lambda i, t: (i, 0, t, 0))],
        out_specs=pl.BlockSpec((1, B, LANE), lambda i, t: (i, 0, 0)),
        compiler_params=pltpu.CompilerParams(
            dimension_semantics=("parallel", "arbitrary")),
    )(stacked)
    gl = jnp.transpose(gaps, (1, 0, 2)).reshape(B, n * LANE)      # tiny lane-concat glue

    # --- (b) per-group attention weights (softmax over branches) ---
    attn = pl.pallas_call(
        functools.partial(_sk_attn_kernel, m_max=mmax),
        out_shape=jax.ShapeDtypeStruct((G, mmax, B, LANE), jnp.float32),
        grid=(G,),
        in_specs=[pl.BlockSpec((B, n * LANE), lambda g: (0, 0)),
                  pl.BlockSpec((1, n * LANE, d), lambda g: (g, 0, 0)),
                  pl.BlockSpec((1, 1, d), lambda g: (g, 0, 0)),
                  pl.BlockSpec((mmax, d, LANE), lambda g: (g, 0, 0)),
                  pl.BlockSpec((mmax, 1, LANE), lambda g: (g, 0, 0))],
        out_specs=pl.BlockSpec((1, mmax, B, LANE), lambda g: (g, 0, 0, 0)),
        compiler_params=pltpu.CompilerParams(dimension_semantics=("parallel",)),
    )(gl, skp['wfc'], skp['bfc'], skp['wfcs'], skp['bfcs'])

    # --- (c) HW-tiled weighted apply; branch blocks gathered via scalar-prefetch table ---
    min_steps = 2 if (_NUM_CORES >= 2 and G == 1) else 1          # keep v7x's 2nd core busy
    thw = _pick_tile(HWp, B * LANE * 12, cap=2048, min_steps=min_steps)
    flops = 2 * G * mmax * B * HWp * LANE
    bytes_acc = (G * mmax + G) * B * HWp * LANE * 2
    out = pl.pallas_call(
        _sk_apply_kernel,
        out_shape=jax.ShapeDtypeStruct((G, B, HWp, LANE), jnp.bfloat16),
        grid_spec=pltpu.PrefetchScalarGridSpec(
            num_scalar_prefetch=1,
            grid=(G, HWp // thw, mmax),
            in_specs=[
                pl.BlockSpec((1, B, thw, LANE),
                             lambda g, t, m, tbl: (tbl[g * mmax + m], 0, t, 0)),
                pl.BlockSpec((1, 1, B, LANE),
                             lambda g, t, m, tbl: (g, m, 0, 0)),
            ],
            out_specs=pl.BlockSpec((1, B, thw, LANE),
                                   lambda g, t, m, tbl: (g, 0, t, 0)),
            scratch_shapes=[pltpu.VMEM((B, thw, LANE), jnp.float32)],
        ),
        compiler_params=pltpu.CompilerParams(
            dimension_semantics=("parallel", "parallel", "arbitrary")),
        cost_estimate=pl.CostEstimate(flops=flops, transcendentals=0,
                                      bytes_accessed=bytes_acc),
    )(skp['tbl'], stacked, attn)
    return out                                                    # (G, B, HWp, 128) bf16


# --------------------- bilinear upsampling (align_corners=True) ------------------------
def _bilinear_matrix(size_in, size_out):
    A = np.zeros((size_out, size_in), dtype=np.float32)
    if size_in == 1:
        A[:, 0] = 1.0
        return jnp.asarray(A)
    for p in range(size_out):
        src = p * (size_in - 1) / (size_out - 1) if size_out > 1 else 0.0
        i0 = min(int(np.floor(src)), size_in - 1)
        i1 = min(i0 + 1, size_in - 1)
        w1 = src - i0
        A[p, i0] += 1.0 - w1
        A[p, i1] += w1
    return jnp.asarray(A)


def bilinear_upsample_nhwc(x, scale):
    # TODO(synk): nn.UpsamplingBilinear2d kept in plain JAX (separable interp matrices);
    # it is resampling glue between kernels at these sizes.
    if scale == 1:
        return x
    B, H, W, C = x.shape
    Ah = _bilinear_matrix(H, H * scale)
    Aw = _bilinear_matrix(W, W * scale)
    y = jnp.einsum('ph,bhwc->bpwc', Ah, x)
    y = jnp.einsum('qw,bpwc->bpqc', Aw, y)
    return y


# ------------------------------------ parameters ---------------------------------------
def init_params(key, channel_list, pred_channel, class_num):
    assert LANE % pred_channel == 0
    d = max(pred_channel // SK_R, SK_L)
    cmax = max(channel_list)
    S = len(channel_list)
    k1_raw = LP * IN_CH
    k1p = _round8(k1_raw + 1)                   # +1 constant column for the bias
    k2_raw = LP * cmax
    k2p = _round8(k2_raw + 1)

    params = {}

    # ---- fused encoder (1x1 conv + ReLU) + up_sample (1x1 conv + folded BN), bf16 ----
    w1_all = np.zeros((S, k1p, k2p), np.float32)
    w2_all = np.zeros((S, k2p, LANE), np.float32)
    for i, cin in enumerate(channel_list):
        key, ka, kb, kc, kg, kbe, km, kv = jax.random.split(key, 8)
        w_enc = np.asarray(jax.random.normal(ka, (IN_CH, cin), jnp.float32)) / np.sqrt(IN_CH)
        b_enc = 0.01 * np.asarray(jax.random.normal(kb, (cin,), jnp.float32))
        w_up = np.asarray(jax.random.normal(kc, (cin, pred_channel), jnp.float32)) / np.sqrt(cin)
        gamma = 1.0 + 0.1 * np.asarray(jax.random.normal(kg, (pred_channel,), jnp.float32))
        beta = 0.1 * np.asarray(jax.random.normal(kbe, (pred_channel,), jnp.float32))
        mean = 0.1 * np.asarray(jax.random.normal(km, (pred_channel,), jnp.float32))
        var = 0.5 + np.asarray(jax.random.uniform(kv, (pred_channel,), jnp.float32))
        sc = gamma / np.sqrt(var + 1e-5)
        w_up_f = w_up * sc[None, :]
        b_up_f = beta - mean * sc
        w1p = np.zeros((IN_CH, cmax), np.float32); w1p[:, :cin] = w_enc
        b1p = np.zeros((cmax,), np.float32); b1p[:cin] = b_enc
        w2p = np.zeros((cmax, pred_channel), np.float32); w2p[:cin, :] = w_up_f
        for q in range(LP):
            w1_all[i, q * IN_CH:(q + 1) * IN_CH, q * cmax:(q + 1) * cmax] = w1p
            w1_all[i, k1_raw, q * cmax:(q + 1) * cmax] = b1p
            w2_all[i, q * cmax:(q + 1) * cmax, q * pred_channel:(q + 1) * pred_channel] = w2p
            w2_all[i, k2_raw, q * pred_channel:(q + 1) * pred_channel] = b_up_f
        w1_all[i, k1_raw, k2_raw] = 1.0          # pass the constant-1 column to layer 2
    params['enc_up_w1'] = jnp.asarray(w1_all).astype(jnp.bfloat16)
    params['enc_up_w2'] = jnp.asarray(w2_all).astype(jnp.bfloat16)

    # ---- prediction heads: per stage (n, 128, 128) bf16 block-diag weight + f32 bias ----
    out_counts = [S] + list(range((S + 1) // 2, 0, -2))            # [5, 3, 1]
    head_w, head_b = [], []
    for cnt in out_counts:
        assert LP * cnt * class_num <= LANE
        w = np.zeros((cnt, LANE, LANE), np.float32)
        bias = np.zeros((1, LANE), np.float32)
        for m in range(cnt):
            key, ka, kb = jax.random.split(key, 3)
            wm = np.asarray(jax.random.normal(ka, (pred_channel, class_num), jnp.float32)
                            ) / np.sqrt(pred_channel)
            bm = 0.01 * np.asarray(jax.random.normal(kb, (class_num,), jnp.float32))
            for q in range(LP):
                r0 = q * pred_channel
                c0 = q * cnt * class_num + m * class_num
                w[m, r0:r0 + pred_channel, c0:c0 + class_num] = wm
                bias[0, c0:c0 + class_num] = bm
        head_w.append(jnp.asarray(w).astype(jnp.bfloat16))
        head_b.append(jnp.asarray(bias))
    params['head_w'] = head_w
    params['head_b'] = head_b

    # ---- SKConv stages (fc weights pre-tiled to the 128-lane packed layout, f32: tiny) ----
    sk_stages = []
    n_feas_stage = S
    for n_groups in range((S + 1) // 2, 0, -2):                    # [3, 1]
        groups = _group_branches(n_feas_stage, n_groups)
        mmax = max(len(g) for g in groups)
        nl = n_feas_stage * LANE
        wfc_p = np.zeros((n_groups, nl, d), np.float32)
        bfc_p = np.zeros((n_groups, 1, d), np.float32)
        wfcs_p = np.zeros((n_groups * mmax, d, LANE), np.float32)
        bfcs_p = np.full((n_groups * mmax, 1, LANE), NEG_INF, np.float32)  # pads masked out
        tbl = np.zeros((n_groups * mmax,), np.int32)
        for g, members in enumerate(groups):
            M = len(members)
            key, ka, kb, kc, kd = jax.random.split(key, 5)
            wfc = np.asarray(jax.random.normal(ka, (pred_channel, d), jnp.float32)
                             ) / np.sqrt(pred_channel)
            bfc = 0.01 * np.asarray(jax.random.normal(kb, (d,), jnp.float32))
            wfcs = np.asarray(jax.random.normal(kc, (M, d, pred_channel), jnp.float32)
                              ) / np.sqrt(d)
            bfcs = 0.01 * np.asarray(jax.random.normal(kd, (M, pred_channel), jnp.float32))
            for idx in members:                    # folds the branch-sum, GAP slot-average
                for q in range(LP):
                    r0 = idx * LANE + q * pred_channel
                    wfc_p[g, r0:r0 + pred_channel, :] = wfc / LP
            bfc_p[g, 0] = bfc
            for m in range(mmax):
                slot = g * mmax + m
                if m < M:
                    wfcs_p[slot] = np.tile(wfcs[m], (1, LP))
                    bfcs_p[slot, 0] = np.tile(bfcs[m], LP)
                    tbl[slot] = members[m]
                else:
                    tbl[slot] = members[-1]        # duplicate last member: no extra DMA,
                                                   # its attention weight is exactly 0
        sk_stages.append({'wfc': jnp.asarray(wfc_p), 'bfc': jnp.asarray(bfc_p),
                          'wfcs': jnp.asarray(wfcs_p), 'bfcs': jnp.asarray(bfcs_p),
                          'tbl': jnp.asarray(tbl)})
        n_feas_stage = n_groups
    params['sk'] = sk_stages
    return params


# --------------------------------------- forward ---------------------------------------
def forward(params, x_nchw):
    x = jnp.transpose(x_nchw, (0, 2, 3, 1))                        # NCHW -> NHWC
    B, H, W, _ = x.shape
    assert (H * W) % LP == 0
    HWp = (H * W) // LP

    stacked = encoder_and_up(params, x)                            # (5, B, HWp, 128) bf16

    outs = []
    for j in range(len(CHANNEL_LIST) // 2):
        outs += heads_forward(stacked, params['head_w'][j], params['head_b'][j], B, H, W)
        stacked = sk_stage(stacked, params['sk'][j], B, HWp)       # next stage's stacked feas
    outs += heads_forward(stacked, params['head_w'][-1], params['head_b'][-1], B, H, W)
    return outs                                                    # NCHW prediction maps


# ----------------------------------------- main ----------------------------------------
if __name__ == "__main__":
    key = jax.random.PRNGKey(0)
    key, kx, kp = jax.random.split(key, 3)
    x = jax.random.normal(kx, (BATCH, IN_CH, SPATIAL, SPATIAL), jnp.float32)   # NCHW input
    params = init_params(kp, CHANNEL_LIST, PRED_CHANNEL, CLASS_NUM)

    outs = jax.jit(forward)(params, x)
    outs = jax.block_until_ready(outs)

    # 5 + 3 + 1 prediction maps, each (B, class_num, H, W)
    assert len(outs) == 9
    for o in outs:
        assert o.shape == (BATCH, CLASS_NUM, SPATIAL, SPATIAL)
        assert bool(jnp.all(jnp.isfinite(o)))
    print("KERNEL_OK")
</pallas_src>

<mosaic_0001>
module attributes {stable_mosaic.version = 11 : i64} {
  func.func @_enc_up_kernel(%arg0: i32, %arg1: memref<23xi32, #tpu.memory_space<smem>>, %arg2: memref<8x16xbf16, #tpu.memory_space<vmem>>, %arg3: memref<1x16x168xbf16, #tpu.memory_space<vmem>>, %arg4: memref<1x168x128xbf16, #tpu.memory_space<vmem>>, %arg5: memref<8x128xbf16, #tpu.memory_space<vmem>>) attributes {dimension_semantics = [#tpu.dimension_semantics<parallel>], iteration_bounds = array<i64: 23>, scalar_prefetch = 1 : i64, scratch_operands = 0 : i64, tpu.core_type = #tpu.core_type<tc>, window_params = [{transform_indices = @transform_0, window_bounds = array<i64: 8, 16>}, {transform_indices = @transform_1, window_bounds = array<i64: 1, 16, 168>}, {transform_indices = @transform_2, window_bounds = array<i64: 1, 168, 128>}, {transform_indices = @transform_3, window_bounds = array<i64: 8, 128>}]} {
    %c0 = arith.constant 0 : index
    %c0_0 = arith.constant 0 : index
    %0 = vector.load %arg2[%c0, %c0_0] : memref<8x16xbf16, #tpu.memory_space<vmem>>, vector<8x16xbf16>
    %c0_1 = arith.constant 0 : index
    %c0_2 = arith.constant 0 : index
    %c0_3 = arith.constant 0 : index
    %1 = vector.load %arg3[%c0_1, %c0_2, %c0_3] : memref<1x16x168xbf16, #tpu.memory_space<vmem>>, vector<1x16x168xbf16>
    %2 = vector.shape_cast %1 : vector<1x16x168xbf16> to vector<16x168xbf16>
    %cst = arith.constant dense<0.000000e+00> : vector<8x168xf32>
    %3 = tpu.matmul %0, %2, %cst {dimension_numbers = #tpu.dot_dimension_numbers<[1], [0], [0], [1], [0, 0, 1, 1], [], []>} : vector<8x16xbf16>, vector<16x168xbf16>, vector<8x168xf32> -> vector<8x168xf32>
    %cst_4 = arith.constant 0.000000e+00 : f32
    %4 = vector.broadcast %cst_4 : f32 to vector<8x168xf32>
    %5 = arith.maximumf %3, %4 : vector<8x168xf32>
    %6 = arith.truncf %5 : vector<8x168xf32> to vector<8x168xbf16>
    %c0_5 = arith.constant 0 : index
    %c0_6 = arith.constant 0 : index
    %c0_7 = arith.constant 0 : index
    %7 = vector.load %arg4[%c0_5, %c0_6, %c0_7] : memref<1x168x128xbf16, #tpu.memory_space<vmem>>, vector<1x168x128xbf16>
    %8 = vector.shape_cast %7 : vector<1x168x128xbf16> to vector<168x128xbf16>
    %cst_8 = arith.constant dense<0.000000e+00> : vector<8x128xf32>
    %9 = tpu.matmul %6, %8, %cst_8 {dimension_numbers = #tpu.dot_dimension_numbers<[1], [0], [0], [1], [0, 0, 1, 1], [], []>} : vector<8x168xbf16>, vector<168x128xbf16>, vector<8x128xf32> -> vector<8x128xf32>
    %10 = arith.truncf %9 : vector<8x128xf32> to vector<8x128xbf16>
    %c0_9 = arith.constant 0 : index
    %c0_10 = arith.constant 0 : index
    %11 = vector.load %arg5[%c0_9, %c0_10] : memref<8x128xbf16, #tpu.memory_space<vmem>>, vector<8x128xbf16>
    tpu.vector_store %arg5[%c0_9, %c0_10], %10 {strides = array<i32>} : memref<8x128xbf16, #tpu.memory_space<vmem>>, vector<8x128xbf16>,
    return
  }
  func.func @transform_0(%arg0: i32, %arg1: memref<23xi32, #tpu.memory_space<smem>>) -> (i32, i32) {
    %c0_i32 = arith.constant 0 : i32
    %c0_i32_0 = arith.constant 0 : i32
    return %arg0, %c0_i32 : i32, i32
  }
  func.func @transform_1(%arg0: i32, %arg1: memref<23xi32, #tpu.memory_space<smem>>) -> (i32, i32, i32) {
    %0 = arith.index_cast %arg0 : i32 to index
    %1 = memref.load %arg1[%0] : memref<23xi32, #tpu.memory_space<smem>>
    %c0_i32 = arith.constant 0 : i32
    %c0_i32_0 = arith.constant 0 : i32
    %c0_i32_1 = arith.constant 0 : i32
    return %1, %c0_i32, %c0_i32_0 : i32, i32, i32
  }
  func.func @transform_2(%arg0: i32, %arg1: memref<23xi32, #tpu.memory_space<smem>>) -> (i32, i32, i32) {
    %0 = arith.index_cast %arg0 : i32 to index
    %1 = memref.load %arg1[%0] : memref<23xi32, #tpu.memory_space<smem>>
    %c0_i32 = arith.constant 0 : i32
    %c0_i32_0 = arith.constant 0 : i32
    %c0_i32_1 = arith.constant 0 : i32
    return %1, %c0_i32, %c0_i32_0 : i32, i32, i32
  }
  func.func @transform_3(%arg0: i32, %arg1: memref<23xi32, #tpu.memory_space<smem>>) -> (i32, i32) {
    %c0_i32 = arith.constant 0 : i32
    %c0_i32_0 = arith.constant 0 : i32
    return %arg0, %c0_i32 : i32, i32
  }
}

module attributes {stable_mosaic.version = 11 : i64} {
  func.func @_heads_kernel(%arg0: i32, %arg1: memref<5x128x128xbf16, #tpu.memory_space<vmem>>, %arg2: memref<5x128x128xbf16, #tpu.memory_space<vmem>>, %arg3: memref<1x128xf32, #tpu.memory_space<vmem>>, %arg4: memref<128x128xbf16, #tpu.memory_space<vmem>>) attributes {dimension_semantics = [#tpu.dimension_semantics<parallel>], iteration_bounds = array<i64: 1>, scalar_prefetch = 0 : i64, scratch_operands = 0 : i64, tpu.core_type = #tpu.core_type<tc>, window_params = [{transform_indices = @transform_0, window_bounds = array<i64: 5, 128, 128>}, {pipeline_mode = #tpu.pipeline_mode<synchronous>, transform_indices = @transform_1, window_bounds = array<i64: 5, 128, 128>}, {pipeline_mode = #tpu.pipeline_mode<synchronous>, transform_indices = @transform_2, window_bounds = array<i64: 1, 128>}, {transform_indices = @transform_3, window_bounds = array<i64: 128, 128>}]} {
    %cst = arith.constant 0.000000e+00 : f32
    %0 = vector.broadcast %cst : f32 to vector<128x128xf32>
    %c0 = arith.constant 0 : index
    %c0_0 = arith.constant 0 : index
    %c0_1 = arith.constant 0 : index
    %1 = vector.load %arg1[%c0, %c0_0, %c0_1] : memref<5x128x128xbf16, #tpu.memory_space<vmem>>, vector<1x128x128xbf16>
    %2 = vector.shape_cast %1 : vector<1x128x128xbf16> to vector<128x128xbf16>
    %c0_2 = arith.constant 0 : index
    %c0_3 = arith.constant 0 : index
    %c0_4 = arith.constant 0 : index
    %3 = vector.load %arg2[%c0_2, %c0_3, %c0_4] : memref<5x128x128xbf16, #tpu.memory_space<vmem>>, vector<1x128x128xbf16>
    %4 = vector.shape_cast %3 : vector<1x128x128xbf16> to vector<128x128xbf16>
    %cst_5 = arith.constant dense<0.000000e+00> : vector<128x128xf32>
    %5 = tpu.matmul %2, %4, %cst_5 {dimension_numbers = #tpu.dot_dimension_numbers<[1], [0], [0], [1], [0, 0, 1, 1], [], []>} : vector<128x128xbf16>, vector<128x128xbf16>, vector<128x128xf32> -> vector<128x128xf32>
    %6 = arith.addf %0, %5 : vector<128x128xf32>
    %c1 = arith.constant 1 : index
    %c0_6 = arith.constant 0 : index
    %c0_7 = arith.constant 0 : index
    %7 = vector.load %arg1[%c1, %c0_6, %c0_7] : memref<5x128x128xbf16, #tpu.memory_space<vmem>>, vector<1x128x128xbf16>
    %8 = vector.shape_cast %7 : vector<1x128x128xbf16> to vector<128x128xbf16>
    %c1_8 = arith.constant 1 : index
    %c0_9 = arith.constant 0 : index
    %c0_10 = arith.constant 0 : index
    %9 = vector.load %arg2[%c1_8, %c0_9, %c0_10] : memref<5x128x128xbf16, #tpu.memory_space<vmem>>, vector<1x128x128xbf16>
    %10 = vector.shape_cast %9 : vector<1x128x128xbf16> to vector<128x128xbf16>
    %cst_11 = arith.constant dense<0.000000e+00> : vector<128x128xf32>
    %11 = tpu.matmul %8, %10, %cst_11 {dimension_numbers = #tpu.dot_dimension_numbers<[1], [0], [0], [1], [0, 0, 1, 1], [], []>} : vector<128x128xbf16>, vector<128x128xbf16>, vector<128x128xf32> -> vector<128x128xf32>
    %12 = arith.addf %6, %11 : vector<128x128xf32>
    %c2 = arith.constant 2 : index
    %c0_12 = arith.constant 0 : index
    %c0_13 = arith.constant 0 : index
    %13 = vector.load %arg1[%c2, %c0_12, %c0_13] : memref<5x128x128xbf16, #tpu.memory_space<vmem>>, vector<1x128x128xbf16>
    %14 = vector.shape_cast %13 : vector<1x128x128xbf16> to vector<128x128xbf16>
    %c2_14 = arith.constant 2 : index
    %c0_15 = arith.constant 0 : index
    %c0_16 = arith.constant 0 : index
    %15 = vector.load %arg2[%c2_14, %c0_15, %c0_16] : memref<5x128x128xbf16, #tpu.memory_space<vmem>>, vector<1x128x128xbf16>
    %16 = vector.shape_cast %15 : vector<1x128x128xbf16> to vector<128x128xbf16>
    %cst_17 = arith.constant dense<0.000000e+00> : vector<128x128xf32>
    %17 = tpu.matmul %14, %16, %cst_17 {dimension_numbers = #tpu.dot_dimension_numbers<[1], [0], [0], [1], [0, 0, 1, 1], [], []>} : vector<128x128xbf16>, vector<128x128xbf16>, vector<128x128xf32> -> vector<128x128xf32>
    %18 = arith.addf %12, %17 : vector<128x128xf32>
    %c3 = arith.constant 3 : index
    %c0_18 = arith.constant 0 : index
    %c0_19 = arith.constant 0 : index
    %19 = vector.load %arg1[%c3, %c0_18, %c0_19] : memref<5x128x128xbf16, #tpu.memory_space<vmem>>, vector<1x128x128xbf16>
    %20 = vector.shape_cast %19 : vector<1x128x128xbf16> to vector<128x128xbf16>
    %c3_20 = arith.constant 3 : index
    %c0_21 = arith.constant 0 : index
    %c0_22 = arith.constant 0 : index
    %21 = vector.load %arg2[%c3_20, %c0_21, %c0_22] : memref<5x128x128xbf16, #tpu.memory_space<vmem>>, vector<1x128x128xbf16>
    %22 = vector.shape_cast %21 : vector<1x128x128xbf16> to vector<128x128xbf16>
    %cst_23 = arith.constant dense<0.000000e+00> : vector<128x128xf32>
    %23 = tpu.matmul %20, %22, %cst_23 {dimension_numbers = #tpu.dot_dimension_numbers<[1], [0], [0], [1], [0, 0, 1, 1], [], []>} : vector<128x128xbf16>, vector<128x128xbf16>, vector<128x128xf32> -> vector<128x128xf32>
    %24 = arith.addf %18, %23 : vector<128x128xf32>
    %c4 = arith.constant 4 : index
    %c0_24 = arith.constant 0 : index
    %c0_25 = arith.constant 0 : index
    %25 = vector.load %arg1[%c4, %c0_24, %c0_25] : memref<5x128x128xbf16, #tpu.memory_space<vmem>>, vector<1x128x128xbf16>
    %26 = vector.shape_cast %25 : vector<1x128x128xbf16> to vector<128x128xbf16>
    %c4_26 = arith.constant 4 : index
    %c0_27 = arith.constant 0 : index
    %c0_28 = arith.constant 0 : index
    %27 = vector.load %arg2[%c4_26, %c0_27, %c0_28] : memref<5x128x128xbf16, #tpu.memory_space<vmem>>, vector<1x128x128xbf16>
    %28 = vector.shape_cast %27 : vector<1x128x128xbf16> to vector<128x128xbf16>
    %cst_29 = arith.constant dense<0.000000e+00> : vector<128x128xf32>
    %29 = tpu.matmul %26, %28, %cst_29 {dimension_numbers = #tpu.dot_dimension_numbers<[1], [0], [0], [1], [0, 0, 1, 1], [], []>} : vector<128x128xbf16>, vector<128x128xbf16>, vector<128x128xf32> -> vector<128x128xf32>
    %30 = arith.addf %24, %29 : vector<128x128xf32>
    %c0_30 = arith.constant 0 : index
    %c0_31 = arith.constant 0 : index
    %31 = vector.load %arg3[%c0_30, %c0_31] : memref<1x128xf32, #tpu.memory_space<vmem>>, vector<1x128xf32>
    %32 = vector.broadcast %31 : vector<1x128xf32> to vector<128x128xf32>
    %33 = arith.addf %30, %32 : vector<128x128xf32>
    %34 = arith.truncf %33 : vector<128x128xf32> to vector<128x128xbf16>
    %c0_32 = arith.constant 0 : index
    %c0_33 = arith.constant 0 : index
    %35 = vector.load %arg4[%c0_32, %c0_33] : memref<128x128xbf16, #tpu.memory_space<vmem>>, vector<128x128xbf16>
    tpu.vector_store %arg4[%c0_32, %c0_33], %34 {strides = array<i32>} : memref<128x128xbf16, #tpu.memory_space<vmem>>, vector<128x128xbf16>,
    return
  }
  func.func @transform_0(%arg0: i32) -> (i32, i32, i32) {
    %c0_i32 = arith.constant 0 : i32
    %c0_i32_0 = arith.constant 0 : i32
    %c0_i32_1 = arith.constant 0 : i32
    return %c0_i32, %arg0, %c0_i32_0 : i32, i32, i32
  }
  func.func @transform_1(%arg0: i32) -> (i32, i32, i32) {
    %c0_i32 = arith.constant 0 : i32
    %c0_i32_0 = arith.constant 0 : i32
    %c0_i32_1 = arith.constant 0 : i32
    %c0_i32_2 = arith.constant 0 : i32
    return %c0_i32, %c0_i32_0, %c0_i32_1 : i32, i32, i32
  }
  func.func @transform_2(%arg0: i32) -> (i32, i32) {
    %c0_i32 = arith.constant 0 : i32
    %c0_i32_0 = arith.constant 0 : i32
    %c0_i32_1 = arith.constant 0 : i32
    return %c0_i32, %c0_i32_0 : i32, i32
  }
  func.func @transform_3(%arg0: i32) -> (i32, i32) {
    %c0_i32 = arith.constant 0 : i32
    %c0_i32_0 = arith.constant 0 : i32
    return %arg0, %c0_i32 : i32, i32
  }
}

module attributes {stable_mosaic.version = 11 : i64} {
  func.func @_gap_kernel(%arg0: i32, %arg1: i32, %arg2: memref<1x2x64x128xbf16, #tpu.memory_space<vmem>>, %arg3: memref<1x2x128xf32, #tpu.memory_space<vmem>>) attributes {dimension_semantics = [#tpu.dimension_semantics<parallel>, #tpu.dimension_semantics<arbitrary>], iteration_bounds = array<i64: 5, 1>, scalar_prefetch = 0 : i64, scratch_operands = 0 : i64, tpu.core_type = #tpu.core_type<tc>, window_params = [{transform_indices = @transform_0, window_bounds = array<i64: 1, 2, 64, 128>}, {transform_indices = @transform_1, window_bounds = array<i64: 1, 2, 128>}]} {
    %c0_i32 = arith.constant 0 : i32
    %0 = arith.cmpi eq, %arg1, %c0_i32 : i32
    %1 = arith.extui %0 : i1 to i32
    %c0_i32_0 = arith.constant 0 : i32
    %2 = arith.cmpi ne, %1, %c0_i32_0 : i32
    scf.if %2 {
      %cst_11 = arith.constant 0.000000e+00 : f32
      %15 = vector.broadcast %cst_11 : f32 to vector<1x2x128xf32>
      %c0_12 = arith.constant 0 : index
      %c0_13 = arith.constant 0 : index
      %c0_14 = arith.constant 0 : index
      %16 = vector.load %arg3[%c0_12, %c0_13, %c0_14] : memref<1x2x128xf32, #tpu.memory_space<vmem>>, vector<1x2x128xf32>
      tpu.vector_store %arg3[%c0_12, %c0_13, %c0_14], %15 {strides = array<i32>} : memref<1x2x128xf32, #tpu.memory_space<vmem>>, vector<1x2x128xf32>,
    } else {
    }
    %c0 = arith.constant 0 : index
    %c0_1 = arith.constant 0 : index
    %c0_2 = arith.constant 0 : index
    %c0_3 = arith.constant 0 : index
    %3 = vector.load %arg2[%c0, %c0_1, %c0_2, %c0_3] : memref<1x2x64x128xbf16, #tpu.memory_space<vmem>>, vector<1x2x64x128xbf16>
    %4 = vector.shape_cast %3 : vector<1x2x64x128xbf16> to vector<2x64x128xbf16>
    %5 = arith.extf %4 : vector<2x64x128xbf16> to vector<2x64x128xf32>
    %c0_4 = arith.constant 0 : index
    %c0_5 = arith.constant 0 : index
    %c0_6 = arith.constant 0 : index
    %6 = vector.load %arg3[%c0_4, %c0_5, %c0_6] : memref<1x2x128xf32, #tpu.memory_space<vmem>>, vector<1x2x128xf32>
    %7 = vector.shape_cast %6 : vector<1x2x128xf32> to vector<2x128xf32>
    %cst = arith.constant dense<0.000000e+00> : vector<2x128xf32>
    %8 = vector.multi_reduction <add>, %5, %cst [1] : vector<2x64x128xf32> to vector<2x128xf32>
    %cst_7 = arith.constant 1.562500e-02 : f32
    %9 = vector.broadcast %cst_7 : f32 to vector<2x128xf32>
    %10 = arith.mulf %8, %9 : vector<2x128xf32>
    %11 = arith.addf %7, %10 : vector<2x128xf32>
    %c0_8 = arith.constant 0 : index
    %c0_9 = arith.constant 0 : index
    %c0_10 = arith.constant 0 : index
    %12 = vector.load %arg3[%c0_8, %c0_9, %c0_10] : memref<1x2x128xf32, #tpu.memory_space<vmem>>, vector<1x2x128xf32>
    %13 = vector.shape_cast %12 : vector<1x2x128xf32> to vector<2x128xf32>
    %14 = vector.shape_cast %11 : vector<2x128xf32> to vector<1x2x128xf32>
    tpu.vector_store %arg3[%c0_8, %c0_9, %c0_10], %14 {strides = array<i32>} : memref<1x2x128xf32, #tpu.memory_space<vmem>>, vector<1x2x128xf32>,
    return
  }
  func.func @transform_0(%arg0: i32, %arg1: i32) -> (i32, i32, i32, i32) {
    %c0_i32 = arith.constant 0 : i32
    %c0_i32_0 = arith.constant 0 : i32
    %c0_i32_1 = arith.constant 0 : i32
    return %arg0, %c0_i32, %arg1, %c0_i32_0 : i32, i32, i32, i32
  }
  func.func @transform_1(%arg0: i32, %arg1: i32) -> (i32, i32, i32) {
    %c0_i32 = arith.constant 0 : i32
    %c0_i32_0 = arith.constant 0 : i32
    %c0_i32_1 = arith.constant 0 : i32
    return %arg0, %c0_i32, %c0_i32_0 : i32, i32, i32
  }
}

module attributes {stable_mosaic.version = 11 : i64} {
  func.func @_sk_attn_kernel(%arg0: i32, %arg1: memref<2x640xf32, #tpu.memory_space<vmem>>, %arg2: memref<1x640x64xf32, #tpu.memory_space<vmem>>, %arg3: memref<1x1x64xf32, #tpu.memory_space<vmem>>, %arg4: memref<3x64x128xf32, #tpu.memory_space<vmem>>, %arg5: memref<3x1x128xf32, #tpu.memory_space<vmem>>, %arg6: memref<1x3x2x128xf32, #tpu.memory_space<vmem>>) attributes {dimension_semantics = [#tpu.dimension_semantics<parallel>], iteration_bounds = array<i64: 3>, scalar_prefetch = 0 : i64, scratch_operands = 0 : i64, tpu.core_type = #tpu.core_type<tc>, window_params = [{pipeline_mode = #tpu.pipeline_mode<synchronous>, transform_indices = @transform_0, window_bounds = array<i64: 2, 640>}, {transform_indices = @transform_1, window_bounds = array<i64: 1, 640, 64>}, {transform_indices = @transform_2, window_bounds = array<i64: 1, 1, 64>}, {transform_indices = @transform_3, window_bounds = array<i64: 3, 64, 128>}, {transform_indices = @transform_4, window_bounds = array<i64: 3, 1, 128>}, {transform_indices = @transform_5, window_bounds = array<i64: 1, 3, 2, 128>}]} {
    %c0 = arith.constant 0 : index
    %c0_0 = arith.constant 0 : index
    %0 = vector.load %arg1[%c0, %c0_0] : memref<2x640xf32, #tpu.memory_space<vmem>>, vector<2x640xf32>
    %c0_1 = arith.constant 0 : index
    %c0_2 = arith.constant 0 : index
    %c0_3 = arith.constant 0 : index
    %1 = vector.load %arg2[%c0_1, %c0_2, %c0_3] : memref<1x640x64xf32, #tpu.memory_space<vmem>>, vector<1x640x64xf32>
    %2 = vector.shape_cast %1 : vector<1x640x64xf32> to vector<640x64xf32>
    %cst = arith.constant dense<0.000000e+00> : vector<2x64xf32>
    %3 = tpu.matmul %0, %2, %cst {dimension_numbers = #tpu.dot_dimension_numbers<[1], [0], [0], [1], [0, 0, 1, 1], [], []>} : vector<2x640xf32>, vector<640x64xf32>, vector<2x64xf32> -> vector<2x64xf32>
    %c0_4 = arith.constant 0 : index
    %c0_5 = arith.constant 0 : index
    %c0_6 = arith.constant 0 : index
    %4 = vector.load %arg3[%c0_4, %c0_5, %c0_6] : memref<1x1x64xf32, #tpu.memory_space<vmem>>, vector<1x1x64xf32>
    %5 = vector.shape_cast %4 : vector<1x1x64xf32> to vector<1x64xf32>
    %6 = vector.broadcast %5 : vector<1x64xf32> to vector<2x64xf32>
    %7 = arith.addf %3, %6 : vector<2x64xf32>
    %cst_7 = arith.constant 0.000000e+00 : f32
    %8 = vector.broadcast %cst_7 : f32 to vector<2x64xf32>
    %9 = arith.maximumf %7, %8 : vector<2x64xf32>
    %c0_8 = arith.constant 0 : index
    %c0_9 = arith.constant 0 : index
    %c0_10 = arith.constant 0 : index
    %10 = vector.load %arg4[%c0_8, %c0_9, %c0_10] : memref<3x64x128xf32, #tpu.memory_space<vmem>>, vector<1x64x128xf32>
    %11 = vector.shape_cast %10 : vector<1x64x128xf32> to vector<64x128xf32>
    %cst_11 = arith.constant dense<0.000000e+00> : vector<2x128xf32>
    %12 = tpu.matmul %9, %11, %cst_11 {dimension_numbers = #tpu.dot_dimension_numbers<[1], [0], [0], [1], [0, 0, 1, 1], [], []>} : vector<2x64xf32>, vector<64x128xf32>, vector<2x128xf32> -> vector<2x128xf32>
    %c0_12 = arith.constant 0 : index
    %c0_13 = arith.constant 0 : index
    %c0_14 = arith.constant 0 : index
    %13 = vector.load %arg5[%c0_12, %c0_13, %c0_14] : memref<3x1x128xf32, #tpu.memory_space<vmem>>, vector<1x1x128xf32>
    %14 = vector.shape_cast %13 : vector<1x1x128xf32> to vector<1x128xf32>
    %15 = vector.broadcast %14 : vector<1x128xf32> to vector<2x128xf32>
    %16 = arith.addf %12, %15 : vector<2x128xf32>
    %c1 = arith.constant 1 : index
    %c0_15 = arith.constant 0 : index
    %c0_16 = arith.constant 0 : index
    %17 = vector.load %arg4[%c1, %c0_15, %c0_16] : memref<3x64x128xf32, #tpu.memory_space<vmem>>, vector<1x64x128xf32>
    %18 = vector.shape_cast %17 : vector<1x64x128xf32> to vector<64x128xf32>
    %cst_17 = arith.constant dense<0.000000e+00> : vector<2x128xf32>
    %19 = tpu.matmul %9, %18, %cst_17 {dimension_numbers = #tpu.dot_dimension_numbers<[1], [0], [0], [1], [0, 0, 1, 1], [], []>} : vector<2x64xf32>, vector<64x128xf32>, vector<2x128xf32> -> vector<2x128xf32>
    %c1_18 = arith.constant 1 : index
    %c0_19 = arith.constant 0 : index
    %c0_20 = arith.constant 0 : index
    %20 = vector.load %arg5[%c1_18, %c0_19, %c0_20] : memref<3x1x128xf32, #tpu.memory_space<vmem>>, vector<1x1x128xf32>
    %21 = vector.shape_cast %20 : vector<1x1x128xf32> to vector<1x128xf32>
    %22 = vector.broadcast %21 : vector<1x128xf32> to vector<2x128xf32>
    %23 = arith.addf %19, %22 : vector<2x128xf32>
    %c2 = arith.constant 2 : index
    %c0_21 = arith.constant 0 : index
    %c0_22 = arith.constant 0 : index
    %24 = vector.load %arg4[%c2, %c0_21, %c0_22] : memref<3x64x128xf32, #tpu.memory_space<vmem>>, vector<1x64x128xf32>
    %25 = vector.shape_cast %24 : vector<1x64x128xf32> to vector<64x128xf32>
    %cst_23 = arith.constant dense<0.000000e+00> : vector<2x128xf32>
    %26 = tpu.matmul %9, %25, %cst_23 {dimension_numbers = #tpu.dot_dimension_numbers<[1], [0], [0], [1], [0, 0, 1, 1], [], []>} : vector<2x64xf32>, vector<64x128xf32>, vector<2x128xf32> -> vector<2x128xf32>
    %c2_24 = arith.constant 2 : index
    %c0_25 = arith.constant 0 : index
    %c0_26 = arith.constant 0 : index
    %27 = vector.load %arg5[%c2_24, %c0_25, %c0_26] : memref<3x1x128xf32, #tpu.memory_space<vmem>>, vector<1x1x128xf32>
    %28 = vector.shape_cast %27 : vector<1x1x128xf32> to vector<1x128xf32>
    %29 = vector.broadcast %28 : vector<1x128xf32> to vector<2x128xf32>
    %30 = arith.addf %26, %29 : vector<2x128xf32>
    %31 = arith.maximumf %16, %23 : vector<2x128xf32>
    %32 = arith.maximumf %31, %30 : vector<2x128xf32>
    %33 = arith.subf %16, %32 : vector<2x128xf32>
    %34 = math.exp %33 : vector<2x128xf32>
    %35 = arith.subf %23, %32 : vector<2x128xf32>
    %36 = math.exp %35 : vector<2x128xf32>
    %37 = arith.subf %30, %32 : vector<2x128xf32>
    %38 = math.exp %37 : vector<2x128xf32>
    %39 = arith.addf %34, %36 : vector<2x128xf32>
    %40 = arith.addf %39, %38 : vector<2x128xf32>
    %41 = tpu.reciprocal %40 {approx = true} : vector<2x128xf32> -> vector<2x128xf32>
    %42 = arith.mulf %34, %41 : vector<2x128xf32>
    %c0_27 = arith.constant 0 : index
    %c0_28 = arith.constant 0 : index
    %c0_29 = arith.constant 0 : index
    %c0_30 = arith.constant 0 : index
    %43 = vector.load %arg6[%c0_27, %c0_28, %c0_29, %c0_30] : memref<1x3x2x128xf32, #tpu.memory_space<vmem>>, vector<1x1x2x128xf32>
    %44 = vector.shape_cast %43 : vector<1x1x2x128xf32> to vector<2x128xf32>
    %45 = vector.shape_cast %42 : vector<2x128xf32> to vector<1x1x2x128xf32>
    tpu.vector_store %arg6[%c0_27, %c0_28, %c0_29, %c0_30], %45 {strides = array<i32>} : memref<1x3x2x128xf32, #tpu.memory_space<vmem>>, vector<1x1x2x128xf32>,
    %46 = arith.mulf %36, %41 : vector<2x128xf32>
    %c0_31 = arith.constant 0 : index
    %c1_32 = arith.constant 1 : index
    %c0_33 = arith.constant 0 : index
    %c0_34 = arith.constant 0 : index
    %47 = vector.load %arg6[%c0_31, %c1_32, %c0_33, %c0_34] : memref<1x3x2x128xf32, #tpu.memory_space<vmem>>, vector<1x1x2x128xf32>
    %48 = vector.shape_cast %47 : vector<1x1x2x128xf32> to vector<2x128xf32>
    %49 = vector.shape_cast %46 : vector<2x128xf32> to vector<1x1x2x128xf32>
    tpu.vector_store %arg6[%c0_31, %c1_32, %c0_33, %c0_34], %49 {strides = array<i32>} : memref<1x3x2x128xf32, #tpu.memory_space<vmem>>, vector<1x1x2x128xf32>,
    %50 = arith.mulf %38, %41 : vector<2x128xf32>
    %c0_35 = arith.constant 0 : index
    %c2_36 = arith.constant 2 : index
    %c0_37 = arith.constant 0 : index
    %c0_38 = arith.constant 0 : index
    %51 = vector.load %arg6[%c0_35, %c2_36, %c0_37, %c0_38] : memref<1x3x2x128xf32, #tpu.memory_space<vmem>>, vector<1x1x2x128xf32>
    %52 = vector.shape_cast %51 : vector<1x1x2x128xf32> to vector<2x128xf32>
    %53 = vector.shape_cast %50 : vector<2x128xf32> to vector<1x1x2x128xf32>
    tpu.vector_store %arg6[%c0_35, %c2_36, %c0_37, %c0_38], %53 {strides = array<i32>} : memref<1x3x2x128xf32, #tpu.memory_space<vmem>>, vector<1x1x2x128xf32>,
    return
  }
  func.func @transform_0(%arg0: i32) -> (i32, i32) {
    %c0_i32 = arith.constant 0 : i32
    %c0_i32_0 = arith.constant 0 : i32
    %c0_i32_1 = arith.constant 0 : i32
    return %c0_i32, %c0_i32_0 : i32, i32
  }
  func.func @transform_1(%arg0: i32) -> (i32, i32, i32) {
    %c0_i32 = arith.constant 0 : i32
    %c0_i32_0 = arith.constant 0 : i32
    %c0_i32_1 = arith.constant 0 : i32
    return %arg0, %c0_i32, %c0_i32_0 : i32, i32, i32
  }
  func.func @transform_2(%arg0: i32) -> (i32, i32, i32) {
    %c0_i32 = arith.constant 0 : i32
    %c0_i32_0 = arith.constant 0 : i32
    %c0_i32_1 = arith.constant 0 : i32
    return %arg0, %c0_i32, %c0_i32_0 : i32, i32, i32
  }
  func.func @transform_3(%arg0: i32) -> (i32, i32, i32) {
    %c0_i32 = arith.constant 0 : i32
    %c0_i32_0 = arith.constant 0 : i32
    %c0_i32_1 = arith.constant 0 : i32
    return %arg0, %c0_i32, %c0_i32_0 : i32, i32, i32
  }
  func.func @transform_4(%arg0: i32) -> (i32, i32, i32) {
    %c0_i32 = arith.constant 0 : i32
    %c0_i32_0 = arith.constant 0 : i32
    %c0_i32_1 = arith.constant 0 : i32
    return %arg0, %c0_i32, %c0_i32_0 : i32, i32, i32
  }
  func.func @transform_5(%arg0: i32) -> (i32, i32, i32, i32) {
    %c0_i32 = arith.constant 0 : i32
    %c0_i32_0 = arith.constant 0 : i32
    %c0_i32_1 = arith.constant 0 : i32
    %c0_i32_2 = arith.constant 0 : i32
    return %arg0, %c0_i32, %c0_i32_0, %c0_i32_1 : i32, i32, i32, i32
  }
}

module attributes {stable_mosaic.version = 11 : i64} {
  func.func @_gap_kernel(%arg0: i32, %arg1: i32, %arg2: memref<1x2x64x128xbf16, #tpu.memory_space<vmem>>, %arg3: memref<1x2x128xf32, #tpu.memory_space<vmem>>) attributes {dimension_semantics = [#tpu.dimension_semantics<parallel>, #tpu.dimension_semantics<arbitrary>], iteration_bounds = array<i64: 3, 1>, scalar_prefetch = 0 : i64, scratch_operands = 0 : i64, tpu.core_type = #tpu.core_type<tc>, window_params = [{transform_indices = @transform_0, window_bounds = array<i64: 1, 2, 64, 128>}, {transform_indices = @transform_1, window_bounds = array<i64: 1, 2, 128>}]} {
    %c0_i32 = arith.constant 0 : i32
    %0 = arith.cmpi eq, %arg1, %c0_i32 : i32
    %1 = arith.extui %0 : i1 to i32
    %c0_i32_0 = arith.constant 0 : i32
    %2 = arith.cmpi ne, %1, %c0_i32_0 : i32
    scf.if %2 {
      %cst_11 = arith.constant 0.000000e+00 : f32
      %15 = vector.broadcast %cst_11 : f32 to vector<1x2x128xf32>
      %c0_12 = arith.constant 0 : index
      %c0_13 = arith.constant 0 : index
      %c0_14 = arith.constant 0 : index
      %16 = vector.load %arg3[%c0_12, %c0_13, %c0_14] : memref<1x2x128xf32, #tpu.memory_space<vmem>>, vector<1x2x128xf32>
      tpu.vector_store %arg3[%c0_12, %c0_13, %c0_14], %15 {strides = array<i32>} : memref<1x2x128xf32, #tpu.memory_space<vmem>>, vector<1x2x128xf32>,
    } else {
    }
    %c0 = arith.constant 0 : index
    %c0_1 = arith.constant 0 : index
    %c0_2 = arith.constant 0 : index
    %c0_3 = arith.constant 0 : index
    %3 = vector.load %arg2[%c0, %c0_1, %c0_2, %c0_3] : memref<1x2x64x128xbf16, #tpu.memory_space<vmem>>, vector<1x2x64x128xbf16>
    %4 = vector.shape_cast %3 : vector<1x2x64x128xbf16> to vector<2x64x128xbf16>
    %5 = arith.extf %4 : vector<2x64x128xbf16> to vector<2x64x128xf32>
    %c0_4 = arith.constant 0 : index
    %c0_5 = arith.constant 0 : index
    %c0_6 = arith.constant 0 : index
    %6 = vector.load %arg3[%c0_4, %c0_5, %c0_6] : memref<1x2x128xf32, #tpu.memory_space<vmem>>, vector<1x2x128xf32>
    %7 = vector.shape_cast %6 : vector<1x2x128xf32> to vector<2x128xf32>
    %cst = arith.constant dense<0.000000e+00> : vector<2x128xf32>
    %8 = vector.multi_reduction <add>, %5, %cst [1] : vector<2x64x128xf32> to vector<2x128xf32>
    %cst_7 = arith.constant 1.562500e-02 : f32
    %9 = vector.broadcast %cst_7 : f32 to vector<2x128xf32>
    %10 = arith.mulf %8, %9 : vector<2x128xf32>
    %11 = arith.addf %7, %10 : vector<2x128xf32>
    %c0_8 = arith.constant 0 : index
    %c0_9 = arith.constant 0 : index
    %c0_10 = arith.constant 0 : index
    %12 = vector.load %arg3[%c0_8, %c0_9, %c0_10] : memref<1x2x128xf32, #tpu.memory_space<vmem>>, vector<1x2x128xf32>
    %13 = vector.shape_cast %12 : vector<1x2x128xf32> to vector<2x128xf32>
    %14 = vector.shape_cast %11 : vector<2x128xf32> to vector<1x2x128xf32>
    tpu.vector_store %arg3[%c0_8, %c0_9, %c0_10], %14 {strides = array<i32>} : memref<1x2x128xf32, #tpu.memory_space<vmem>>, vector<1x2x128xf32>,
    return
  }
  func.func @transform_0(%arg0: i32, %arg1: i32) -> (i32, i32, i32, i32) {
    %c0_i32 = arith.constant 0 : i32
    %c0_i32_0 = arith.constant 0 : i32
    %c0_i32_1 = arith.constant 0 : i32
    return %arg0, %c0_i32, %arg1, %c0_i32_0 : i32, i32, i32, i32
  }
  func.func @transform_1(%arg0: i32, %arg1: i32) -> (i32, i32, i32) {
    %c0_i32 = arith.constant 0 : i32
    %c0_i32_0 = arith.constant 0 : i32
    %c0_i32_1 = arith.constant 0 : i32
    return %arg0, %c0_i32, %c0_i32_0 : i32, i32, i32
  }
}

module attributes {stable_mosaic.version = 11 : i64} {
  func.func @_sk_apply_kernel(%arg0: i32, %arg1: i32, %arg2: i32, %arg3: memref<9xi32, #tpu.memory_space<smem>>, %arg4: memref<1x2x64x128xbf16, #tpu.memory_space<vmem>>, %arg5: memref<1x1x2x128xf32, #tpu.memory_space<vmem>>, %arg6: memref<1x2x64x128xbf16, #tpu.memory_space<vmem>>, %arg7: memref<2x64x128xf32, #tpu.memory_space<vmem>>) attributes {dimension_semantics = [#tpu.dimension_semantics<parallel>, #tpu.dimension_semantics<parallel>, #tpu.dimension_semantics<arbitrary>], iteration_bounds = array<i64: 3, 1, 3>, scalar_prefetch = 1 : i64, scratch_operands = 1 : i64, tpu.core_type = #tpu.core_type<tc>, window_params = [{transform_indices = @transform_0, window_bounds = array<i64: 1, 2, 64, 128>}, {transform_indices = @transform_1, window_bounds = array<i64: 1, 1, 2, 128>}, {transform_indices = @transform_2, window_bounds = array<i64: 1, 2, 64, 128>}]} {
    %c0_i32 = arith.constant 0 : i32
    %0 = arith.cmpi eq, %arg2, %c0_i32 : i32
    %1 = arith.extui %0 : i1 to i32
    %c0_i32_0 = arith.constant 0 : i32
    %2 = arith.cmpi ne, %1, %c0_i32_0 : i32
    scf.if %2 {
      %cst = arith.constant 0.000000e+00 : f32
      %17 = vector.broadcast %cst : f32 to vector<2x64x128xf32>
      %c0_15 = arith.constant 0 : index
      %c0_16 = arith.constant 0 : index
      %c0_17 = arith.constant 0 : index
      %18 = vector.load %arg7[%c0_15, %c0_16, %c0_17] : memref<2x64x128xf32, #tpu.memory_space<vmem>>, vector<2x64x128xf32>
      tpu.vector_store %arg7[%c0_15, %c0_16, %c0_17], %17 {strides = array<i32>} : memref<2x64x128xf32, #tpu.memory_space<vmem>>, vector<2x64x128xf32>,
    } else {
    }
    %c0 = arith.constant 0 : index
    %c0_1 = arith.constant 0 : index
    %c0_2 = arith.constant 0 : index
    %c0_3 = arith.constant 0 : index
    %3 = vector.load %arg5[%c0, %c0_1, %c0_2, %c0_3] : memref<1x1x2x128xf32, #tpu.memory_space<vmem>>, vector<1x1x2x128xf32>
    %4 = vector.shape_cast %3 : vector<1x1x2x128xf32> to vector<2x128xf32>
    %c0_4 = arith.constant 0 : index
    %c0_5 = arith.constant 0 : index
    %c0_6 = arith.constant 0 : index
    %5 = vector.load %arg7[%c0_4, %c0_5, %c0_6] : memref<2x64x128xf32, #tpu.memory_space<vmem>>, vector<2x64x128xf32>
    %c0_7 = arith.constant 0 : index
    %c0_8 = arith.constant 0 : index
    %c0_9 = arith.constant 0 : index
    %c0_10 = arith.constant 0 : index
    %6 = vector.load %arg4[%c0_7, %c0_8, %c0_9, %c0_10] : memref<1x2x64x128xbf16, #tpu.memory_space<vmem>>, vector<1x2x64x128xbf16>
    %7 = vector.shape_cast %6 : vector<1x2x64x128xbf16> to vector<2x64x128xbf16>
    %8 = arith.extf %7 : vector<2x64x128xbf16> to vector<2x64x128xf32>
    %9 = vector.shape_cast %4 : vector<2x128xf32> to vector<2x1x128xf32>
    %10 = vector.broadcast %9 : vector<2x1x128xf32> to vector<2x64x128xf32>
    %11 = arith.mulf %8, %10 : vector<2x64x128xf32>
    %12 = arith.addf %5, %11 : vector<2x64x128xf32>
    %c0_11 = arith.constant 0 : index
    %c0_12 = arith.constant 0 : index
    %c0_13 = arith.constant 0 : index
    %13 = vector.load %arg7[%c0_11, %c0_12, %c0_13] : memref<2x64x128xf32, #tpu.memory_space<vmem>>, vector<2x64x128xf32>
    tpu.vector_store %arg7[%c0_11, %c0_12, %c0_13], %12 {strides = array<i32>} : memref<2x64x128xf32, #tpu.memory_space<vmem>>, vector<2x64x128xf32>,
    %c2_i32 = arith.constant 2 : i32
    %14 = arith.cmpi eq, %arg2, %c2_i32 : i32
    %15 = arith.extui %14 : i1 to i32
    %c0_i32_14 = arith.constant 0 : i32
    %16 = arith.cmpi ne, %15, %c0_i32_14 : i32
    scf.if %16 {
      %c0_15 = arith.constant 0 : index
      %c0_16 = arith.constant 0 : index
      %c0_17 = arith.constant 0 : index
      %17 = vector.load %arg7[%c0_15, %c0_16, %c0_17] : memref<2x64x128xf32, #tpu.memory_space<vmem>>, vector<2x64x128xf32>
      %18 = arith.truncf %17 : vector<2x64x128xf32> to vector<2x64x128xbf16>
      %c0_18 = arith.constant 0 : index
      %c0_19 = arith.constant 0 : index
      %c0_20 = arith.constant 0 : index
      %c0_21 = arith.constant 0 : index
      %19 = vector.load %arg6[%c0_18, %c0_19, %c0_20, %c0_21] : memref<1x2x64x128xbf16, #tpu.memory_space<vmem>>, vector<1x2x64x128xbf16>
      %20 = vector.shape_cast %19 : vector<1x2x64x128xbf16> to vector<2x64x128xbf16>
      %21 = vector.shape_cast %18 : vector<2x64x128xbf16> to vector<1x2x64x128xbf16>
      tpu.vector_store %arg6[%c0_18, %c0_19, %c0_20, %c0_21], %21 {strides = array<i32>} : memref<1x2x64x128xbf16, #tpu.memory_space<vmem>>, vector<1x2x64x128xbf16>,
    } else {
    }
    return
  }
  func.func @transform_0(%arg0: i32, %arg1: i32, %arg2: i32, %arg3: memref<9xi32, #tpu.memory_space<smem>>) -> (i32, i32, i32, i32) {
    %c3_i32 = arith.constant 3 : i32
    %0 = arith.muli %arg0, %c3_i32 : i32
    %1 = arith.addi %0, %arg2 : i32
    %2 = arith.index_cast %1 : i32 to index
    %3 = memref.load %arg3[%2] : memref<9xi32, #tpu.memory_space<smem>>
    %c0_i32 = arith.constant 0 : i32
    %c0_i32_0 = arith.constant 0 : i32
    %c0_i32_1 = arith.constant 0 : i32
    return %3, %c0_i32, %arg1, %c0_i32_0 : i32, i32, i32, i32
  }
  func.func @transform_1(%arg0: i32, %arg1: i32, %arg2: i32, %arg3: memref<9xi32, #tpu.memory_space<smem>>) -> (i32, i32, i32, i32) {
    %c0_i32 = arith.constant 0 : i32
    %c0_i32_0 = arith.constant 0 : i32
    %c0_i32_1 = arith.constant 0 : i32
    return %arg0, %arg2, %c0_i32, %c0_i32_0 : i32, i32, i32, i32
  }
  func.func @transform_2(%arg0: i32, %arg1: i32, %arg2: i32, %arg3: memref<9xi32, #tpu.memory_space<smem>>) -> (i32, i32, i32, i32) {
    %c0_i32 = arith.constant 0 : i32
    %c0_i32_0 = arith.constant 0 : i32
    %c0_i32_1 = arith.constant 0 : i32
    return %arg0, %c0_i32, %arg1, %c0_i32_0 : i32, i32, i32, i32
  }
}

module attributes {stable_mosaic.version = 11 : i64} {
  func.func @_sk_attn_kernel(%arg0: i32, %arg1: memref<2x384xf32, #tpu.memory_space<vmem>>, %arg2: memref<1x384x64xf32, #tpu.memory_space<vmem>>, %arg3: memref<1x1x64xf32, #tpu.memory_space<vmem>>, %arg4: memref<3x64x128xf32, #tpu.memory_space<vmem>>, %arg5: memref<3x1x128xf32, #tpu.memory_space<vmem>>, %arg6: memref<1x3x2x128xf32, #tpu.memory_space<vmem>>) attributes {dimension_semantics = [#tpu.dimension_semantics<parallel>], iteration_bounds = array<i64: 1>, scalar_prefetch = 0 : i64, scratch_operands = 0 : i64, tpu.core_type = #tpu.core_type<tc>, window_params = [{pipeline_mode = #tpu.pipeline_mode<synchronous>, transform_indices = @transform_0, window_bounds = array<i64: 2, 384>}, {transform_indices = @transform_1, window_bounds = array<i64: 1, 384, 64>}, {transform_indices = @transform_2, window_bounds = array<i64: 1, 1, 64>}, {transform_indices = @transform_3, window_bounds = array<i64: 3, 64, 128>}, {transform_indices = @transform_4, window_bounds = array<i64: 3, 1, 128>}, {transform_indices = @transform_5, window_bounds = array<i64: 1, 3, 2, 128>}]} {
    %c0 = arith.constant 0 : index
    %c0_0 = arith.constant 0 : index
    %0 = vector.load %arg1[%c0, %c0_0] : memref<2x384xf32, #tpu.memory_space<vmem>>, vector<2x384xf32>
    %c0_1 = arith.constant 0 : index
    %c0_2 = arith.constant 0 : index
    %c0_3 = arith.constant 0 : index
    %1 = vector.load %arg2[%c0_1, %c0_2, %c0_3] : memref<1x384x64xf32, #tpu.memory_space<vmem>>, vector<1x384x64xf32>
    %2 = vector.shape_cast %1 : vector<1x384x64xf32> to vector<384x64xf32>
    %cst = arith.constant dense<0.000000e+00> : vector<2x64xf32>
    %3 = tpu.matmul %0, %2, %cst {dimension_numbers = #tpu.dot_dimension_numbers<[1], [0], [0], [1], [0, 0, 1, 1], [], []>} : vector<2x384xf32>, vector<384x64xf32>, vector<2x64xf32> -> vector<2x64xf32>
    %c0_4 = arith.constant 0 : index
    %c0_5 = arith.constant 0 : index
    %c0_6 = arith.constant 0 : index
    %4 = vector.load %arg3[%c0_4, %c0_5, %c0_6] : memref<1x1x64xf32, #tpu.memory_space<vmem>>, vector<1x1x64xf32>
    %5 = vector.shape_cast %4 : vector<1x1x64xf32> to vector<1x64xf32>
    %6 = vector.broadcast %5 : vector<1x64xf32> to vector<2x64xf32>
    %7 = arith.addf %3, %6 : vector<2x64xf32>
    %cst_7 = arith.constant 0.000000e+00 : f32
    %8 = vector.broadcast %cst_7 : f32 to vector<2x64xf32>
    %9 = arith.maximumf %7, %8 : vector<2x64xf32>
    %c0_8 = arith.constant 0 : index
    %c0_9 = arith.constant 0 : index
    %c0_10 = arith.constant 0 : index
    %10 = vector.load %arg4[%c0_8, %c0_9, %c0_10] : memref<3x64x128xf32, #tpu.memory_space<vmem>>, vector<1x64x128xf32>
    %11 = vector.shape_cast %10 : vector<1x64x128xf32> to vector<64x128xf32>
    %cst_11 = arith.constant dense<0.000000e+00> : vector<2x128xf32>
    %12 = tpu.matmul %9, %11, %cst_11 {dimension_numbers = #tpu.dot_dimension_numbers<[1], [0], [0], [1], [0, 0, 1, 1], [], []>} : vector<2x64xf32>, vector<64x128xf32>, vector<2x128xf32> -> vector<2x128xf32>
    %c0_12 = arith.constant 0 : index
    %c0_13 = arith.constant 0 : index
    %c0_14 = arith.constant 0 : index
    %13 = vector.load %arg5[%c0_12, %c0_13, %c0_14] : memref<3x1x128xf32, #tpu.memory_space<vmem>>, vector<1x1x128xf32>
    %14 = vector.shape_cast %13 : vector<1x1x128xf32> to vector<1x128xf32>
    %15 = vector.broadcast %14 : vector<1x128xf32> to vector<2x128xf32>
    %16 = arith.addf %12, %15 : vector<2x128xf32>
    %c1 = arith.constant 1 : index
    %c0_15 = arith.constant 0 : index
    %c0_16 = arith.constant 0 : index
    %17 = vector.load %arg4[%c1, %c0_15, %c0_16] : memref<3x64x128xf32, #tpu.memory_space<vmem>>, vector<1x64x128xf32>
    %18 = vector.shape_cast %17 : vector<1x64x128xf32> to vector<64x128xf32>
    %cst_17 = arith.constant dense<0.000000e+00> : vector<2x128xf32>
    %19 = tpu.matmul %9, %18, %cst_17 {dimension_numbers = #tpu.dot_dimension_numbers<[1], [0], [0], [1], [0, 0, 1, 1], [], []>} : vector<2x64xf32>, vector<64x128xf32>, vector<2x128xf32> -> vector<2x128xf32>
    %c1_18 = arith.constant 1 : index
    %c0_19 = arith.constant 0 : index
    %c0_20 = arith.constant 0 : index
    %20 = vector.load %arg5[%c1_18, %c0_19, %c0_20] : memref<3x1x128xf32, #tpu.memory_space<vmem>>, vector<1x1x128xf32>
    %21 = vector.shape_cast %20 : vector<1x1x128xf32> to vector<1x128xf32>
    %22 = vector.broadcast %21 : vector<1x128xf32> to vector<2x128xf32>
    %23 = arith.addf %19, %22 : vector<2x128xf32>
    %c2 = arith.constant 2 : index
    %c0_21 = arith.constant 0 : index
    %c0_22 = arith.constant 0 : index
    %24 = vector.load %arg4[%c2, %c0_21, %c0_22] : memref<3x64x128xf32, #tpu.memory_space<vmem>>, vector<1x64x128xf32>
    %25 = vector.shape_cast %24 : vector<1x64x128xf32> to vector<64x128xf32>
    %cst_23 = arith.constant dense<0.000000e+00> : vector<2x128xf32>
    %26 = tpu.matmul %9, %25, %cst_23 {dimension_numbers = #tpu.dot_dimension_numbers<[1], [0], [0], [1], [0, 0, 1, 1], [], []>} : vector<2x64xf32>, vector<64x128xf32>, vector<2x128xf32> -> vector<2x128xf32>
    %c2_24 = arith.constant 2 : index
    %c0_25 = arith.constant 0 : index
    %c0_26 = arith.constant 0 : index
    %27 = vector.load %arg5[%c2_24, %c0_25, %c0_26] : memref<3x1x128xf32, #tpu.memory_space<vmem>>, vector<1x1x128xf32>
    %28 = vector.shape_cast %27 : vector<1x1x128xf32> to vector<1x128xf32>
    %29 = vector.broadcast %28 : vector<1x128xf32> to vector<2x128xf32>
    %30 = arith.addf %26, %29 : vector<2x128xf32>
    %31 = arith.maximumf %16, %23 : vector<2x128xf32>
    %32 = arith.maximumf %31, %30 : vector<2x128xf32>
    %33 = arith.subf %16, %32 : vector<2x128xf32>
    %34 = math.exp %33 : vector<2x128xf32>
    %35 = arith.subf %23, %32 : vector<2x128xf32>
    %36 = math.exp %35 : vector<2x128xf32>
    %37 = arith.subf %30, %32 : vector<2x128xf32>
    %38 = math.exp %37 : vector<2x128xf32>
    %39 = arith.addf %34, %36 : vector<2x128xf32>
    %40 = arith.addf %39, %38 : vector<2x128xf32>
    %41 = tpu.reciprocal %40 {approx = true} : vector<2x128xf32> -> vector<2x128xf32>
    %42 = arith.mulf %34, %41 : vector<2x128xf32>
    %c0_27 = arith.constant 0 : index
    %c0_28 = arith.constant 0 : index
    %c0_29 = arith.constant 0 : index
    %c0_30 = arith.constant 0 : index
    %43 = vector.load %arg6[%c0_27, %c0_28, %c0_29, %c0_30] : memref<1x3x2x128xf32, #tpu.memory_space<vmem>>, vector<1x1x2x128xf32>
    %44 = vector.shape_cast %43 : vector<1x1x2x128xf32> to vector<2x128xf32>
    %45 = vector.shape_cast %42 : vector<2x128xf32> to vector<1x1x2x128xf32>
    tpu.vector_store %arg6[%c0_27, %c0_28, %c0_29, %c0_30], %45 {strides = array<i32>} : memref<1x3x2x128xf32, #tpu.memory_space<vmem>>, vector<1x1x2x128xf32>,
    %46 = arith.mulf %36, %41 : vector<2x128xf32>
    %c0_31 = arith.constant 0 : index
    %c1_32 = arith.constant 1 : index
    %c0_33 = arith.constant 0 : index
    %c0_34 = arith.constant 0 : index
    %47 = vector.load %arg6[%c0_31, %c1_32, %c0_33, %c0_34] : memref<1x3x2x128xf32, #tpu.memory_space<vmem>>, vector<1x1x2x128xf32>
    %48 = vector.shape_cast %47 : vector<1x1x2x128xf32> to vector<2x128xf32>
    %49 = vector.shape_cast %46 : vector<2x128xf32> to vector<1x1x2x128xf32>
    tpu.vector_store %arg6[%c0_31, %c1_32, %c0_33, %c0_34], %49 {strides = array<i32>} : memref<1x3x2x128xf32, #tpu.memory_space<vmem>>, vector<1x1x2x128xf32>,
    %50 = arith.mulf %38, %41 : vector<2x128xf32>
    %c0_35 = arith.constant 0 : index
    %c2_36 = arith.constant 2 : index
    %c0_37 = arith.constant 0 : index
    %c0_38 = arith.constant 0 : index
    %51 = vector.load %arg6[%c0_35, %c2_36, %c0_37, %c0_38] : memref<1x3x2x128xf32, #tpu.memory_space<vmem>>, vector<1x1x2x128xf32>
    %52 = vector.shape_cast %51 : vector<1x1x2x128xf32> to vector<2x128xf32>
    %53 = vector.shape_cast %50 : vector<2x128xf32> to vector<1x1x2x128xf32>
    tpu.vector_store %arg6[%c0_35, %c2_36, %c0_37, %c0_38], %53 {strides = array<i32>} : memref<1x3x2x128xf32, #tpu.memory_space<vmem>>, vector<1x1x2x128xf32>,
    return
  }
  func.func @transform_0(%arg0: i32) -> (i32, i32) {
    %c0_i32 = arith.constant 0 : i32
    %c0_i32_0 = arith.constant 0 : i32
    %c0_i32_1 = arith.constant 0 : i32
    return %c0_i32, %c0_i32_0 : i32, i32
  }
  func.func @transform_1(%arg0: i32) -> (i32, i32, i32) {
    %c0_i32 = arith.constant 0 : i32
    %c0_i32_0 = arith.constant 0 : i32
    %c0_i32_1 = arith.constant 0 : i32
    return %arg0, %c0_i32, %c0_i32_0 : i32, i32, i32
  }
  func.func @transform_2(%arg0: i32) -> (i32, i32, i32) {
    %c0_i32 = arith.constant 0 : i32
    %c0_i32_0 = arith.constant 0 : i32
    %c0_i32_1 = arith.constant 0 : i32
    return %arg0, %c0_i32, %c0_i32_0 : i32, i32, i32
  }
  func.func @transform_3(%arg0: i32) -> (i32, i32, i32) {
    %c0_i32 = arith.constant 0 : i32
    %c0_i32_0 = arith.constant 0 : i32
    %c0_i32_1 = arith.constant 0 : i32
    return %arg0, %c0_i32, %c0_i32_0 : i32, i32, i32
  }
  func.func @transform_4(%arg0: i32) -> (i32, i32, i32) {
    %c0_i32 = arith.constant 0 : i32
    %c0_i32_0 = arith.constant 0 : i32
    %c0_i32_1 = arith.constant 0 : i32
    return %arg0, %c0_i32, %c0_i32_0 : i32, i32, i32
  }
  func.func @transform_5(%arg0: i32) -> (i32, i32, i32, i32) {
    %c0_i32 = arith.constant 0 : i32
    %c0_i32_0 = arith.constant 0 : i32
    %c0_i32_1 = arith.constant 0 : i32
    %c0_i32_2 = arith.constant 0 : i32
    return %arg0, %c0_i32, %c0_i32_0, %c0_i32_1 : i32, i32, i32, i32
  }
}

module attributes {stable_mosaic.version = 11 : i64} {
  func.func @_sk_apply_kernel(%arg0: i32, %arg1: i32, %arg2: i32, %arg3: memref<3xi32, #tpu.memory_space<smem>>, %arg4: memref<1x2x64x128xbf16, #tpu.memory_space<vmem>>, %arg5: memref<1x1x2x128xf32, #tpu.memory_space<vmem>>, %arg6: memref<1x2x64x128xbf16, #tpu.memory_space<vmem>>, %arg7: memref<2x64x128xf32, #tpu.memory_space<vmem>>) attributes {dimension_semantics = [#tpu.dimension_semantics<parallel>, #tpu.dimension_semantics<parallel>, #tpu.dimension_semantics<arbitrary>], iteration_bounds = array<i64: 1, 1, 3>, scalar_prefetch = 1 : i64, scratch_operands = 1 : i64, tpu.core_type = #tpu.core_type<tc>, window_params = [{transform_indices = @transform_0, window_bounds = array<i64: 1, 2, 64, 128>}, {transform_indices = @transform_1, window_bounds = array<i64: 1, 1, 2, 128>}, {transform_indices = @transform_2, window_bounds = array<i64: 1, 2, 64, 128>}]} {
    %c0_i32 = arith.constant 0 : i32
    %0 = arith.cmpi eq, %arg2, %c0_i32 : i32
    %1 = arith.extui %0 : i1 to i32
    %c0_i32_0 = arith.constant 0 : i32
    %2 = arith.cmpi ne, %1, %c0_i32_0 : i32
    scf.if %2 {
      %cst = arith.constant 0.000000e+00 : f32
      %17 = vector.broadcast %cst : f32 to vector<2x64x128xf32>
      %c0_15 = arith.constant 0 : index
      %c0_16 = arith.constant 0 : index
      %c0_17 = arith.constant 0 : index
      %18 = vector.load %arg7[%c0_15, %c0_16, %c0_17] : memref<2x64x128xf32, #tpu.memory_space<vmem>>, vector<2x64x128xf32>
      tpu.vector_store %arg7[%c0_15, %c0_16, %c0_17], %17 {strides = array<i32>} : memref<2x64x128xf32, #tpu.memory_space<vmem>>, vector<2x64x128xf32>,
    } else {
    }
    %c0 = arith.constant 0 : index
    %c0_1 = arith.constant 0 : index
    %c0_2 = arith.constant 0 : index
    %c0_3 = arith.constant 0 : index
    %3 = vector.load %arg5[%c0, %c0_1, %c0_2, %c0_3] : memref<1x1x2x128xf32, #tpu.memory_space<vmem>>, vector<1x1x2x128xf32>
    %4 = vector.shape_cast %3 : vector<1x1x2x128xf32> to vector<2x128xf32>
    %c0_4 = arith.constant 0 : index
    %c0_5 = arith.constant 0 : index
    %c0_6 = arith.constant 0 : index
    %5 = vector.load %arg7[%c0_4, %c0_5, %c0_6] : memref<2x64x128xf32, #tpu.memory_space<vmem>>, vector<2x64x128xf32>
    %c0_7 = arith.constant 0 : index
    %c0_8 = arith.constant 0 : index
    %c0_9 = arith.constant 0 : index
    %c0_10 = arith.constant 0 : index
    %6 = vector.load %arg4[%c0_7, %c0_8, %c0_9, %c0_10] : memref<1x2x64x128xbf16, #tpu.memory_space<vmem>>, vector<1x2x64x128xbf16>
    %7 = vector.shape_cast %6 : vector<1x2x64x128xbf16> to vector<2x64x128xbf16>
    %8 = arith.extf %7 : vector<2x64x128xbf16> to vector<2x64x128xf32>
    %9 = vector.shape_cast %4 : vector<2x128xf32> to vector<2x1x128xf32>
    %10 = vector.broadcast %9 : vector<2x1x128xf32> to vector<2x64x128xf32>
    %11 = arith.mulf %8, %10 : vector<2x64x128xf32>
    %12 = arith.addf %5, %11 : vector<2x64x128xf32>
    %c0_11 = arith.constant 0 : index
    %c0_12 = arith.constant 0 : index
    %c0_13 = arith.constant 0 : index
    %13 = vector.load %arg7[%c0_11, %c0_12, %c0_13] : memref<2x64x128xf32, #tpu.memory_space<vmem>>, vector<2x64x128xf32>
    tpu.vector_store %arg7[%c0_11, %c0_12, %c0_13], %12 {strides = array<i32>} : memref<2x64x128xf32, #tpu.memory_space<vmem>>, vector<2x64x128xf32>,
    %c2_i32 = arith.constant 2 : i32
    %14 = arith.cmpi eq, %arg2, %c2_i32 : i32
    %15 = arith.extui %14 : i1 to i32
    %c0_i32_14 = arith.constant 0 : i32
    %16 = arith.cmpi ne, %15, %c0_i32_14 : i32
    scf.if %16 {
      %c0_15 = arith.constant 0 : index
      %c0_16 = arith.constant 0 : index
      %c0_17 = arith.constant 0 : index
      %17 = vector.load %arg7[%c0_15, %c0_16, %c0_17] : memref<2x64x128xf32, #tpu.memory_space<vmem>>, vector<2x64x128xf32>
      %18 = arith.truncf %17 : vector<2x64x128xf32> to vector<2x64x128xbf16>
      %c0_18 = arith.constant 0 : index
      %c0_19 = arith.constant 0 : index
      %c0_20 = arith.constant 0 : index
      %c0_21 = arith.constant 0 : index
      %19 = vector.load %arg6[%c0_18, %c0_19, %c0_20, %c0_21] : memref<1x2x64x128xbf16, #tpu.memory_space<vmem>>, vector<1x2x64x128xbf16>
      %20 = vector.shape_cast %19 : vector<1x2x64x128xbf16> to vector<2x64x128xbf16>
      %21 = vector.shape_cast %18 : vector<2x64x128xbf16> to vector<1x2x64x128xbf16>
      tpu.vector_store %arg6[%c0_18, %c0_19, %c0_20, %c0_21], %21 {strides = array<i32>} : memref<1x2x64x128xbf16, #tpu.memory_space<vmem>>, vector<1x2x64x128xbf16>,
    } else {
    }
    return
  }
  func.func @transform_0(%arg0: i32, %arg1: i32, %arg2: i32, %arg3: memref<3xi32, #tpu.memory_space<smem>>) -> (i32, i32, i32, i32) {
    %c3_i32 = arith.constant 3 : i32
    %0 = arith.muli %arg0, %c3_i32 : i32
    %1 = arith.addi %0, %arg2 : i32
    %2 = arith.index_cast %1 : i32 to index
    %3 = memref.load %arg3[%2] : memref<3xi32, #tpu.memory_space<smem>>
    %c0_i32 = arith.constant 0 : i32
    %c0_i32_0 = arith.constant 0 : i32
    %c0_i32_1 = arith.constant 0 : i32
    return %3, %c0_i32, %arg1, %c0_i32_0 : i32, i32, i32, i32
  }
  func.func @transform_1(%arg0: i32, %arg1: i32, %arg2: i32, %arg3: memref<3xi32, #tpu.memory_space<smem>>) -> (i32, i32, i32, i32) {
    %c0_i32 = arith.constant 0 : i32
    %c0_i32_0 = arith.constant 0 : i32
    %c0_i32_1 = arith.constant 0 : i32
    return %arg0, %arg2, %c0_i32, %c0_i32_0 : i32, i32, i32, i32
  }
  func.func @transform_2(%arg0: i32, %arg1: i32, %arg2: i32, %arg3: memref<3xi32, #tpu.memory_space<smem>>) -> (i32, i32, i32, i32) {
    %c0_i32 = arith.constant 0 : i32
    %c0_i32_0 = arith.constant 0 : i32
    %c0_i32_1 = arith.constant 0 : i32
    return %arg0, %c0_i32, %arg1, %c0_i32_0 : i32, i32, i32, i32
  }
}

module attributes {stable_mosaic.version = 11 : i64} {
  func.func @_heads_kernel(%arg0: i32, %arg1: memref<1x128x128xbf16, #tpu.memory_space<vmem>>, %arg2: memref<1x128x128xbf16, #tpu.memory_space<vmem>>, %arg3: memref<1x128xf32, #tpu.memory_space<vmem>>, %arg4: memref<128x128xbf16, #tpu.memory_space<vmem>>) attributes {dimension_semantics = [#tpu.dimension_semantics<parallel>], iteration_bounds = array<i64: 1>, scalar_prefetch = 0 : i64, scratch_operands = 0 : i64, tpu.core_type = #tpu.core_type<tc>, window_params = [{transform_indices = @transform_0, window_bounds = array<i64: 1, 128, 128>}, {pipeline_mode = #tpu.pipeline_mode<synchronous>, transform_indices = @transform_1, window_bounds = array<i64: 1, 128, 128>}, {pipeline_mode = #tpu.pipeline_mode<synchronous>, transform_indices = @transform_2, window_bounds = array<i64: 1, 128>}, {transform_indices = @transform_3, window_bounds = array<i64: 128, 128>}]} {
    %cst = arith.constant 0.000000e+00 : f32
    %0 = vector.broadcast %cst : f32 to vector<128x128xf32>
    %c0 = arith.constant 0 : index
    %c0_0 = arith.constant 0 : index
    %c0_1 = arith.constant 0 : index
    %1 = vector.load %arg1[%c0, %c0_0, %c0_1] : memref<1x128x128xbf16, #tpu.memory_space<vmem>>, vector<1x128x128xbf16>
    %2 = vector.shape_cast %1 : vector<1x128x128xbf16> to vector<128x128xbf16>
    %c0_2 = arith.constant 0 : index
    %c0_3 = arith.constant 0 : index
    %c0_4 = arith.constant 0 : index
    %3 = vector.load %arg2[%c0_2, %c0_3, %c0_4] : memref<1x128x128xbf16, #tpu.memory_space<vmem>>, vector<1x128x128xbf16>
    %4 = vector.shape_cast %3 : vector<1x128x128xbf16> to vector<128x128xbf16>
    %cst_5 = arith.constant dense<0.000000e+00> : vector<128x128xf32>
    %5 = tpu.matmul %2, %4, %cst_5 {dimension_numbers = #tpu.dot_dimension_numbers<[1], [0], [0], [1], [0, 0, 1, 1], [], []>} : vector<128x128xbf16>, vector<128x128xbf16>, vector<128x128xf32> -> vector<128x128xf32>
    %6 = arith.addf %0, %5 : vector<128x128xf32>
    %c0_6 = arith.constant 0 : index
    %c0_7 = arith.constant 0 : index
    %7 = vector.load %arg3[%c0_6, %c0_7] : memref<1x128xf32, #tpu.memory_space<vmem>>, vector<1x128xf32>
    %8 = vector.broadcast %7 : vector<1x128xf32> to vector<128x128xf32>
    %9 = arith.addf %6, %8 : vector<128x128xf32>
    %10 = arith.truncf %9 : vector<128x128xf32> to vector<128x128xbf16>
    %c0_8 = arith.constant 0 : index
    %c0_9 = arith.constant 0 : index
    %11 = vector.load %arg4[%c0_8, %c0_9] : memref<128x128xbf16, #tpu.memory_space<vmem>>, vector<128x128xbf16>
    tpu.vector_store %arg4[%c0_8, %c0_9], %10 {strides = array<i32>} : memref<128x128xbf16, #tpu.memory_space<vmem>>, vector<128x128xbf16>,
    return
  }
  func.func @transform_0(%arg0: i32) -> (i32, i32, i32) {
    %c0_i32 = arith.constant 0 : i32
    %c0_i32_0 = arith.constant 0 : i32
    %c0_i32_1 = arith.constant 0 : i32
    return %c0_i32, %arg0, %c0_i32_0 : i32, i32, i32
  }
  func.func @transform_1(%arg0: i32) -> (i32, i32, i32) {
    %c0_i32 = arith.constant 0 : i32
    %c0_i32_0 = arith.constant 0 : i32
    %c0_i32_1 = arith.constant 0 : i32
    %c0_i32_2 = arith.constant 0 : i32
    return %c0_i32, %c0_i32_0, %c0_i32_1 : i32, i32, i32
  }
  func.func @transform_2(%arg0: i32) -> (i32, i32) {
    %c0_i32 = arith.constant 0 : i32
    %c0_i32_0 = arith.constant 0 : i32
    %c0_i32_1 = arith.constant 0 : i32
    return %c0_i32, %c0_i32_0 : i32, i32
  }
  func.func @transform_3(%arg0: i32) -> (i32, i32) {
    %c0_i32 = arith.constant 0 : i32
    %c0_i32_0 = arith.constant 0 : i32
    return %arg0, %c0_i32 : i32, i32
  }
}

module attributes {stable_mosaic.version = 11 : i64} {
  func.func @_heads_kernel(%arg0: i32, %arg1: memref<3x128x128xbf16, #tpu.memory_space<vmem>>, %arg2: memref<3x128x128xbf16, #tpu.memory_space<vmem>>, %arg3: memref<1x128xf32, #tpu.memory_space<vmem>>, %arg4: memref<128x128xbf16, #tpu.memory_space<vmem>>) attributes {dimension_semantics = [#tpu.dimension_semantics<parallel>], iteration_bounds = array<i64: 1>, scalar_prefetch = 0 : i64, scratch_operands = 0 : i64, tpu.core_type = #tpu.core_type<tc>, window_params = [{transform_indices = @transform_0, window_bounds = array<i64: 3, 128, 128>}, {pipeline_mode = #tpu.pipeline_mode<synchronous>, transform_indices = @transform_1, window_bounds = array<i64: 3, 128, 128>}, {pipeline_mode = #tpu.pipeline_mode<synchronous>, transform_indices = @transform_2, window_bounds = array<i64: 1, 128>}, {transform_indices = @transform_3, window_bounds = array<i64: 128, 128>}]} {
    %cst = arith.constant 0.000000e+00 : f32
    %0 = vector.broadcast %cst : f32 to vector<128x128xf32>
    %c0 = arith.constant 0 : index
    %c0_0 = arith.constant 0 : index
    %c0_1 = arith.constant 0 : index
    %1 = vector.load %arg1[%c0, %c0_0, %c0_1] : memref<3x128x128xbf16, #tpu.memory_space<vmem>>, vector<1x128x128xbf16>
    %2 = vector.shape_cast %1 : vector<1x128x128xbf16> to vector<128x128xbf16>
    %c0_2 = arith.constant 0 : index
    %c0_3 = arith.constant 0 : index
    %c0_4 = arith.constant 0 : index
    %3 = vector.load %arg2[%c0_2, %c0_3, %c0_4] : memref<3x128x128xbf16, #tpu.memory_space<vmem>>, vector<1x128x128xbf16>
    %4 = vector.shape_cast %3 : vector<1x128x128xbf16> to vector<128x128xbf16>
    %cst_5 = arith.constant dense<0.000000e+00> : vector<128x128xf32>
    %5 = tpu.matmul %2, %4, %cst_5 {dimension_numbers = #tpu.dot_dimension_numbers<[1], [0], [0], [1], [0, 0, 1, 1], [], []>} : vector<128x128xbf16>, vector<128x128xbf16>, vector<128x128xf32> -> vector<128x128xf32>
    %6 = arith.addf %0, %5 : vector<128x128xf32>
    %c1 = arith.constant 1 : index
    %c0_6 = arith.constant 0 : index
    %c0_7 = arith.constant 0 : index
    %7 = vector.load %arg1[%c1, %c0_6, %c0_7] : memref<3x128x128xbf16, #tpu.memory_space<vmem>>, vector<1x128x128xbf16>
    %8 = vector.shape_cast %7 : vector<1x128x128xbf16> to vector<128x128xbf16>
    %c1_8 = arith.constant 1 : index
    %c0_9 = arith.constant 0 : index
    %c0_10 = arith.constant 0 : index
    %9 = vector.load %arg2[%c1_8, %c0_9, %c0_10] : memref<3x128x128xbf16, #tpu.memory_space<vmem>>, vector<1x128x128xbf16>
    %10 = vector.shape_cast %9 : vector<1x128x128xbf16> to vector<128x128xbf16>
    %cst_11 = arith.constant dense<0.000000e+00> : vector<128x128xf32>
    %11 = tpu.matmul %8, %10, %cst_11 {dimension_numbers = #tpu.dot_dimension_numbers<[1], [0], [0], [1], [0, 0, 1, 1], [], []>} : vector<128x128xbf16>, vector<128x128xbf16>, vector<128x128xf32> -> vector<128x128xf32>
    %12 = arith.addf %6, %11 : vector<128x128xf32>
    %c2 = arith.constant 2 : index
    %c0_12 = arith.constant 0 : index
    %c0_13 = arith.constant 0 : index
    %13 = vector.load %arg1[%c2, %c0_12, %c0_13] : memref<3x128x128xbf16, #tpu.memory_space<vmem>>, vector<1x128x128xbf16>
    %14 = vector.shape_cast %13 : vector<1x128x128xbf16> to vector<128x128xbf16>
    %c2_14 = arith.constant 2 : index
    %c0_15 = arith.constant 0 : index
    %c0_16 = arith.constant 0 : index
    %15 = vector.load %arg2[%c2_14, %c0_15, %c0_16] : memref<3x128x128xbf16, #tpu.memory_space<vmem>>, vector<1x128x128xbf16>
    %16 = vector.shape_cast %15 : vector<1x128x128xbf16> to vector<128x128xbf16>
    %cst_17 = arith.constant dense<0.000000e+00> : vector<128x128xf32>
    %17 = tpu.matmul %14, %16, %cst_17 {dimension_numbers = #tpu.dot_dimension_numbers<[1], [0], [0], [1], [0, 0, 1, 1], [], []>} : vector<128x128xbf16>, vector<128x128xbf16>, vector<128x128xf32> -> vector<128x128xf32>
    %18 = arith.addf %12, %17 : vector<128x128xf32>
    %c0_18 = arith.constant 0 : index
    %c0_19 = arith.constant 0 : index
    %19 = vector.load %arg3[%c0_18, %c0_19] : memref<1x128xf32, #tpu.memory_space<vmem>>, vector<1x128xf32>
    %20 = vector.broadcast %19 : vector<1x128xf32> to vector<128x128xf32>
    %21 = arith.addf %18, %20 : vector<128x128xf32>
    %22 = arith.truncf %21 : vector<128x128xf32> to vector<128x128xbf16>
    %c0_20 = arith.constant 0 : index
    %c0_21 = arith.constant 0 : index
    %23 = vector.load %arg4[%c0_20, %c0_21] : memref<128x128xbf16, #tpu.memory_space<vmem>>, vector<128x128xbf16>
    tpu.vector_store %arg4[%c0_20, %c0_21], %22 {strides = array<i32>} : memref<128x128xbf16, #tpu.memory_space<vmem>>, vector<128x128xbf16>,
    return
  }
  func.func @transform_0(%arg0: i32) -> (i32, i32, i32) {
    %c0_i32 = arith.constant 0 : i32
    %c0_i32_0 = arith.constant 0 : i32
    %c0_i32_1 = arith.constant 0 : i32
    return %c0_i32, %arg0, %c0_i32_0 : i32, i32, i32
  }
  func.func @transform_1(%arg0: i32) -> (i32, i32, i32) {
    %c0_i32 = arith.constant 0 : i32
    %c0_i32_0 = arith.constant 0 : i32
    %c0_i32_1 = arith.constant 0 : i32
    %c0_i32_2 = arith.constant 0 : i32
    return %c0_i32, %c0_i32_0, %c0_i32_1 : i32, i32, i32
  }
  func.func @transform_2(%arg0: i32) -> (i32, i32) {
    %c0_i32 = arith.constant 0 : i32
    %c0_i32_0 = arith.constant 0 : i32
    %c0_i32_1 = arith.constant 0 : i32
    return %c0_i32, %c0_i32_0 : i32, i32
  }
  func.func @transform_3(%arg0: i32) -> (i32, i32) {
    %c0_i32 = arith.constant 0 : i32
    %c0_i32_0 = arith.constant 0 : i32
    return %arg0, %c0_i32 : i32, i32
  }
}

</mosaic_0001>

<bundles_post_ra>
// kernel: forward.10
= control target key start
LH: loop header
LB: loop body
LE: loop exit
PB: predicated region body
PF: predicated region fallthrough
CT: control target
= control target key end

     0   :  { %s582_s18 = smov [#allocation3]   ;;  %s654_s0 = inlined_call_operand.vmem [shape: s32[23], index: 0, kind: input, shape index: {}]   ;;  %s655_s1 = inlined_call_operand.vmem [shape: bf16[184,16], index: 1, kind: input, shape index: {}]   ;;  %s656_s2 = inlined_call_operand.vmem [shape: bf16[5,16,168], index: 2, kind: input, shape index: {}]   ;;  %s657_s3 = inlined_call_operand.vmem [shape: bf16[5,168,128], index: 3, kind: input, shape index: {}]   ;;  %s658_s4 = inlined_call_operand.vmem [shape: bf16[184,128], index: 4, kind: output, shape index: {}]  }
   0x1   :  { %s10_s17 = sshll.u32 %s654_s0, 4  ;;  %s11_s17 = int_to_ptr.vmem [resolvable:$true] %s10_s17 }
   0x2   :  { %13 = dma.vmem_to_smem %s11_s17, 16, %s582_s18, [#allocation2] }
   0x3   :  { %576 = dma.done.wait [#allocation2], 16 }
   0x4   :  { %577 = vsyncadd [#allocation2], 4294967280 }
   0x5   :  { %16 = sfence }
   0x6   :  { %s611_s19 = smov 0  }
   0x7 LB: > { %s474_s20 = sadd.s32 4294967295, %s580_s19   ;;  %p478_p0 = scmp.ge.s32.totalorder %s580_s19, 1  ;;  %s580_s19 = sphi %s611_s19, %s22_s19  }
   0x8   : > { %p173_p1 = scmp.lt.s32.totalorder %s580_s19, 24 }
   0xa   : > { %p174_p2 = pnand %p478_p0, %p173_p1 }
   0xb   : > { %s211_s0 = sld [smem:[#allocation3 + %s474_s20]] (!%p174_p2)  ;;  %p207_p3 = scmp.lt.s32.totalorder (!%p174_p2), %s474_s20, 22 }
   0xc   : > { %177 = sbr.rel (%p174_p2) target bundleno = 299 (0x12b), region = 32  ;;  %s218_s21 = sld [smem:[#allocation3 + %s474_s20]] (!%p174_p2) }
  0x11   : > { %s660_s20 = smov (!%p207_p3, %s474_s20), 22  ;;  %p212_p4 = scmp.lt.s32.totalorder %s211_s0, 4  ;;  %vm243_vm0 = vcmask 130048   ;;  %vm365_vm1 = vcmask 1043456   ;;  %vm361_vm2 = vcmask 326656  }
  0x12   : > { %s479_s22 = sshll.u32 %s660_s20, 2  ;;  %p219_p5 = scmp.lt.s32.totalorder %s218_s21, 4 }
  0x13   : > { %s662_s0 = smov (!%p212_p4, %s211_s0), 4  ;;  %s210_s30 = scalar_lea.vmem %s655_s1, %s479_s22 }
  0x14   : > { %s664_s21 = smov (!%p219_p5, %s218_s21), 4  ;;  %s537_s23 = sshll.u32 %s662_s0, 4  ;;  %v230_v7 = vld [vmem:[%s210_s30] sm:$0xf] }
  0x15   : > { %s216_s26 = scalar_lea.vmem %s656_s2, %s537_s23  ;;  %s550_s27 = smul.u32 84, %s664_s21 }
  0x16   : > { %v486_v0 = vld [vmem:[%s216_s26] sm:$0xf]  ;;  %v539_v1 = vld [vmem:[%s216_s26 + $0x4] sm:$0xf0]  ;;  %v538_v2 = vld [vmem:[%s216_s26 + $0x4] sm:$0xf]  ;;  %s228_s10 = scalar_lea.vmem %s658_s4, %s479_s22 }
  0x17   : > { %v487_v3 = vor.u32 %v539_v1, %v486_v0  ;;  %v488_v4 = vld [vmem:[%s216_s26 + $0x8] sm:$0xf0]  ;;  %s633_s7 = scalar_lea.vmem %s657_s3, %s550_s27 }
  0x18   : > { %v491_v5 = vor.u32 %v538_v2, %v488_v4  ;;  %v547_v6 = vld [vmem:[%s633_s7 + $0x38] sm:$0xff]  ;;  %v546_v8 = vld [vmem:[%s633_s7 + $0x30] sm:$0xff]  ;;  %v545_v12 = vld [vmem:[%s633_s7 + $0x28] sm:$0xff] }
  0x19   : > { %254 = vmatpush.bf16.msra.mxu0 %v487_v3  ;;  %369 = vmatpush.bf16.msra.mxu2 %v547_v6  ;;  %v297_v9 = vld [vmem:[%s633_s7 + $0x50] sm:$0xf]  ;;  %v549_v14 = vld [vmem:[%s633_s7 + $0x48] sm:$0xff]  ;;  %v544_v15 = vld [vmem:[%s633_s7 + $0x20] sm:$0xff] }
  0x1a   : > { %267 = vmatpush.bf16.msra.mxu1 %v491_v5  ;;  %v339_v10 = vunpack.c.l.b16 %v297_v9  ;;  %v543_v16 = vld [vmem:[%s633_s7 + $0x18] sm:$0xff]  ;;  %v542_v17 = vld [vmem:[%s633_s7 + $0x10] sm:$0xff]  ;;  %v541_v18 = vld [vmem:[%s633_s7 + $0x8] sm:$0xff] }
  0x1b   : > { %v540_v19 = vld [vmem:[%s633_s7] sm:$0xff] }
  0x1c   : > { %492 = vmatmul.msk.bf16.vlgmr.msra.gmra.mxu0 %vm243_vm0, %v230_v7  ;;  %v350_v11 = vpack.c.b16 %v339_v10, %v339_v10  ;;  %v548_v20 = vld [vmem:[%s633_s7 + $0x40] sm:$0xff] }
  0x1d   : > { %493 = vmatmul.msk.bf16.vlgmr.msra.gmra.mxu1 %vm243_vm0, %v230_v7  ;;  %370 = vmatpush.bf16.msra.mxu2 %v546_v8 }
  0x1e   : > { %v367_v13 = vsel %vm365_vm1, %v350_v11, 0 }
  0x1f   : > { %387 = vmatpush.bf16.msra.mxu3 %v367_v13 }
  0x21   : > { %371 = vmatpush.bf16.msra.mxu2 %v545_v12 }
  0x23   : > { %388 = vmatpush.bf16.msra.mxu3 %v549_v14 }
  0x25   : > { %372 = vmatpush.bf16.msra.mxu2 %v544_v15 }
  0x27   : > { %389 = vmatpush.bf16.msra.mxu3 %v548_v20 }
  0x29   : > { %373 = vmatpush.bf16.msra.mxu2 %v543_v16 }
  0x2d   : > { %374 = vmatpush.bf16.msra.mxu2 %v542_v17 }
  0x31   : > { %375 = vmatpush.bf16.msra.mxu2 %v541_v18 }
  0x35   : > { %376 = vmatpush.bf16.msra.mxu2 %v540_v19 }
  0x99   : > { %v256_v21 = vpop.f32.mrf.mxu0 }
  0x9a   : > { %v273_v22 = vmax.f32 %v256_v21, 0.0  ;;  %v269_v23 = vpop.f32.mrf.mxu1 }
  0x9b   : > { %v274_v24 = vmax.f32 %v269_v23, 0.0 }
  0x9c   : > { %v275_v25 = vpack.c.bf16 %v273_v22, %v273_v22 }
  0x9d   : > { %v276_v26 = vpack.c.bf16 %v274_v24, %v274_v24 }
  0x9e   : > { %377 = vmatmul.bf16.vlgmr.msra.gmra.mxu2 %v275_v25 }
  0x9f   : > { %534 = vmatmul.msk.bf16.vlgmr.msra.gmra.mxu3 %vm361_vm2, %v276_v26 }
  0xa1   : > { %v258_v27 = vpop.f32.mrf.mxu0 }
  0xa2   : > { %v271_v28 = vpop.f32.mrf.mxu1 }
 0x121   : > { %v378_v29 = vpop.f32.mrf.mxu2 }
 0x122   : > { %v391_v30 = vpop.f32.mrf.mxu3 }
 0x123   : > { %v392_v31 = vadd.f32 %v391_v30, %v378_v29 }
 0x125   : > { %v395_v32 = vpack.c.bf16 %v392_v31, %v392_v31 }
 0x127   : > { %396 = vst [vmem:[%s228_s10] sm:$0xf] %v395_v32 }
 0x129   : > { %v380_v33 = vpop.f32.mrf.mxu2 }
 0x12a   : > { %v393_v34 = vpop.f32.mrf.mxu3 }
 0x12b PF: > { %s22_s19 = sadd.s32 1, %s580_s19  }
 0x12c   : > { %p19_p6 = scmp.ge.s32.totalorder %s22_s19, 25  }
 0x12e   :  { %21 = sbr.rel (!%p19_p6) target bundleno = 7 (0x7), region = 68 }

// kernel: forward.12
= control target key start
LH: loop header
LB: loop body
LE: loop exit
PB: predicated region body
PF: predicated region fallthrough
CT: control target
= control target key end

     0   :  { %s393_s6 = smov 0   ;;  %s395_s7 = smov 0   ;;  %s431_s0 = inlined_call_operand.vmem [shape: bf16[5,2,64,128], index: 0, kind: input, shape index: {}]   ;;  %s432_s1 = inlined_call_operand.vmem [shape: f32[5,2,128], index: 1, kind: output, shape index: {}]  }
   0x1   :  { %s397_s8 = smov 0  }
   0x2 LB: > { %s23_s9 = sadd.s32 1, %s376_s7  ;;  %p287_p0 = scmp.ge.s32.totalorder %s380_s8, 1  ;;  %s380_s8 = sphi %s397_s8, %s11_s8   ;;  %s376_s7 = sphi %s395_s7, %s434_s7   ;;  %s372_s6 = sphi %s393_s6, %s433_s6  }
   0x3   : > { %p25_p1 = scmp.ge.s32.totalorder %s23_s9, 5  ;;  %p106_p2 = scmp.lt.s32.totalorder %s380_s8, 6 }
   0x5   : > { %s436_s9 = smov (%p25_p1, %s23_s9), 0  ;;  %p107_p3 = pnand %p287_p0, %p106_p2 }
   0x6   : > { %p130_p4 = scmp.lt.s32.totalorder (!%p107_p3), %s372_s6, 4 }
   0x7   : > { %110 = sbr.rel (%p107_p3) target bundleno = 51 (0x33), region = 24 }
   0xc   : > { %s438_s6 = smov (!%p130_p4, %s372_s6), 4  ;;  %v382_v0 = vmov 0.0   ;;  %vm211_vm0 = vcmask 1041409  }
   0xd   : > { %s293_s10 = sshll.u32 %s438_s6, 6  ;;  %s290_s11 = sshll.u32 %s438_s6, 1 }
   0xe   : > { %s137_s14 = scalar_lea.vmem %s431_s0, %s293_s10  ;;  %s417_s17 = scalar_lea.vmem %s432_s1, %s290_s11 }
   0xf   : > { %147 = vst [vmem:[%s417_s17] sm:$0x3] %v382_v0  ;;  %v295_v1 = vld [vmem:[%s137_s14] sm:$0xff]   ;;  %v326_v2 = vld [vmem:[%s137_s14 + $0x8] sm:$0xff]   ;;  %v327_v8 = vld [vmem:[%s137_s14 + $0x10] sm:$0xff]  }
  0x10   : > { %v296_v3 = vunpack.c.l.bf16 %v295_v1  ;;  %v297_v4 = vunpack.c.h.bf16 %v295_v1  ;;  %v300_v5 = vunpack.c.l.bf16 %v326_v2  ;;  %v329_v6 = vld [vmem:[%s137_s14 + $0x20] sm:$0xff]   ;;  %v330_v7 = vld [vmem:[%s137_s14 + $0x28] sm:$0xff]   ;;  %v301_v12 = vunpack.c.h.bf16 %v326_v2  ;;  %v331_v13 = vld [vmem:[%s137_s14 + $0x30] sm:$0xff]  }
  0x11   : > { %v312_v9 = vunpack.c.l.bf16 %v329_v6  ;;  %v313_v10 = vunpack.c.h.bf16 %v329_v6  ;;  %v316_v11 = vunpack.c.l.bf16 %v330_v7  ;;  %v317_v15 = vunpack.c.h.bf16 %v330_v7  ;;  %v328_v21 = vld [vmem:[%s137_s14 + $0x18] sm:$0xff]  }
  0x12   : > { %v181_v14 = vadd.f32 %v297_v4, %v296_v3  ;;  %v304_v17 = vunpack.c.l.bf16 %v327_v8  ;;  %v320_v19 = vunpack.c.l.bf16 %v331_v13  ;;  %v305_v22 = vunpack.c.h.bf16 %v327_v8  ;;  %v332_v23 = vld [vmem:[%s137_s14 + $0x38] sm:$0xff]  }
  0x13   : > { %v194_v16 = vadd.f32 %v313_v10, %v312_v9  ;;  %v321_v25 = vunpack.c.h.bf16 %v331_v13  ;;  %v308_v27 = vunpack.c.l.bf16 %v328_v21  ;;  %v324_v29 = vunpack.c.l.bf16 %v332_v23 }
  0x14   : > { %v182_v18 = vadd.f32 %v300_v5, %v181_v14  ;;  %v309_v31 = vunpack.c.h.bf16 %v328_v21  ;;  %v325_v33 = vunpack.c.h.bf16 %v332_v23 }
  0x15   : > { %v195_v20 = vadd.f32 %v316_v11, %v194_v16 }
  0x16   : > { %v183_v24 = vadd.f32 %v301_v12, %v182_v18  ;;  %v180_v52 = vld [vmem:[%s417_s17] sm:$0x3] }
  0x17   : > { %v196_v26 = vadd.f32 %v317_v15, %v195_v20 }
  0x18   : > { %v184_v28 = vadd.f32 %v304_v17, %v183_v24 }
  0x19   : > { %v197_v30 = vadd.f32 %v320_v19, %v196_v26 }
  0x1a   : > { %v185_v32 = vadd.f32 %v305_v22, %v184_v28 }
  0x1b   : > { %v198_v34 = vadd.f32 %v321_v25, %v197_v30 }
  0x1c   : > { %v186_v35 = vadd.f32 %v308_v27, %v185_v32 }
  0x1d   : > { %v199_v36 = vadd.f32 %v324_v29, %v198_v34 }
  0x1e   : > { %v187_v37 = vadd.f32 %v309_v31, %v186_v35 }
  0x1f   : > { %v200_v38 = vadd.f32 %v325_v33, %v199_v36 }
  0x20   : > { %v188_v39 = vrot.slane %v187_v37, 4 }
  0x21   : > { %v201_v40 = vrot.slane %v200_v38, 4 }
  0x22   : > { %v189_v41 = vadd.f32 %v188_v39, %v187_v37 }
  0x23   : > { %v202_v42 = vadd.f32 %v201_v40, %v200_v38 }
  0x24   : > { %v190_v43 = vrot.slane %v189_v41, 2 }
  0x25   : > { %v203_v44 = vrot.slane %v202_v42, 2 }
  0x26   : > { %v191_v45 = vadd.f32 %v190_v43, %v189_v41 }
  0x27   : > { %v204_v46 = vadd.f32 %v203_v44, %v202_v42 }
  0x28   : > { %v192_v47 = vrot.slane %v191_v45, 1 }
  0x29   : > { %v205_v48 = vrot.slane %v204_v46, 1 }
  0x2a   : > { %v193_v49 = vadd.f32 %v192_v47, %v191_v45 }
  0x2b   : > { %v206_v50 = vadd.f32 %v205_v48, %v204_v46 }
  0x2c   : > { %v207_v51 = vmul.f32 0.015625, %v193_v49 }
  0x2d   : > { %v208_v53 = vmul.f32 0.015625, %v206_v50 }
  0x2f   : > { %v212_v54 = vsel %vm211_vm0, %v208_v53, %v207_v51 }
  0x30   : > { %v214_v55 = vadd.f32 %v212_v54, %v180_v52 }
  0x32   : > { %215 = vst [vmem:[%s417_s17] sm:$0x3] %v214_v55 }
  0x33 PF: > { %s11_s8 = sadd.s32 1, %s380_s8   ;;  %s433_s6 = smov %s376_s7 }
  0x34   : > { %p8_p5 = scmp.ge.s32.totalorder %s11_s8, 7   ;;  %s434_s7 = smov %s436_s9 }
  0x36   :  { %10 = sbr.rel (!%p8_p5) target bundleno = 2 (0x2), region = 58 }

// kernel: forward.13
= control target key start
LH: loop header
LB: loop body
LE: loop exit
PB: predicated region body
PF: predicated region fallthrough
CT: control target
= control target key end

     0   :  { %s791_s18 = smov 0   ;;  %s965_s0 = inlined_call_operand.vmem [shape: f32[2,640], index: 0, kind: input, shape index: {}]   ;;  %s966_s1 = inlined_call_operand.vmem [shape: f32[3,640,64], index: 1, kind: input, shape index: {}]   ;;  %s967_s2 = inlined_call_operand.vmem [shape: f32[3,1,64], index: 2, kind: input, shape index: {}]   ;;  %s968_s3 = inlined_call_operand.vmem [shape: f32[9,64,128], index: 3, kind: input, shape index: {}]   ;;  %s969_s4 = inlined_call_operand.vmem [shape: f32[9,1,128], index: 4, kind: input, shape index: {}]   ;;  %s970_s5 = inlined_call_operand.vmem [shape: f32[3,3,2,128], index: 5, kind: output, shape index: {}]  }
   0x1 LB: > { %s797_s19 = sadd.s32 4294967295, %s759_s18   ;;  %p700_p0 = scmp.ge.s32.totalorder %s759_s18, 1  ;;  %s759_s18 = sphi %s791_s18, %s15_s18  }
   0x2   : > { %p217_p1 = scmp.lt.s32.totalorder %s759_s18, 4 }
   0x4   : > { %p218_p2 = pnand %p700_p0, %p217_p1 }
   0x5   : > { %p258_p3 = scmp.lt.s32.totalorder (!%p218_p2), %s797_s19, 2  ;;  %s266_s28 = smul.u32 (!%p218_p2), 3, %s797_s19 }
   0x6   : > { %221 = sbr.rel (%p218_p2) target bundleno = 376 (0x178), region = 40 }
   0x7   : > { %p863_p4 = scmp.lt.s32.totalorder (!%p218_p2), %s266_s28, 8 }
   0xb   : > { %s803_s20 = scalar_select %p258_p3, %s797_s19, 2  ;;  %v283_v49 = vld [vmem:[%s965_s0] sm:$0xff]  ;;  %v284_v54 = vld [vmem:[%s965_s0 + $0x8] sm:$0x3]  ;;  %vm497_vm0 = vcmask 523264  }
   0xc   : > { %371 = vst [vmem:[#allocation1] ss:$4 sm:$0xff] %v283_v49  ;;  %s973_s28 = smov (!%p863_p4, %s266_s28), 8 }
   0xd   : > { %s731_s21 = smul.u32 640, %s803_s20  ;;  %s265_s24 = scalar_lea.vmem %s967_s2, %s803_s20  ;;  %373 = vst [vmem:[#allocation1 + $0x20] ss:$4 sm:$0xff] %v284_v54 }
   0xe   : > { %s730_s9 = sshll.u32 %s973_s28, 6  ;;  %s927_s15 = scalar_lea.vmem %s969_s4, %s973_s28 }
   0xf   : > { %s813_s27 = scalar_lea.vmem %s966_s1, %s731_s21  ;;  %s904_s12 = scalar_lea.vmem %s968_s3, %s730_s9 }
  0x10   : > { %v300_v0 = vld [vmem:[%s813_s27 + $0x78] sm:$0xff]  ;;  %v299_v1 = vld [vmem:[%s813_s27 + $0x70] sm:$0xff]  ;;  %v298_v2 = vld [vmem:[%s813_s27 + $0x68] sm:$0xff]  ;;  %s732_s19 = smul.u32 6, %s803_s20 }
  0x11   : > { %384 = vmatpush.msra.mxu0 %v300_v0  ;;  %v332_v3 = vld [vmem:[%s813_s27 + $0x178] sm:$0xff]  ;;  %v297_v4 = vld [vmem:[%s813_s27 + $0x60] sm:$0xff]  ;;  %v331_v5 = vld [vmem:[%s813_s27 + $0x170] sm:$0xff] }
  0x12   : > { %424 = vmatpush.msra.mxu2 %v332_v3  ;;  %v348_v6 = vld [vmem:[%s813_s27 + $0x1f8] sm:$0xff]  ;;  %v330_v8 = vld [vmem:[%s813_s27 + $0x168] sm:$0xff]  ;;  %v347_v10 = vld [vmem:[%s813_s27 + $0x1f0] sm:$0xff]  ;;  %s282_s23 = scalar_lea.vmem %s970_s5, %s732_s19 }
  0x13   : > { %385 = vmatpush.msra.mxu0 %v299_v1  ;;  %444 = vmatpush.msra.mxu3 %v348_v6  ;;  %v316_v7 = vld [vmem:[%s813_s27 + $0xf8] sm:$0xff]  ;;  %v315_v11 = vld [vmem:[%s813_s27 + $0xf0] sm:$0xff]  ;;  %v329_v12 = vld [vmem:[%s813_s27 + $0x160] sm:$0xff] }
  0x14   : > { %v296_v9 = vld [vmem:[%s813_s27 + $0x58] sm:$0xff]  ;;  %425 = vmatpush.msra.mxu2 %v331_v5  ;;  %404 = vmatpush.msra.mxu1 %v316_v7  ;;  %v346_v13 = vld [vmem:[%s813_s27 + $0x1e8] sm:$0xff]  ;;  %v295_v14 = vld [vmem:[%s813_s27 + $0x50] sm:$0xff] }
  0x15   : > { %386 = vmatpush.msra.mxu0 %v298_v2  ;;  %445 = vmatpush.msra.mxu3 %v347_v10  ;;  %v314_v15 = vld [vmem:[%s813_s27 + $0xe8] sm:$0xff]  ;;  %v345_v16 = vld [vmem:[%s813_s27 + $0x1e0] sm:$0xff]  ;;  %v328_v17 = vld [vmem:[%s813_s27 + $0x158] sm:$0xff] }
  0x16   : > { %426 = vmatpush.msra.mxu2 %v330_v8  ;;  %405 = vmatpush.msra.mxu1 %v315_v11  ;;  %v313_v18 = vld [vmem:[%s813_s27 + $0xe0] sm:$0xff]  ;;  %v294_v19 = vld [vmem:[%s813_s27 + $0x48] sm:$0xff]  ;;  %v344_v20 = vld [vmem:[%s813_s27 + $0x1d8] sm:$0xff] }
  0x17   : > { %387 = vmatpush.msra.mxu0 %v297_v4  ;;  %446 = vmatpush.msra.mxu3 %v346_v13  ;;  %v327_v21 = vld [vmem:[%s813_s27 + $0x150] sm:$0xff]  ;;  %v312_v22 = vld [vmem:[%s813_s27 + $0xd8] sm:$0xff]  ;;  %v293_v23 = vld [vmem:[%s813_s27 + $0x40] sm:$0xff] }
  0x18   : > { %427 = vmatpush.msra.mxu2 %v329_v12  ;;  %406 = vmatpush.msra.mxu1 %v314_v15  ;;  %v343_v24 = vld [vmem:[%s813_s27 + $0x1d0] sm:$0xff]  ;;  %v326_v25 = vld [vmem:[%s813_s27 + $0x148] sm:$0xff]  ;;  %v292_v27 = vld [vmem:[%s813_s27 + $0x38] sm:$0xff] }
  0x19   : > { %388 = vmatpush.msra.mxu0 %v296_v9  ;;  %447 = vmatpush.msra.mxu3 %v345_v16  ;;  %v311_v26 = vld [vmem:[%s813_s27 + $0xd0] sm:$0xff]  ;;  %v342_v28 = vld [vmem:[%s813_s27 + $0x1c8] sm:$0xff]  ;;  %v325_v29 = vld [vmem:[%s813_s27 + $0x140] sm:$0xff] }
  0x1a   : > { %428 = vmatpush.msra.mxu2 %v328_v17  ;;  %407 = vmatpush.msra.mxu1 %v313_v18  ;;  %v310_v30 = vld [vmem:[%s813_s27 + $0xc8] sm:$0xff]  ;;  %v291_v31 = vld [vmem:[%s813_s27 + $0x30] sm:$0xff]  ;;  %v341_v32 = vld [vmem:[%s813_s27 + $0x1c0] sm:$0xff] }
  0x1b   : > { %389 = vmatpush.msra.mxu0 %v295_v14  ;;  %448 = vmatpush.msra.mxu3 %v344_v20  ;;  %v324_v33 = vld [vmem:[%s813_s27 + $0x138] sm:$0xff]  ;;  %v309_v34 = vld [vmem:[%s813_s27 + $0xc0] sm:$0xff]  ;;  %v290_v35 = vld [vmem:[%s813_s27 + $0x28] sm:$0xff] }
  0x1c   : > { %429 = vmatpush.msra.mxu2 %v327_v21  ;;  %408 = vmatpush.msra.mxu1 %v312_v22  ;;  %v340_v36 = vld [vmem:[%s813_s27 + $0x1b8] sm:$0xff]  ;;  %v323_v37 = vld [vmem:[%s813_s27 + $0x130] sm:$0xff]  ;;  %v289_v39 = vld [vmem:[%s813_s27 + $0x20] sm:$0xff] }
  0x1d   : > { %390 = vmatpush.msra.mxu0 %v294_v19  ;;  %449 = vmatpush.msra.mxu3 %v343_v24  ;;  %v308_v38 = vld [vmem:[%s813_s27 + $0xb8] sm:$0xff]  ;;  %v339_v40 = vld [vmem:[%s813_s27 + $0x1b0] sm:$0xff]  ;;  %v322_v41 = vld [vmem:[%s813_s27 + $0x128] sm:$0xff] }
  0x1e   : > { %430 = vmatpush.msra.mxu2 %v326_v25  ;;  %409 = vmatpush.msra.mxu1 %v311_v26  ;;  %v307_v42 = vld [vmem:[%s813_s27 + $0xb0] sm:$0xff]  ;;  %v288_v43 = vld [vmem:[%s813_s27 + $0x18] sm:$0xff]  ;;  %v338_v44 = vld [vmem:[%s813_s27 + $0x1a8] sm:$0xff] }
  0x1f   : > { %391 = vmatpush.msra.mxu0 %v293_v23  ;;  %450 = vmatpush.msra.mxu3 %v342_v28  ;;  %v321_v45 = vld [vmem:[%s813_s27 + $0x120] sm:$0xff]  ;;  %v306_v46 = vld [vmem:[%s813_s27 + $0xa8] sm:$0xff]  ;;  %v287_v47 = vld [vmem:[%s813_s27 + $0x10] sm:$0xff] }
  0x20   : > { %431 = vmatpush.msra.mxu2 %v325_v29  ;;  %410 = vmatpush.msra.mxu1 %v310_v30  ;;  %v337_v48 = vld [vmem:[%s813_s27 + $0x1a0] sm:$0xff]  ;;  %v320_v50 = vld [vmem:[%s813_s27 + $0x118] sm:$0xff]  ;;  %v286_v52 = vld [vmem:[%s813_s27 + $0x8] sm:$0xff] }
  0x21   : > { %392 = vmatpush.msra.mxu0 %v292_v27  ;;  %451 = vmatpush.msra.mxu3 %v341_v32  ;;  %v305_v51 = vld [vmem:[%s813_s27 + $0xa0] sm:$0xff]  ;;  %v336_v53 = vld [vmem:[%s813_s27 + $0x198] sm:$0xff]  ;;  %v319_v55 = vld [vmem:[%s813_s27 + $0x110] sm:$0xff] }
  0x22   : > { %432 = vmatpush.msra.mxu2 %v324_v33  ;;  %411 = vmatpush.msra.mxu1 %v309_v34  ;;  %v304_v56 = vld [vmem:[%s813_s27 + $0x98] sm:$0xff]  ;;  %v285_v57 = vld [vmem:[%s813_s27] sm:$0xff]  ;;  %v335_v58 = vld [vmem:[%s813_s27 + $0x190] sm:$0xff] }
  0x23   : > { %393 = vmatpush.msra.mxu0 %v291_v31  ;;  %452 = vmatpush.msra.mxu3 %v340_v36  ;;  %v364_v59 = vld [vmem:[%s813_s27 + $0x278] sm:$0xff]  ;;  %v318_v60 = vld [vmem:[%s813_s27 + $0x108] sm:$0xff]  ;;  %v303_v61 = vld [vmem:[%s813_s27 + $0x90] sm:$0xff] }
  0x24   : > { %433 = vmatpush.msra.mxu2 %v323_v37  ;;  %412 = vmatpush.msra.mxu1 %v308_v38  ;;  %v334_v62 = vld [vmem:[%s813_s27 + $0x188] sm:$0xff]  ;;  %v363_v63 = vld [vmem:[%s813_s27 + $0x270] sm:$0xff]  ;;  %v317_v0 = vld [vmem:[%s813_s27 + $0x100] sm:$0xff] }
  0x25   : > { %394 = vmatpush.msra.mxu0 %v290_v35  ;;  %453 = vmatpush.msra.mxu3 %v339_v40  ;;  %v376_v1 = vld.sshfl [vmem:[#allocation1 + $0x10] sm:$0xff pattern:$0x73625140]  ;;  %v302_v2 = vld [vmem:[%s813_s27 + $0x88] sm:$0xff]  ;;  %v333_v4 = vld [vmem:[%s813_s27 + $0x180] sm:$0xff] }
  0x26   : > { %434 = vmatpush.msra.mxu2 %v322_v41  ;;  %413 = vmatpush.msra.mxu1 %v307_v42  ;;  %v362_v3 = vld [vmem:[%s813_s27 + $0x268] sm:$0xff]  ;;  %v374_v5 = vld.sshfl [vmem:[#allocation1] sm:$0xff pattern:$0x73625140]  ;;  %v713_v10 = vld [vmem:[%s904_s12 + $0x78] sm:$0xff] }
  0x27   : > { %395 = vmatpush.msra.mxu0 %v289_v39  ;;  %454 = vmatpush.msra.mxu3 %v338_v44  ;;  %v377_v6 = vld.sshfl [vmem:[#allocation1 + $0x18] sm:$0xff pattern:$0x73625140]  ;;  %v361_v7 = vld [vmem:[%s813_s27 + $0x260] sm:$0xff]  ;;  %v359_v14 = vld [vmem:[%s813_s27 + $0x250] sm:$0xff] }
  0x28   : > { %435 = vmatpush.msra.mxu2 %v321_v45  ;;  %414 = vmatpush.msra.mxu1 %v306_v46  ;;  %v301_v8 = vld [vmem:[%s813_s27 + $0x80] sm:$0xff]  ;;  %v375_v9 = vld.sshfl [vmem:[#allocation1 + $0x8] sm:$0xff pattern:$0x73625140]  ;;  %v360_v11 = vld [vmem:[%s813_s27 + $0x258] sm:$0xff] }
  0x29   : > { %396 = vmatpush.msra.mxu0 %v288_v43  ;;  %455 = vmatpush.msra.mxu3 %v337_v48  ;;  %v492_v12 = vld [vmem:[%s904_s12 + $0x38] sm:$0xff]  ;;  %v358_v15 = vld [vmem:[%s813_s27 + $0x248] sm:$0xff]  ;;  %v357_v16 = vld [vmem:[%s813_s27 + $0x240] sm:$0xff] }
  0x2a   : > { %436 = vmatpush.msra.mxu2 %v320_v50  ;;  %415 = vmatpush.msra.mxu1 %v305_v51  ;;  %v723_v13 = vld [vmem:[%s904_s12 + $0xb8] sm:$0xff]  ;;  %v355_v18 = vld [vmem:[%s813_s27 + $0x230] sm:$0xff]  ;;  %v354_v19 = vld [vmem:[%s813_s27 + $0x228] sm:$0xff] }
  0x2b   : > { %397 = vmatpush.msra.mxu0 %v287_v47  ;;  %456 = vmatpush.msra.mxu3 %v336_v53  ;;  %v356_v17 = vld [vmem:[%s813_s27 + $0x238] sm:$0xff]  ;;  %v353_v20 = vld [vmem:[%s813_s27 + $0x220] sm:$0xff]  ;;  %v351_v22 = vld [vmem:[%s813_s27 + $0x210] sm:$0xff] }
  0x2c   : > { %437 = vmatpush.msra.mxu2 %v319_v55  ;;  %416 = vmatpush.msra.mxu1 %v304_v56  ;;  %v352_v21 = vld [vmem:[%s813_s27 + $0x218] sm:$0xff]  ;;  %v350_v23 = vld [vmem:[%s813_s27 + $0x208] sm:$0xff]  ;;  %v349_v24 = vld [vmem:[%s813_s27 + $0x200] sm:$0xff] }
  0x2d   : > { %398 = vmatpush.msra.mxu0 %v286_v52  ;;  %457 = vmatpush.msra.mxu3 %v335_v58  ;;  %v378_v25 = vld.sshfl [vmem:[#allocation1 + $0x20] sm:$0xff pattern:$0x73625140]  ;;  %v491_v26 = vld [vmem:[%s904_s12 + $0x30] sm:$0xff]  ;;  %v490_v29 = vld [vmem:[%s904_s12 + $0x28] sm:$0xff] }
  0x2e   : > { %438 = vmatpush.msra.mxu2 %v318_v60  ;;  %417 = vmatpush.msra.mxu1 %v303_v61  ;;  %v712_v27 = vld [vmem:[%s904_s12 + $0x70] sm:$0xff]  ;;  %v711_v30 = vld [vmem:[%s904_s12 + $0x68] sm:$0xff]  ;;  %v489_v32 = vld [vmem:[%s904_s12 + $0x20] sm:$0xff] }
  0x2f   : > { %399 = vmatpush.msra.mxu0 %v285_v57  ;;  %458 = vmatpush.msra.mxu3 %v334_v62  ;;  %v722_v28 = vld [vmem:[%s904_s12 + $0xb0] sm:$0xff]  ;;  %v721_v31 = vld [vmem:[%s904_s12 + $0xa8] sm:$0xff]  ;;  %v710_v33 = vld [vmem:[%s904_s12 + $0x60] sm:$0xff] }
  0x30   : > { %439 = vmatpush.msra.mxu2 %v317_v0  ;;  %418 = vmatpush.msra.mxu1 %v302_v2  ;;  %v720_v34 = vld [vmem:[%s904_s12 + $0xa0] sm:$0xff]  ;;  %v488_v35 = vld [vmem:[%s904_s12 + $0x18] sm:$0xff]  ;;  %v487_v38 = vld [vmem:[%s904_s12 + $0x10] sm:$0xff] }
  0x31   : > { %464 = vmatpush.msrb.mxu0 %v364_v59  ;;  %440 = vmatmul.f32.vlgmr.msra.gmra.mxu2 %v376_v1  ;;  %v709_v36 = vld [vmem:[%s904_s12 + $0x58] sm:$0xff]  ;;  %v708_v39 = vld [vmem:[%s904_s12 + $0x50] sm:$0xff]  ;;  %v486_v41 = vld [vmem:[%s904_s12 + $0x8] sm:$0xff] }
  0x32   : > { %459 = vmatpush.msra.mxu3 %v333_v4  ;;  %400 = vmatmul.f32.vlgmr.msra.gmra.mxu0 %v374_v5  ;;  %v719_v37 = vld [vmem:[%s904_s12 + $0x98] sm:$0xff]  ;;  %v718_v40 = vld [vmem:[%s904_s12 + $0x90] sm:$0xff]  ;;  %v707_v42 = vld [vmem:[%s904_s12 + $0x48] sm:$0xff] }
  0x33   : > { %465 = vmatpush.msrb.mxu0 %v363_v63  ;;  %460 = vmatmul.f32.vlgmr.msra.gmra.mxu3 %v377_v6  ;;  %v717_v43 = vld [vmem:[%s904_s12 + $0x88] sm:$0xff]  ;;  %v485_v44 = vld [vmem:[%s904_s12] sm:$0xff] }
  0x34   : > { %419 = vmatpush.msra.mxu1 %v301_v8  ;;  %543 = vmatpush.msrb.mxu2 %v713_v10  ;;  %v706_v45 = vld [vmem:[%s904_s12 + $0x40] sm:$0xff] }
  0x35   : > { %466 = vmatpush.msrb.mxu0 %v362_v3  ;;  %420 = vmatmul.f32.vlgmr.msra.gmra.mxu1 %v375_v9  ;;  %v716_v46 = vld [vmem:[%s904_s12 + $0x80] sm:$0xff] }
  0x36   : > { %509 = vmatpush.msrb.mxu1 %v492_v12  ;;  %577 = vmatpush.msrb.mxu3 %v723_v13  ;;  %v741_v47 = vld [vmem:[%s265_s24] ss:$0 sm:$0xff]  ;;  %v743_v60 = vld [vmem:[%s927_s15 + $0x1] ss:$0 sm:$0xff]  ;;  %v744_v62 = vld [vmem:[%s927_s15 + $0x2] ss:$0 sm:$0xff] }
  0x37   : > { %467 = vmatpush.msrb.mxu0 %v361_v7  ;;  %544 = vmatpush.msrb.mxu2 %v712_v27  ;;  %v742_v59 = vld [vmem:[%s927_s15] ss:$0 sm:$0xff] }
  0x38   : > { %510 = vmatpush.msrb.mxu1 %v491_v26  ;;  %578 = vmatpush.msrb.mxu3 %v722_v28 }
  0x39   : > { %468 = vmatpush.msrb.mxu0 %v360_v11  ;;  %545 = vmatpush.msrb.mxu2 %v711_v30 }
  0x3a   : > { %511 = vmatpush.msrb.mxu1 %v490_v29  ;;  %579 = vmatpush.msrb.mxu3 %v721_v31 }
  0x3b   : > { %469 = vmatpush.msrb.mxu0 %v359_v14  ;;  %546 = vmatpush.msrb.mxu2 %v710_v33 }
  0x3c   : > { %512 = vmatpush.msrb.mxu1 %v489_v32  ;;  %580 = vmatpush.msrb.mxu3 %v720_v34 }
  0x3d   : > { %470 = vmatpush.msrb.mxu0 %v358_v15  ;;  %547 = vmatpush.msrb.mxu2 %v709_v36 }
  0x3e   : > { %513 = vmatpush.msrb.mxu1 %v488_v35  ;;  %581 = vmatpush.msrb.mxu3 %v719_v37 }
  0x3f   : > { %471 = vmatpush.msrb.mxu0 %v357_v16  ;;  %548 = vmatpush.msrb.mxu2 %v708_v39 }
  0x40   : > { %514 = vmatpush.msrb.mxu1 %v487_v38  ;;  %582 = vmatpush.msrb.mxu3 %v718_v40 }
  0x41   : > { %472 = vmatpush.msrb.mxu0 %v356_v17  ;;  %549 = vmatpush.msrb.mxu2 %v707_v42 }
  0x42   : > { %515 = vmatpush.msrb.mxu1 %v486_v41  ;;  %583 = vmatpush.msrb.mxu3 %v717_v43 }
  0x43   : > { %473 = vmatpush.msrb.mxu0 %v355_v18  ;;  %550 = vmatpush.msrb.mxu2 %v706_v45 }
  0x44   : > { %516 = vmatpush.msrb.mxu1 %v485_v44  ;;  %584 = vmatpush.msrb.mxu3 %v716_v46 }
  0x45   : > { %474 = vmatpush.msrb.mxu0 %v354_v19 }
  0x47   : > { %475 = vmatpush.msrb.mxu0 %v353_v20 }
  0x49   : > { %476 = vmatpush.msrb.mxu0 %v352_v21 }
  0x4b   : > { %477 = vmatpush.msrb.mxu0 %v351_v22 }
  0x4d   : > { %478 = vmatpush.msrb.mxu0 %v350_v23 }
  0x4f   : > { %479 = vmatpush.msrb.mxu0 %v349_v24 }
  0x50   : > { %480 = vmatmul.f32.vlgmr.msrb.gmra.mxu0 %v378_v25 }
  0xaf   : > { %v401_v48 = vpop.f32.mrf.mxu0 }
  0xb0   : > { %v402_v49 = vadd.f32 %v741_v47, %v401_v48 }
  0xb2   : > { %v421_v50 = vpop.f32.mrf.mxu1 }
  0xb3   : > { %v422_v51 = vadd.f32 %v421_v50, %v402_v49 }
  0xb4   : > { %v441_v52 = vpop.f32.mrf.mxu2 }
  0xb5   : > { %v442_v53 = vadd.f32 %v441_v52, %v422_v51 }
  0xb6   : > { %v461_v54 = vpop.f32.mrf.mxu3 }
  0xb7   : > { %v462_v55 = vadd.f32 %v461_v54, %v442_v53 }
  0xcd   : > { %v481_v56 = vpop.f32.mrf.mxu0 }
  0xce   : > { %v482_v57 = vadd.f32 %v481_v56, %v462_v55 }
  0xd0   : > { %v484_v58 = vmax.f32 %v482_v57, 0.0 }
  0xd2   : > { %705 = vmatmul.msk.f32.vlgmr.msrb.gmra.mxu1 %vm497_vm0, %v484_v58  ;;  %715 = vmatmul.msk.f32.vlgmr.msrb.gmra.mxu2 %vm497_vm0, %v484_v58 }
  0xd3   : > { %725 = vmatmul.msk.f32.vlgmr.msrb.gmra.mxu3 %vm497_vm0, %v484_v58 }
 0x14f   : > { %v518_v61 = vpop.f32.mrf.mxu1 }
 0x150   : > { %v519_v0 = vadd.f32 %v742_v59, %v518_v61 }
 0x155   : > { %v552_v63 = vpop.f32.mrf.mxu2 }
 0x156   : > { %v553_v1 = vadd.f32 %v743_v60, %v552_v63  ;;  %v586_v2 = vpop.f32.mrf.mxu3 }
 0x157   : > { %v587_v4 = vadd.f32 %v744_v62, %v586_v2 }
 0x158   : > { %v589_v3 = vmax.f32 %v519_v0, %v553_v1 }
 0x15a   : > { %v590_v5 = vmax.f32 %v589_v3, %v587_v4 }
 0x15c   : > { %v591_v6 = vsub.f32 %v519_v0, %v590_v5  ;;  %v594_v7 = vsub.f32 %v553_v1, %v590_v5  ;;  %v597_v8 = vsub.f32 %v587_v4, %v590_v5 }
 0x15e   : > { %v592_v9 = vmul.f32 1.442695, %v591_v6  ;;  %v595_v10 = vmul.f32 1.442695, %v594_v7  ;;  %v598_v11 = vmul.f32 1.442695, %v597_v8 }
 0x160   : > { %745 = vpow2.f32 %v592_v9 }
 0x161   : > { %747 = vpow2.f32 %v595_v10 }
 0x162   : > { %749 = vpow2.f32 %v598_v11 }
 0x166   : > { %v746_v12 = vpop.eup %745 }
 0x167   : > { %v748_v13 = vpop.eup %747 }
 0x168   : > { %v600_v14 = vadd.f32 %v748_v13, %v746_v12  ;;  %v750_v15 = vpop.eup %749 }
 0x16a   : > { %v601_v16 = vadd.f32 %v750_v15, %v600_v14 }
 0x16c   : > { %751 = vrcp.f32 %v601_v16 }
 0x172   : > { %v752_v17 = vpop.eup %751 }
 0x173   : > { %v603_v18 = vmul.f32 %v752_v17, %v746_v12  ;;  %v605_v19 = vmul.f32 %v752_v17, %v748_v13  ;;  %v608_v20 = vmul.f32 %v752_v17, %v750_v15 }
 0x175   : > { %604 = vst [vmem:[%s282_s23] sm:$0x3] %v603_v18 }
 0x176   : > { %726 = vst [vmem:[%s282_s23 + $0x2] sm:$0x3] %v605_v19 }
 0x177   : > { %727 = vst [vmem:[%s282_s23 + $0x4] sm:$0x3] %v608_v20 }
 0x178 PF: > { %s15_s18 = sadd.s32 1, %s759_s18  }
 0x179   : > { %p12_p5 = scmp.ge.s32.totalorder %s15_s18, 5  }
 0x17b   :  { %14 = sbr.rel (!%p12_p5) target bundleno = 1 (0x1), region = 86 }

// kernel: forward.11
= control target key start
LH: loop header
LB: loop body
LE: loop exit
PB: predicated region body
PF: predicated region fallthrough
CT: control target
= control target key end

     0   :  { %s1952_s1 = inlined_call_operand.vmem [shape: bf16[5,128,128], index: 1, kind: input, shape index: {}]   ;;  %s1953_s0 = inlined_call_operand.vmem [shape: bf16[5,128,128], index: 0, kind: input, shape index: {}]   ;;  %s1954_s2 = inlined_call_operand.vmem [shape: f32[1,128], index: 2, kind: input, shape index: {}]   ;;  %s1955_s3 = inlined_call_operand.vmem [shape: bf16[128,128], index: 3, kind: output, shape index: {}]  }
   0x1   :  { %v1490_v0 = vld [vmem:[%s1952_s1 + $0x78] sm:$0xff]  ;;  %v1489_v1 = vld [vmem:[%s1952_s1 + $0x70] sm:$0xff]  ;;  %v1488_v2 = vld [vmem:[%s1952_s1 + $0x68] sm:$0xff] }
   0x2   :  { %1586 = vmatpush.bf16.msra.mxu1 %v1490_v0  ;;  %1587 = vmatpush.bf16.msra.mxu2 %v1490_v0  ;;  %v1487_v3 = vld [vmem:[%s1952_s1 + $0x60] sm:$0xff]  ;;  %v1486_v4 = vld [vmem:[%s1952_s1 + $0x58] sm:$0xff]  ;;  %v1485_v5 = vld [vmem:[%s1952_s1 + $0x50] sm:$0xff] }
   0x3   :  { %1588 = vmatpush.bf16.msra.mxu3 %v1490_v0  ;;  %176 = vmatpush.bf16.msra.mxu0 %v1490_v0  ;;  %v1484_v6 = vld [vmem:[%s1952_s1 + $0x48] sm:$0xff]  ;;  %v1483_v7 = vld [vmem:[%s1952_s1 + $0x40] sm:$0xff]  ;;  %v1506_v8 = vld [vmem:[%s1952_s1 + $0xb8] sm:$0xff] }
   0x4   :  { %v1474_v9 = vld [vmem:[%s1952_s1 + $0x38] sm:$0xff]  ;;  %v1477_v10 = vld [vmem:[%s1953_s0 + $0x50] sm:$0xff]  ;;  %v1479_v11 = vld [vmem:[%s1953_s0 + $0x60] sm:$0xff] }
   0x5   :  { %v1481_v12 = vld [vmem:[%s1953_s0 + $0x70] sm:$0xff]  ;;  %v1475_v13 = vld [vmem:[%s1953_s0 + $0x40] sm:$0xff]  ;;  %v1522_v14 = vld [vmem:[%s1952_s1 + $0xf8] sm:$0xff] }
   0x6   :  { %1589 = vmatpush.bf16.msra.mxu1 %v1489_v1  ;;  %1590 = vmatpush.bf16.msra.mxu2 %v1489_v1  ;;  %v1538_v15 = vld [vmem:[%s1952_s1 + $0x138] sm:$0xff]  ;;  %v1505_v16 = vld [vmem:[%s1952_s1 + $0xb0] sm:$0xff]  ;;  %v1504_v20 = vld [vmem:[%s1952_s1 + $0xa8] sm:$0xff] }
   0x7   :  { %1591 = vmatpush.bf16.msra.mxu3 %v1489_v1  ;;  %177 = vmatpush.bf16.msra.mxu0 %v1489_v1  ;;  %v1473_v17 = vld [vmem:[%s1952_s1 + $0x30] sm:$0xff]  ;;  %v1472_v21 = vld [vmem:[%s1952_s1 + $0x28] sm:$0xff]  ;;  %v1503_v24 = vld [vmem:[%s1952_s1 + $0xa0] sm:$0xff] }
   0x8   :  { %v1521_v18 = vld [vmem:[%s1952_s1 + $0xf0] sm:$0xff]  ;;  %v1520_v22 = vld [vmem:[%s1952_s1 + $0xe8] sm:$0xff]  ;;  %v1471_v25 = vld [vmem:[%s1952_s1 + $0x20] sm:$0xff] }
   0x9   :  { %v1537_v19 = vld [vmem:[%s1952_s1 + $0x130] sm:$0xff]  ;;  %v1536_v23 = vld [vmem:[%s1952_s1 + $0x128] sm:$0xff]  ;;  %v1519_v26 = vld [vmem:[%s1952_s1 + $0xe0] sm:$0xff] }
   0xa   :  { %1592 = vmatpush.bf16.msra.mxu1 %v1488_v2  ;;  %1593 = vmatpush.bf16.msra.mxu2 %v1488_v2  ;;  %v1535_v27 = vld [vmem:[%s1952_s1 + $0x120] sm:$0xff]  ;;  %v1502_v28 = vld [vmem:[%s1952_s1 + $0x98] sm:$0xff]  ;;  %v1480_v31 = vld [vmem:[%s1953_s0 + $0x68] sm:$0xff] }
   0xb   :  { %1594 = vmatpush.bf16.msra.mxu3 %v1488_v2  ;;  %178 = vmatpush.bf16.msra.mxu0 %v1488_v2  ;;  %v1470_v29 = vld [vmem:[%s1952_s1 + $0x18] sm:$0xff]  ;;  %v1476_v33 = vld [vmem:[%s1953_s0 + $0x48] sm:$0xff]  ;;  %v1501_v36 = vld [vmem:[%s1952_s1 + $0x90] sm:$0xff] }
   0xc   :  { %v1478_v30 = vld [vmem:[%s1953_s0 + $0x58] sm:$0xff]  ;;  %v1469_v37 = vld [vmem:[%s1952_s1 + $0x10] sm:$0xff]  ;;  %v1500_v40 = vld [vmem:[%s1952_s1 + $0x88] sm:$0xff] }
   0xd   :  { %v1482_v32 = vld [vmem:[%s1953_s0 + $0x78] sm:$0xff]  ;;  %v1517_v38 = vld [vmem:[%s1952_s1 + $0xd0] sm:$0xff]  ;;  %v1468_v41 = vld [vmem:[%s1952_s1 + $0x8] sm:$0xff] }
   0xe   :  { %1595 = vmatpush.bf16.msra.mxu1 %v1487_v3  ;;  %1596 = vmatpush.bf16.msra.mxu2 %v1487_v3  ;;  %v1518_v34 = vld [vmem:[%s1952_s1 + $0xd8] sm:$0xff]  ;;  %v1533_v39 = vld [vmem:[%s1952_s1 + $0x110] sm:$0xff]  ;;  %v1516_v42 = vld [vmem:[%s1952_s1 + $0xc8] sm:$0xff] }
   0xf   :  { %1597 = vmatpush.bf16.msra.mxu3 %v1487_v3  ;;  %179 = vmatpush.bf16.msra.mxu0 %v1487_v3  ;;  %v1534_v35 = vld [vmem:[%s1952_s1 + $0x118] sm:$0xff]  ;;  %v1532_v43 = vld [vmem:[%s1952_s1 + $0x108] sm:$0xff]  ;;  %v1499_v44 = vld [vmem:[%s1952_s1 + $0x80] sm:$0xff] }
  0x10   :  { %v1467_v45 = vld [vmem:[%s1952_s1] sm:$0xff]  ;;  %v1460_v52 = vld [vmem:[%s1953_s0 + $0x8] sm:$0xff]  ;;  %v1461_v56 = vld [vmem:[%s1953_s0 + $0x10] sm:$0xff] }
  0x11   :  { %v1515_v46 = vld [vmem:[%s1952_s1 + $0xc0] sm:$0xff]  ;;  %v1492_v53 = vld [vmem:[%s1953_s0 + $0x88] sm:$0xff]  ;;  %v1493_v57 = vld [vmem:[%s1953_s0 + $0x90] sm:$0xff] }
  0x12   :  { %1598 = vmatpush.bf16.msra.mxu1 %v1486_v4  ;;  %1599 = vmatpush.bf16.msra.mxu2 %v1486_v4  ;;  %v1531_v47 = vld [vmem:[%s1952_s1 + $0x100] sm:$0xff]  ;;  %v1508_v54 = vld [vmem:[%s1953_s0 + $0xc8] sm:$0xff]  ;;  %v1509_v58 = vld [vmem:[%s1953_s0 + $0xd0] sm:$0xff] }
  0x13   :  { %1600 = vmatpush.bf16.msra.mxu3 %v1486_v4  ;;  %180 = vmatpush.bf16.msra.mxu0 %v1486_v4  ;;  %v1459_v48 = vld [vmem:[%s1953_s0] sm:$0xff]  ;;  %v1524_v55 = vld [vmem:[%s1953_s0 + $0x108] sm:$0xff]  ;;  %v1525_v59 = vld [vmem:[%s1953_s0 + $0x110] sm:$0xff] }
  0x14   :  { %v1491_v49 = vld [vmem:[%s1953_s0 + $0x80] sm:$0xff]  ;;  %v1462_v60 = vld [vmem:[%s1953_s0 + $0x18] sm:$0xff]  ;;  %v1464_v4 = vld [vmem:[%s1953_s0 + $0x28] sm:$0xff] }
  0x15   :  { %v1507_v50 = vld [vmem:[%s1953_s0 + $0xc0] sm:$0xff]  ;;  %v1494_v61 = vld [vmem:[%s1953_s0 + $0x98] sm:$0xff] }
  0x16   :  { %1601 = vmatpush.bf16.msra.mxu1 %v1485_v5  ;;  %1602 = vmatpush.bf16.msra.mxu2 %v1485_v5  ;;  %v1523_v51 = vld [vmem:[%s1953_s0 + $0x100] sm:$0xff]  ;;  %v1510_v62 = vld [vmem:[%s1953_s0 + $0xd8] sm:$0xff] }
  0x17   :  { %1603 = vmatpush.bf16.msra.mxu3 %v1485_v5  ;;  %181 = vmatpush.bf16.msra.mxu0 %v1485_v5  ;;  %v1526_v63 = vld [vmem:[%s1953_s0 + $0x118] sm:$0xff]  ;;  %v1463_v0 = vld [vmem:[%s1953_s0 + $0x20] sm:$0xff]  ;;  %v1496_v5 = vld [vmem:[%s1953_s0 + $0xa8] sm:$0xff] }
  0x18   :  { %v1495_v1 = vld [vmem:[%s1953_s0 + $0xa0] sm:$0xff] }
  0x19   :  { %v1511_v2 = vld [vmem:[%s1953_s0 + $0xe0] sm:$0xff] }
  0x1a   :  { %1604 = vmatpush.bf16.msra.mxu1 %v1484_v6  ;;  %1605 = vmatpush.bf16.msra.mxu2 %v1484_v6  ;;  %v1527_v3 = vld [vmem:[%s1953_s0 + $0x120] sm:$0xff] }
  0x1b   :  { %1606 = vmatpush.bf16.msra.mxu3 %v1484_v6  ;;  %182 = vmatpush.bf16.msra.mxu0 %v1484_v6  ;;  %v1512_v6 = vld [vmem:[%s1953_s0 + $0xe8] sm:$0xff] }
  0x1e   :  { %1607 = vmatpush.bf16.msra.mxu1 %v1483_v7  ;;  %1608 = vmatpush.bf16.msra.mxu2 %v1483_v7 }
  0x1f   :  { %1609 = vmatpush.bf16.msra.mxu3 %v1483_v7  ;;  %183 = vmatpush.bf16.msra.mxu0 %v1483_v7  ;;  %v1528_v7 = vld [vmem:[%s1953_s0 + $0x128] sm:$0xff] }
  0x21   :  { %194 = vmatmul.bf16.vlgmr.msra.gmra.mxu1 %v1477_v10  ;;  %204 = vmatmul.bf16.vlgmr.msra.gmra.mxu2 %v1479_v11  ;;  %v1513_v11 = vld [vmem:[%s1953_s0 + $0xf0] sm:$0xff] }
  0x22   :  { %500 = vmatpush.bf16.msrb.mxu2 %v1506_v8  ;;  %321 = vmatpush.bf16.msrb.mxu1 %v1474_v9  ;;  %v1465_v8 = vld [vmem:[%s1953_s0 + $0x30] sm:$0xff] }
  0x23   :  { %214 = vmatmul.bf16.vlgmr.msra.gmra.mxu3 %v1481_v12  ;;  %184 = vmatmul.bf16.vlgmr.msra.gmra.mxu0 %v1475_v13  ;;  %v1497_v9 = vld [vmem:[%s1953_s0 + $0xb0] sm:$0xff] }
  0x24   :  { %695 = vmatpush.bf16.msrb.mxu3 %v1522_v14  ;;  %890 = vmatpush.bf16.msrb.mxu0 %v1538_v15  ;;  %v1529_v12 = vld [vmem:[%s1953_s0 + $0x130] sm:$0xff] }
  0x26   :  { %501 = vmatpush.bf16.msrb.mxu2 %v1505_v16  ;;  %322 = vmatpush.bf16.msrb.mxu1 %v1473_v17 }
  0x28   :  { %696 = vmatpush.bf16.msrb.mxu3 %v1521_v18  ;;  %891 = vmatpush.bf16.msrb.mxu0 %v1537_v19 }
  0x2a   :  { %502 = vmatpush.bf16.msrb.mxu2 %v1504_v20  ;;  %323 = vmatpush.bf16.msrb.mxu1 %v1472_v21  ;;  %v1466_v20 = vld [vmem:[%s1953_s0 + $0x38] sm:$0xff] }
  0x2b   :  { %v1498_v21 = vld [vmem:[%s1953_s0 + $0xb8] sm:$0xff] }
  0x2c   :  { %697 = vmatpush.bf16.msrb.mxu3 %v1520_v22  ;;  %892 = vmatpush.bf16.msrb.mxu0 %v1536_v23  ;;  %v1514_v23 = vld [vmem:[%s1953_s0 + $0xf8] sm:$0xff] }
  0x2e   :  { %503 = vmatpush.bf16.msrb.mxu2 %v1503_v24  ;;  %324 = vmatpush.bf16.msrb.mxu1 %v1471_v25  ;;  %v1530_v24 = vld [vmem:[%s1953_s0 + $0x138] sm:$0xff] }
  0x30   :  { %698 = vmatpush.bf16.msrb.mxu3 %v1519_v26  ;;  %893 = vmatpush.bf16.msrb.mxu0 %v1535_v27 }
  0x31   :  { %199 = vmatmul.bf16.gmra.mxu1 %v1478_v30  ;;  %209 = vmatmul.bf16.gmra.mxu2 %v1480_v31 }
  0x32   :  { %504 = vmatpush.bf16.msrb.mxu2 %v1502_v28  ;;  %325 = vmatpush.bf16.msrb.mxu1 %v1470_v29 }
  0x33   :  { %219 = vmatmul.bf16.gmra.mxu3 %v1482_v32  ;;  %189 = vmatmul.bf16.gmra.mxu0 %v1476_v33 }
  0x34   :  { %699 = vmatpush.bf16.msrb.mxu3 %v1518_v34  ;;  %894 = vmatpush.bf16.msrb.mxu0 %v1534_v35 }
  0x36   :  { %505 = vmatpush.bf16.msrb.mxu2 %v1501_v36  ;;  %326 = vmatpush.bf16.msrb.mxu1 %v1469_v37 }
  0x38   :  { %700 = vmatpush.bf16.msrb.mxu3 %v1517_v38  ;;  %895 = vmatpush.bf16.msrb.mxu0 %v1533_v39 }
  0x3a   :  { %506 = vmatpush.bf16.msrb.mxu2 %v1500_v40  ;;  %327 = vmatpush.bf16.msrb.mxu1 %v1468_v41 }
  0x3c   :  { %701 = vmatpush.bf16.msrb.mxu3 %v1516_v42  ;;  %896 = vmatpush.bf16.msrb.mxu0 %v1532_v43 }
  0x3e   :  { %507 = vmatpush.bf16.msrb.mxu2 %v1499_v44  ;;  %328 = vmatpush.bf16.msrb.mxu1 %v1467_v45 }
  0x40   :  { %702 = vmatpush.bf16.msrb.mxu3 %v1515_v46  ;;  %897 = vmatpush.bf16.msrb.mxu0 %v1531_v47  ;;  %v1898_v47 = vld [vmem:[%s1954_s2] ss:$0 sm:$0xff] }
  0x41   :  { %329 = vmatmul.bf16.vlgmr.msrb.gmra.mxu1 %v1459_v48  ;;  %508 = vmatmul.bf16.vlgmr.msrb.gmra.mxu2 %v1491_v49 }
  0x43   :  { %703 = vmatmul.bf16.vlgmr.msrb.gmra.mxu3 %v1507_v50  ;;  %898 = vmatmul.bf16.vlgmr.msrb.gmra.mxu0 %v1523_v51 }
  0x51   :  { %334 = vmatmul.bf16.gmra.mxu1 %v1460_v52  ;;  %513 = vmatmul.bf16.gmra.mxu2 %v1492_v53 }
  0x53   :  { %708 = vmatmul.bf16.gmra.mxu3 %v1508_v54  ;;  %903 = vmatmul.bf16.gmra.mxu0 %v1524_v55 }
  0x61   :  { %339 = vmatmul.bf16.gmra.mxu1 %v1461_v56  ;;  %518 = vmatmul.bf16.gmra.mxu2 %v1493_v57 }
  0x63   :  { %713 = vmatmul.bf16.gmra.mxu3 %v1509_v58  ;;  %908 = vmatmul.bf16.gmra.mxu0 %v1525_v59 }
  0x71   :  { %344 = vmatmul.bf16.gmra.mxu1 %v1462_v60  ;;  %523 = vmatmul.bf16.gmra.mxu2 %v1494_v61 }
  0x73   :  { %718 = vmatmul.bf16.gmra.mxu3 %v1510_v62  ;;  %913 = vmatmul.bf16.gmra.mxu0 %v1526_v63 }
  0x81   :  { %349 = vmatmul.bf16.gmra.mxu1 %v1463_v0  ;;  %528 = vmatmul.bf16.gmra.mxu2 %v1495_v1 }
  0x83   :  { %723 = vmatmul.bf16.gmra.mxu3 %v1511_v2  ;;  %918 = vmatmul.bf16.gmra.mxu0 %v1527_v3 }
  0x91   :  { %354 = vmatmul.bf16.gmra.mxu1 %v1464_v4  ;;  %533 = vmatmul.bf16.gmra.mxu2 %v1496_v5 }
  0x93   :  { %728 = vmatmul.bf16.gmra.mxu3 %v1512_v6  ;;  %923 = vmatmul.bf16.gmra.mxu0 %v1528_v7 }
  0x9e   :  { %v1853_v10 = vpop.f32.mrf.mxu1 }
  0xa0   :  { %v185_v13 = vpop.f32.mrf.mxu0 }
  0xa1   :  { %359 = vmatmul.bf16.gmra.mxu1 %v1465_v8  ;;  %538 = vmatmul.bf16.gmra.mxu2 %v1497_v9 }
  0xa3   :  { %733 = vmatmul.bf16.gmra.mxu3 %v1513_v11  ;;  %928 = vmatmul.bf16.gmra.mxu0 %v1529_v12 }
  0xa4   :  { %v1861_v14 = vpop.f32.mrf.mxu2 }
  0xa6   :  { %v1863_v15 = vpop.f32.mrf.mxu3  ;;  %v1865_v16 = vpop.f32.mrf.mxu1 }
  0xa8   :  { %v187_v17 = vpop.f32.mrf.mxu0 }
  0xac   :  { %v1867_v18 = vpop.f32.mrf.mxu2 }
  0xae   :  { %v1869_v19 = vpop.f32.mrf.mxu3  ;;  %v1877_v22 = vpop.f32.mrf.mxu1 }
  0xb0   :  { %v190_v25 = vpop.f32.mrf.mxu0 }
  0xb1   :  { %364 = vmatmul.bf16.gmra.mxu1 %v1466_v20  ;;  %543 = vmatmul.bf16.gmra.mxu2 %v1498_v21 }
  0xb3   :  { %738 = vmatmul.bf16.gmra.mxu3 %v1514_v23  ;;  %933 = vmatmul.bf16.gmra.mxu0 %v1530_v24 }
  0xb4   :  { %v1885_v26 = vpop.f32.mrf.mxu2 }
  0xb6   :  { %v1887_v27 = vpop.f32.mrf.mxu3  ;;  %v1889_v28 = vpop.f32.mrf.mxu1 }
  0xb8   :  { %v192_v29 = vpop.f32.mrf.mxu0 }
  0xbc   :  { %v1891_v30 = vpop.f32.mrf.mxu2 }
  0xbe   :  { %v1893_v31 = vpop.f32.mrf.mxu3  ;;  %v330_v32 = vpop.f32.mrf.mxu1 }
  0xbf   :  { %v331_v35 = vadd.f32 %v330_v32, %v185_v13 }
  0xc0   :  { %v899_v33 = vpop.f32.mrf.mxu0 }
  0xc4   :  { %v509_v34 = vpop.f32.mrf.mxu2 }
  0xc5   :  { %v549_v38 = vadd.f32 %v509_v34, %v331_v35 }
  0xc6   :  { %v704_v36 = vpop.f32.mrf.mxu3  ;;  %v332_v37 = vpop.f32.mrf.mxu1 }
  0xc7   :  { %v744_v40 = vadd.f32 %v704_v36, %v549_v38  ;;  %v333_v41 = vadd.f32 %v332_v37, %v187_v17 }
  0xc8   :  { %v901_v39 = vpop.f32.mrf.mxu0 }
  0xc9   :  { %v939_v46 = vadd.f32 %v899_v33, %v744_v40 }
  0xcb   :  { %v959_v51 = vadd.f32 %v1898_v47, %v939_v46 }
  0xcc   :  { %v511_v42 = vpop.f32.mrf.mxu2 }
  0xcd   :  { %v550_v43 = vadd.f32 %v511_v42, %v333_v41 }
  0xce   :  { %v706_v44 = vpop.f32.mrf.mxu3  ;;  %v335_v45 = vpop.f32.mrf.mxu1 }
  0xcf   :  { %v745_v48 = vadd.f32 %v706_v44, %v550_v43  ;;  %v336_v55 = vadd.f32 %v335_v45, %v190_v25 }
  0xd0   :  { %v904_v49 = vpop.f32.mrf.mxu0 }
  0xd1   :  { %v940_v50 = vadd.f32 %v901_v39, %v745_v48 }
  0xd3   :  { %v960_v52 = vadd.f32 %v1898_v47, %v940_v50 }
  0xd4   :  { %v514_v53 = vpop.f32.mrf.mxu2 }
  0xd5   :  { %v1542_v54 = vpack.c.bf16 %v960_v52, %v959_v51  ;;  %v551_v58 = vadd.f32 %v514_v53, %v336_v55 }
  0xd6   :  { %v709_v56 = vpop.f32.mrf.mxu3  ;;  %v337_v57 = vpop.f32.mrf.mxu1 }
  0xd7   :  { %1543 = vst [vmem:[%s1955_s3] sm:$0xff] %v1542_v54   ;;  %v746_v60 = vadd.f32 %v709_v56, %v551_v58  ;;  %v338_v61 = vadd.f32 %v337_v57, %v192_v29 }
  0xd8   :  { %v906_v59 = vpop.f32.mrf.mxu0 }
  0xd9   :  { %v941_v2 = vadd.f32 %v904_v49, %v746_v60 }
  0xdb   :  { %v961_v6 = vadd.f32 %v1898_v47, %v941_v2 }
  0xdc   :  { %v516_v62 = vpop.f32.mrf.mxu2 }
  0xdd   :  { %v552_v63 = vadd.f32 %v516_v62, %v338_v61 }
  0xde   :  { %v711_v0 = vpop.f32.mrf.mxu3  ;;  %v340_v1 = vpop.f32.mrf.mxu1 }
  0xdf   :  { %v747_v3 = vadd.f32 %v711_v0, %v552_v63  ;;  %v341_v11 = vadd.f32 %v340_v1, %v1853_v10 }
  0xe0   :  { %v909_v4 = vpop.f32.mrf.mxu0 }
  0xe1   :  { %v942_v5 = vadd.f32 %v906_v59, %v747_v3 }
  0xe3   :  { %v962_v7 = vadd.f32 %v1898_v47, %v942_v5 }
  0xe4   :  { %v519_v8 = vpop.f32.mrf.mxu2 }
  0xe5   :  { %v1547_v9 = vpack.c.bf16 %v962_v7, %v961_v6  ;;  %v553_v17 = vadd.f32 %v519_v8, %v341_v11 }
  0xe6   :  { %v714_v12 = vpop.f32.mrf.mxu3  ;;  %v342_v13 = vpop.f32.mrf.mxu1 }
  0xe7   :  { %1579 = vst [vmem:[%s1955_s3 + $0x8] sm:$0xff] %v1547_v9   ;;  %v748_v21 = vadd.f32 %v714_v12, %v553_v17  ;;  %v343_v23 = vadd.f32 %v342_v13, %v1865_v16 }
  0xe8   :  { %v911_v20 = vpop.f32.mrf.mxu0 }
  0xe9   :  { %v943_v33 = vadd.f32 %v909_v4, %v748_v21 }
  0xeb   :  { %v963_v10 = vadd.f32 %v1898_v47, %v943_v33 }
  0xec   :  { %v521_v24 = vpop.f32.mrf.mxu2 }
  0xed   :  { %v554_v25 = vadd.f32 %v521_v24, %v343_v23 }
  0xee   :  { %v716_v29 = vpop.f32.mrf.mxu3  ;;  %v345_v32 = vpop.f32.mrf.mxu1 }
  0xef   :  { %v749_v34 = vadd.f32 %v716_v29, %v554_v25  ;;  %v346_v40 = vadd.f32 %v345_v32, %v1877_v22 }
  0xf0   :  { %v914_v35 = vpop.f32.mrf.mxu0 }
  0xf1   :  { %v944_v36 = vadd.f32 %v911_v20, %v749_v34 }
  0xf3   :  { %v964_v37 = vadd.f32 %v1898_v47, %v944_v36 }
  0xf4   :  { %v524_v38 = vpop.f32.mrf.mxu2 }
  0xf5   :  { %v1552_v39 = vpack.c.bf16 %v964_v37, %v963_v10  ;;  %v555_v16 = vadd.f32 %v524_v38, %v346_v40 }
  0xf6   :  { %v719_v41 = vpop.f32.mrf.mxu3  ;;  %v347_v42 = vpop.f32.mrf.mxu1 }
  0xf7   :  { %1580 = vst [vmem:[%s1955_s3 + $0x10] sm:$0xff] %v1552_v39   ;;  %v750_v44 = vadd.f32 %v719_v41, %v555_v16  ;;  %v348_v45 = vadd.f32 %v347_v42, %v1889_v28 }
  0xf8   :  { %v916_v43 = vpop.f32.mrf.mxu0 }
  0xf9   :  { %v945_v51 = vadd.f32 %v914_v35, %v750_v44 }
  0xfb   :  { %v965_v22 = vadd.f32 %v1898_v47, %v945_v51 }
  0xfc   :  { %v526_v46 = vpop.f32.mrf.mxu2 }
  0xfd   :  { %v556_v48 = vadd.f32 %v526_v46, %v348_v45 }
  0xfe   :  { %v721_v49 = vpop.f32.mrf.mxu3  ;;  %v350_v50 = vpop.f32.mrf.mxu1 }
  0xff   :  { %v751_v52 = vadd.f32 %v721_v49, %v556_v48  ;;  %v351_v58 = vadd.f32 %v350_v50, %v1861_v14 }
 0x100   :  { %v919_v53 = vpop.f32.mrf.mxu0 }
 0x101   :  { %v946_v54 = vadd.f32 %v916_v43, %v751_v52 }
 0x103   :  { %v966_v55 = vadd.f32 %v1898_v47, %v946_v54 }
 0x104   :  { %v529_v56 = vpop.f32.mrf.mxu2 }
 0x105   :  { %v1557_v57 = vpack.c.bf16 %v966_v55, %v965_v22  ;;  %v557_v28 = vadd.f32 %v529_v56, %v351_v58 }
 0x106   :  { %v724_v59 = vpop.f32.mrf.mxu3  ;;  %v352_v60 = vpop.f32.mrf.mxu1 }
 0x107   :  { %1581 = vst [vmem:[%s1955_s3 + $0x18] sm:$0xff] %v1557_v57   ;;  %v752_v62 = vadd.f32 %v724_v59, %v557_v28  ;;  %v353_v63 = vadd.f32 %v352_v60, %v1867_v18 }
 0x108   :  { %v921_v61 = vpop.f32.mrf.mxu0 }
 0x109   :  { %v947_v4 = vadd.f32 %v919_v53, %v752_v62 }
 0x10b   :  { %v967_v14 = vadd.f32 %v1898_v47, %v947_v4 }
 0x10c   :  { %v531_v0 = vpop.f32.mrf.mxu2 }
 0x10d   :  { %v558_v1 = vadd.f32 %v531_v0, %v353_v63 }
 0x10e   :  { %v726_v2 = vpop.f32.mrf.mxu3  ;;  %v355_v3 = vpop.f32.mrf.mxu1 }
 0x10f   :  { %v753_v5 = vadd.f32 %v726_v2, %v558_v1  ;;  %v356_v12 = vadd.f32 %v355_v3, %v1885_v26 }
 0x110   :  { %v924_v6 = vpop.f32.mrf.mxu0 }
 0x111   :  { %v948_v7 = vadd.f32 %v921_v61, %v753_v5 }
 0x113   :  { %v968_v8 = vadd.f32 %v1898_v47, %v948_v7 }
 0x114   :  { %v534_v9 = vpop.f32.mrf.mxu2 }
 0x115   :  { %v1562_v11 = vpack.c.bf16 %v968_v8, %v967_v14  ;;  %v559_v18 = vadd.f32 %v534_v9, %v356_v12 }
 0x116   :  { %v729_v13 = vpop.f32.mrf.mxu3  ;;  %v357_v17 = vpop.f32.mrf.mxu1 }
 0x117   :  { %1582 = vst [vmem:[%s1955_s3 + $0x20] sm:$0xff] %v1562_v11   ;;  %v754_v21 = vadd.f32 %v729_v13, %v559_v18  ;;  %v358_v23 = vadd.f32 %v357_v17, %v1891_v30 }
 0x118   :  { %v926_v20 = vpop.f32.mrf.mxu0 }
 0x119   :  { %v949_v33 = vadd.f32 %v924_v6, %v754_v21 }
 0x11b   :  { %v969_v26 = vadd.f32 %v1898_v47, %v949_v33 }
 0x11c   :  { %v536_v24 = vpop.f32.mrf.mxu2 }
 0x11d   :  { %v560_v25 = vadd.f32 %v536_v24, %v358_v23 }
 0x11e   :  { %v731_v29 = vpop.f32.mrf.mxu3  ;;  %v360_v32 = vpop.f32.mrf.mxu1 }
 0x11f   :  { %v755_v34 = vadd.f32 %v731_v29, %v560_v25  ;;  %v361_v39 = vadd.f32 %v360_v32, %v1863_v15 }
 0x120   :  { %v929_v36 = vpop.f32.mrf.mxu0 }
 0x121   :  { %v950_v35 = vadd.f32 %v926_v20, %v755_v34 }
 0x123   :  { %v970_v10 = vadd.f32 %v1898_v47, %v950_v35 }
 0x124   :  { %v539_v37 = vpop.f32.mrf.mxu2 }
 0x125   :  { %v1567_v38 = vpack.c.bf16 %v970_v10, %v969_v26  ;;  %v561_v30 = vadd.f32 %v539_v37, %v361_v39 }
 0x126   :  { %v734_v40 = vpop.f32.mrf.mxu3  ;;  %v362_v41 = vpop.f32.mrf.mxu1 }
 0x127   :  { %1583 = vst [vmem:[%s1955_s3 + $0x28] sm:$0xff] %v1567_v38   ;;  %v756_v42 = vadd.f32 %v734_v40, %v561_v30  ;;  %v363_v16 = vadd.f32 %v362_v41, %v1869_v19 }
 0x128   :  { %v931_v43 = vpop.f32.mrf.mxu0 }
 0x129   :  { %v951_v49 = vadd.f32 %v929_v36, %v756_v42 }
 0x12b   :  { %v971_v15 = vadd.f32 %v1898_v47, %v951_v49 }
 0x12c   :  { %v541_v44 = vpop.f32.mrf.mxu2 }
 0x12d   :  { %v562_v45 = vadd.f32 %v541_v44, %v363_v16 }
 0x12e   :  { %v736_v46 = vpop.f32.mrf.mxu3  ;;  %v365_v48 = vpop.f32.mrf.mxu1 }
 0x12f   :  { %v757_v50 = vadd.f32 %v736_v46, %v562_v45  ;;  %v366_v22 = vadd.f32 %v365_v48, %v1887_v27 }
 0x130   :  { %v934_v56 = vpop.f32.mrf.mxu0 }
 0x131   :  { %v952_v51 = vadd.f32 %v931_v43, %v757_v50 }
 0x133   :  { %v972_v52 = vadd.f32 %v1898_v47, %v952_v51 }
 0x134   :  { %v544_v53 = vpop.f32.mrf.mxu2 }
 0x135   :  { %v1572_v54 = vpack.c.bf16 %v972_v52, %v971_v15  ;;  %v563_v19 = vadd.f32 %v544_v53, %v366_v22 }
 0x136   :  { %v739_v55 = vpop.f32.mrf.mxu3  ;;  %v367_v57 = vpop.f32.mrf.mxu1 }
 0x137   :  { %1584 = vst [vmem:[%s1955_s3 + $0x30] sm:$0xff] %v1572_v54   ;;  %v758_v58 = vadd.f32 %v739_v55, %v563_v19  ;;  %v368_v59 = vadd.f32 %v367_v57, %v1893_v31 }
 0x138   :  { %v936_v0 = vpop.f32.mrf.mxu0 }
 0x139   :  { %v953_v62 = vadd.f32 %v934_v56, %v758_v58 }
 0x13b   :  { %v973_v27 = vadd.f32 %v1898_v47, %v953_v62 }
 0x13c   :  { %v546_v60 = vpop.f32.mrf.mxu2 }
 0x13d   :  { %v564_v28 = vadd.f32 %v546_v60, %v368_v59 }
 0x13e   :  { %v741_v61 = vpop.f32.mrf.mxu3 }
 0x13f   :  { %v759_v63 = vadd.f32 %v741_v61, %v564_v28 }
 0x141   :  { %v954_v1 = vadd.f32 %v936_v0, %v759_v63 }
 0x143   :  { %v974_v2 = vadd.f32 %v1898_v47, %v954_v1 }
 0x145   :  { %v1577_v3 = vpack.c.bf16 %v974_v2, %v973_v27 }
 0x147   :  { %1585 = vst [vmem:[%s1955_s3 + $0x38] sm:$0xff] %v1577_v3  }

// kernel: forward.16
= control target key start
LH: loop header
LB: loop body
LE: loop exit
PB: predicated region body
PF: predicated region fallthrough
CT: control target
= control target key end

     0   :  { %s393_s6 = smov 0   ;;  %s395_s7 = smov 0   ;;  %s431_s0 = inlined_call_operand.vmem [shape: bf16[3,2,64,128], index: 0, kind: input, shape index: {}]   ;;  %s432_s1 = inlined_call_operand.vmem [shape: f32[3,2,128], index: 1, kind: output, shape index: {}]  }
   0x1   :  { %s397_s8 = smov 0  }
   0x2 LB: > { %s23_s9 = sadd.s32 1, %s376_s7  ;;  %p287_p0 = scmp.ge.s32.totalorder %s380_s8, 1  ;;  %s380_s8 = sphi %s397_s8, %s11_s8   ;;  %s376_s7 = sphi %s395_s7, %s434_s7   ;;  %s372_s6 = sphi %s393_s6, %s433_s6  }
   0x3   : > { %p25_p1 = scmp.ge.s32.totalorder %s23_s9, 3  ;;  %p106_p2 = scmp.lt.s32.totalorder %s380_s8, 4 }
   0x5   : > { %s436_s9 = smov (%p25_p1, %s23_s9), 0  ;;  %p107_p3 = pnand %p287_p0, %p106_p2 }
   0x6   : > { %p130_p4 = scmp.lt.s32.totalorder (!%p107_p3), %s372_s6, 2 }
   0x7   : > { %110 = sbr.rel (%p107_p3) target bundleno = 51 (0x33), region = 24 }
   0xc   : > { %s438_s6 = smov (!%p130_p4, %s372_s6), 2  ;;  %v382_v0 = vmov 0.0   ;;  %vm211_vm0 = vcmask 1041409  }
   0xd   : > { %s293_s10 = sshll.u32 %s438_s6, 6  ;;  %s290_s11 = sshll.u32 %s438_s6, 1 }
   0xe   : > { %s137_s14 = scalar_lea.vmem %s431_s0, %s293_s10  ;;  %s417_s17 = scalar_lea.vmem %s432_s1, %s290_s11 }
   0xf   : > { %147 = vst [vmem:[%s417_s17] sm:$0x3] %v382_v0  ;;  %v295_v1 = vld [vmem:[%s137_s14] sm:$0xff]   ;;  %v326_v2 = vld [vmem:[%s137_s14 + $0x8] sm:$0xff]   ;;  %v327_v8 = vld [vmem:[%s137_s14 + $0x10] sm:$0xff]  }
  0x10   : > { %v296_v3 = vunpack.c.l.bf16 %v295_v1  ;;  %v297_v4 = vunpack.c.h.bf16 %v295_v1  ;;  %v300_v5 = vunpack.c.l.bf16 %v326_v2  ;;  %v329_v6 = vld [vmem:[%s137_s14 + $0x20] sm:$0xff]   ;;  %v330_v7 = vld [vmem:[%s137_s14 + $0x28] sm:$0xff]   ;;  %v301_v12 = vunpack.c.h.bf16 %v326_v2  ;;  %v331_v13 = vld [vmem:[%s137_s14 + $0x30] sm:$0xff]  }
  0x11   : > { %v312_v9 = vunpack.c.l.bf16 %v329_v6  ;;  %v313_v10 = vunpack.c.h.bf16 %v329_v6  ;;  %v316_v11 = vunpack.c.l.bf16 %v330_v7  ;;  %v317_v15 = vunpack.c.h.bf16 %v330_v7  ;;  %v328_v21 = vld [vmem:[%s137_s14 + $0x18] sm:$0xff]  }
  0x12   : > { %v181_v14 = vadd.f32 %v297_v4, %v296_v3  ;;  %v304_v17 = vunpack.c.l.bf16 %v327_v8  ;;  %v320_v19 = vunpack.c.l.bf16 %v331_v13  ;;  %v305_v22 = vunpack.c.h.bf16 %v327_v8  ;;  %v332_v23 = vld [vmem:[%s137_s14 + $0x38] sm:$0xff]  }
  0x13   : > { %v194_v16 = vadd.f32 %v313_v10, %v312_v9  ;;  %v321_v25 = vunpack.c.h.bf16 %v331_v13  ;;  %v308_v27 = vunpack.c.l.bf16 %v328_v21  ;;  %v324_v29 = vunpack.c.l.bf16 %v332_v23 }
  0x14   : > { %v182_v18 = vadd.f32 %v300_v5, %v181_v14  ;;  %v309_v31 = vunpack.c.h.bf16 %v328_v21  ;;  %v325_v33 = vunpack.c.h.bf16 %v332_v23 }
  0x15   : > { %v195_v20 = vadd.f32 %v316_v11, %v194_v16 }
  0x16   : > { %v183_v24 = vadd.f32 %v301_v12, %v182_v18  ;;  %v180_v52 = vld [vmem:[%s417_s17] sm:$0x3] }
  0x17   : > { %v196_v26 = vadd.f32 %v317_v15, %v195_v20 }
  0x18   : > { %v184_v28 = vadd.f32 %v304_v17, %v183_v24 }
  0x19   : > { %v197_v30 = vadd.f32 %v320_v19, %v196_v26 }
  0x1a   : > { %v185_v32 = vadd.f32 %v305_v22, %v184_v28 }
  0x1b   : > { %v198_v34 = vadd.f32 %v321_v25, %v197_v30 }
  0x1c   : > { %v186_v35 = vadd.f32 %v308_v27, %v185_v32 }
  0x1d   : > { %v199_v36 = vadd.f32 %v324_v29, %v198_v34 }
  0x1e   : > { %v187_v37 = vadd.f32 %v309_v31, %v186_v35 }
  0x1f   : > { %v200_v38 = vadd.f32 %v325_v33, %v199_v36 }
  0x20   : > { %v188_v39 = vrot.slane %v187_v37, 4 }
  0x21   : > { %v201_v40 = vrot.slane %v200_v38, 4 }
  0x22   : > { %v189_v41 = vadd.f32 %v188_v39, %v187_v37 }
  0x23   : > { %v202_v42 = vadd.f32 %v201_v40, %v200_v38 }
  0x24   : > { %v190_v43 = vrot.slane %v189_v41, 2 }
  0x25   : > { %v203_v44 = vrot.slane %v202_v42, 2 }
  0x26   : > { %v191_v45 = vadd.f32 %v190_v43, %v189_v41 }
  0x27   : > { %v204_v46 = vadd.f32 %v203_v44, %v202_v42 }
  0x28   : > { %v192_v47 = vrot.slane %v191_v45, 1 }
  0x29   : > { %v205_v48 = vrot.slane %v204_v46, 1 }
  0x2a   : > { %v193_v49 = vadd.f32 %v192_v47, %v191_v45 }
  0x2b   : > { %v206_v50 = vadd.f32 %v205_v48, %v204_v46 }
  0x2c   : > { %v207_v51 = vmul.f32 0.015625, %v193_v49 }
  0x2d   : > { %v208_v53 = vmul.f32 0.015625, %v206_v50 }
  0x2f   : > { %v212_v54 = vsel %vm211_vm0, %v208_v53, %v207_v51 }
  0x30   : > { %v214_v55 = vadd.f32 %v212_v54, %v180_v52 }
  0x32   : > { %215 = vst [vmem:[%s417_s17] sm:$0x3] %v214_v55 }
  0x33 PF: > { %s11_s8 = sadd.s32 1, %s380_s8   ;;  %s433_s6 = smov %s376_s7 }
  0x34   : > { %p8_p5 = scmp.ge.s32.totalorder %s11_s8, 5   ;;  %s434_s7 = smov %s436_s9 }
  0x36   :  { %10 = sbr.rel (!%p8_p5) target bundleno = 2 (0x2), region = 58 }

// kernel: forward.14
= control target key start
LH: loop header
LB: loop body
LE: loop exit
PB: predicated region body
PF: predicated region fallthrough
CT: control target
= control target key end

     0   :  { %s736_s15 = smov [#allocation4]   ;;  %s842_s0 = inlined_call_operand.vmem [shape: s32[9], index: 0, kind: input, shape index: {}]   ;;  %s843_s1 = inlined_call_operand.vmem [shape: bf16[5,2,64,128], index: 1, kind: input, shape index: {}]   ;;  %s844_s2 = inlined_call_operand.vmem [shape: f32[3,3,2,128], index: 2, kind: input, shape index: {}]   ;;  %s845_s3 = inlined_call_operand.vmem [shape: bf16[3,2,64,128], index: 3, kind: output, shape index: {}]  }
   0x1   :  { %s9_s14 = sshll.u32 %s842_s0, 4  ;;  %s10_s14 = int_to_ptr.vmem [resolvable:$true] %s9_s14 }
   0x2   :  { %12 = dma.vmem_to_smem %s10_s14, 16, %s736_s15, [#allocation3] }
   0x3   :  { %714 = dma.done.wait [#allocation3], 16 }
   0x4   :  { %715 = vsyncadd [#allocation3], 4294967280 }
   0x5   :  { %15 = sfence }
   0x6   :  { %s761_s16 = smov 0   ;;  %s763_s17 = smov 0  }
   0x7   :  { %s765_s18 = smov 0   ;;  %s767_s19 = smov 0  }
   0x8   :  { %s769_s20 = smov 0  }
   0x9 LB: > { %s33_s0 = sadd.s32 1, %s726_s18  ;;  %s40_s21 = sadd.s32 1, %s730_s19  ;;  %s734_s20 = sphi %s769_s20, %s21_s20   ;;  %s730_s19 = sphi %s767_s19, %s849_s19   ;;  %s726_s18 = sphi %s765_s18, %s848_s18   ;;  %s722_s17 = sphi %s763_s17, %s847_s17   ;;  %s718_s16 = sphi %s761_s16, %s846_s16  }
   0xa   : > { %p34_p0 = scmp.ge.s32.totalorder %s33_s0, 3  ;;  %p541_p1 = scmp.ge.s32.totalorder %s734_s20, 1 }
   0xb   : > { %p176_p2 = scmp.lt.s32.totalorder %s734_s20, 10 }
   0xc   : > { %s851_s0 = smov (%p34_p0, %s33_s0), 0  ;;  %s853_s21 = smov (!%p34_p0, %s40_s21), %s730_s19 }
   0xd   : > { %p177_p3 = pnand %p541_p1, %p176_p2  ;;  %p42_p4 = scmp.ge.s32.totalorder %s853_s21, 3 }
   0xe   : > { %s217_s22 = smul.u32 (!%p177_p3), 3, %s722_s17  ;;  %p233_p5 = scmp.lt.s32.totalorder (!%p177_p3), %s722_s17, 2 }
   0xf   : > { %s855_s21 = smov (%p42_p4, %s853_s21), 0  ;;  %180 = sbr.rel (%p177_p3) target bundleno = 80 (0x50), region = 28 }
  0x10   : > { %p235_p6 = scmp.lt.s32.totalorder (!%p177_p3), %s718_s16, 2  ;;  %s218_s23 = sadd.s32 (!%p177_p3), %s718_s16, %s217_s22 }
  0x11   : > { %s219_s24 = sld [smem:[#allocation4 + %s218_s23]] (!%p177_p3)  ;;  %p547_p8 = scmp.ne.s32.totalorder (!%p177_p3), %s718_s16, 0 }
  0x14   : > { %s857_s17 = smov (!%p233_p5, %s722_s17), 2 }
  0x15   : > { %s236_s25 = scalar_select %p235_p6, %s718_s16, 2 }
  0x16   : > { %s639_s26 = smul.u32 3, %s857_s17  ;;  %s552_s27 = sshll.u32 %s857_s17, 6 }
  0x17   : > { %s799_s30 = scalar_lea.vmem %s845_s3, %s552_s27  ;;  %p221_p7 = scmp.lt.s32.totalorder %s219_s24, 4 }
  0x18   : > { %s238_s4 = sadd.s32 %s639_s26, %s236_s25  ;;  %254 = sbr.rel (%p547_p8) target bundleno = 46 (0x2e), region = 32 }
  0x19   : > { %s544_s5 = sshll.u32 %s238_s4, 1  ;;  %s859_s24 = smov (!%p221_p7, %s219_s24), 4 }
  0x1a   : > { %s240_s8 = scalar_lea.vmem %s844_s2, %s544_s5  ;;  %s551_s9 = sshll.u32 %s859_s24, 6 }
  0x1b   : > { %s807_s12 = scalar_lea.vmem %s843_s1, %s551_s9 }
  0x1d   : > { %v737_v0 = vmov 0.0  }
  0x1e   : > { %255 = vst [vmem:[#allocation2 + $0x30] sm:$0xff] %v737_v0 }
  0x1f   : > { %256 = vst [vmem:[#allocation2] sm:$0xff] %v737_v0 }
  0x20   : > { %257 = vst [vmem:[#allocation2 + $0x58] sm:$0xff] %v737_v0 }
  0x21   : > { %258 = vst [vmem:[#allocation2 + $0x18] sm:$0xff] %v737_v0 }
  0x22   : > { %259 = vst [vmem:[#allocation2 + $0x50] sm:$0xff] %v737_v0 }
  0x23   : > { %260 = vst [vmem:[#allocation2 + $0x68] sm:$0xff] %v737_v0 }
  0x24   : > { %261 = vst [vmem:[#allocation2 + $0x8] sm:$0xff] %v737_v0 }
  0x25   : > { %262 = vst [vmem:[#allocation2 + $0x48] sm:$0xff] %v737_v0 }
  0x26   : > { %263 = vst [vmem:[#allocation2 + $0x40] sm:$0xff] %v737_v0 }
  0x27   : > { %264 = vst [vmem:[#allocation2 + $0x20] sm:$0xff] %v737_v0 }
  0x28   : > { %265 = vst [vmem:[#allocation2 + $0x10] sm:$0xff] %v737_v0 }
  0x29   : > { %266 = vst [vmem:[#allocation2 + $0x38] sm:$0xff] %v737_v0 }
  0x2a   : > { %267 = vst [vmem:[#allocation2 + $0x60] sm:$0xff] %v737_v0 }
  0x2b   : > { %268 = vst [vmem:[#allocation2 + $0x70] sm:$0xff] %v737_v0 }
  0x2c   : > { %269 = vst [vmem:[#allocation2 + $0x78] sm:$0xff] %v737_v0 }
  0x2d   : > { %270 = vst [vmem:[#allocation2 + $0x28] sm:$0xff] %v737_v0 }
  0x2e PF: > { %v271_v1 = vld [vmem:[%s240_s8] sm:$0x3]  ;;  %v625_v6 = vld [vmem:[%s807_s12 + $0x8] sm:$0xff]   ;;  %v272_v7 = vld [vmem:[#allocation2 + $0x30] sm:$0xff]  ;;  %p548_p9 = scmp.ne.s32.totalorder %s718_s16, 2 }
  0x2f   : > { %v554_v2 = vld [vmem:[%s807_s12] sm:$0xff]   ;;  %v322_v4 = vperm.slane %v271_v1, 0  ;;  %v559_v9 = vunpack.c.l.bf16 %v625_v6  ;;  %v560_v10 = vunpack.c.h.bf16 %v625_v6  ;;  %v626_v11 = vld [vmem:[%s807_s12 + $0x10] sm:$0xff]   ;;  %v321_v12 = vrot.slane %v271_v1, 1  ;;  %v274_v15 = vld [vmem:[#allocation2 + $0x58] sm:$0xff] }
  0x30   : > { %v555_v3 = vunpack.c.l.bf16 %v554_v2  ;;  %v556_v5 = vunpack.c.h.bf16 %v554_v2  ;;  %v273_v8 = vld [vmem:[#allocation2] sm:$0xff]  ;;  %v275_v16 = vld [vmem:[#allocation2 + $0x18] sm:$0xff]  ;;  %v563_v17 = vunpack.c.l.bf16 %v626_v11  ;;  %v564_v18 = vunpack.c.h.bf16 %v626_v11  ;;  %v276_v22 = vld [vmem:[#allocation2 + $0x50] sm:$0xff] }
  0x31   : > { %v627_v19 = vld [vmem:[%s807_s12 + $0x18] sm:$0xff]   ;;  %v328_v20 = vmul.f32 %v559_v9, %v322_v4  ;;  %v329_v21 = vmul.f32 %v560_v10, %v322_v4  ;;  %v277_v23 = vld [vmem:[#allocation2 + $0x68] sm:$0xff]  ;;  %v628_v26 = vld [vmem:[%s807_s12 + $0x20] sm:$0xff]   ;;  %v323_v42 = vperm.slane %v321_v12, 0 }
  0x32   : > { %v326_v13 = vmul.f32 %v555_v3, %v322_v4  ;;  %v327_v14 = vmul.f32 %v556_v5, %v322_v4  ;;  %v567_v24 = vunpack.c.l.bf16 %v627_v19  ;;  %v568_v25 = vunpack.c.h.bf16 %v627_v19  ;;  %v278_v31 = vld [vmem:[#allocation2 + $0x8] sm:$0xff]  ;;  %v630_v38 = vld [vmem:[%s807_s12 + $0x30] sm:$0xff]   ;;  %v631_v43 = vld [vmem:[%s807_s12 + $0x38] sm:$0xff]  }
  0x33   : > { %v330_v29 = vmul.f32 %v563_v17, %v322_v4  ;;  %v331_v30 = vmul.f32 %v564_v18, %v322_v4  ;;  %v279_v32 = vld [vmem:[#allocation2 + $0x48] sm:$0xff]  ;;  %v344_v34 = vadd.f32 %v328_v20, %v274_v15  ;;  %v345_v35 = vadd.f32 %v329_v21, %v275_v16  ;;  %v280_v46 = vld [vmem:[#allocation2 + $0x40] sm:$0xff]  ;;  %v282_v55 = vld [vmem:[#allocation2 + $0x10] sm:$0xff] }
  0x34   : > { %v342_v27 = vadd.f32 %v326_v13, %v272_v7  ;;  %v343_v28 = vadd.f32 %v327_v14, %v273_v8  ;;  %v629_v33 = vld [vmem:[%s807_s12 + $0x28] sm:$0xff]   ;;  %v332_v36 = vmul.f32 %v567_v24, %v322_v4  ;;  %v333_v37 = vmul.f32 %v568_v25, %v322_v4  ;;  %v281_v50 = vld [vmem:[#allocation2 + $0x20] sm:$0xff]  ;;  %v283_v60 = vld [vmem:[#allocation2 + $0x38] sm:$0xff] }
  0x35   : > { %v346_v39 = vadd.f32 %v330_v29, %v276_v22  ;;  %v347_v40 = vadd.f32 %v331_v30, %v277_v23  ;;  %v571_v41 = vunpack.c.l.bf16 %v628_v26  ;;  %v572_v47 = vunpack.c.h.bf16 %v628_v26  ;;  %360 = vst [vmem:[#allocation2 + $0x58] sm:$0xff] %v344_v34  ;;  %v284_v0 = vld [vmem:[#allocation2 + $0x60] sm:$0xff]  ;;  %v285_v3 = vld [vmem:[#allocation2 + $0x70] sm:$0xff]  ;;  %v286_v6 = vld [vmem:[#allocation2 + $0x78] sm:$0xff] }
  0x36   : > { %358 = vst [vmem:[#allocation2 + $0x30] sm:$0xff] %v342_v27  ;;  %v348_v44 = vadd.f32 %v332_v36, %v278_v31  ;;  %v349_v45 = vadd.f32 %v333_v37, %v279_v32  ;;  %v575_v48 = vunpack.c.l.bf16 %v629_v33  ;;  %v576_v51 = vunpack.c.h.bf16 %v629_v33  ;;  %v287_v9 = vld [vmem:[#allocation2 + $0x28] sm:$0xff] }
  0x37   : > { %359 = vst [vmem:[#allocation2] sm:$0xff] %v343_v28  ;;  %v334_v49 = vmul.f32 %v571_v41, %v323_v42  ;;  %v579_v52 = vunpack.c.l.bf16 %v630_v38  ;;  %v580_v53 = vunpack.c.h.bf16 %v630_v38  ;;  %v335_v54 = vmul.f32 %v572_v47, %v323_v42 }
  0x38   : > { %361 = vst [vmem:[#allocation2 + $0x18] sm:$0xff] %v345_v35  ;;  %v336_v56 = vmul.f32 %v575_v48, %v323_v42  ;;  %v583_v57 = vunpack.c.l.bf16 %v631_v43  ;;  %v584_v58 = vunpack.c.h.bf16 %v631_v43  ;;  %v337_v61 = vmul.f32 %v576_v51, %v323_v42 }
  0x39   : > { %362 = vst [vmem:[#allocation2 + $0x50] sm:$0xff] %v346_v39  ;;  %v350_v59 = vadd.f32 %v334_v49, %v280_v46  ;;  %v338_v62 = vmul.f32 %v579_v52, %v323_v42  ;;  %v351_v63 = vadd.f32 %v335_v54, %v281_v50  ;;  %v339_v1 = vmul.f32 %v580_v53, %v323_v42 }
  0x3a   : > { %363 = vst [vmem:[#allocation2 + $0x68] sm:$0xff] %v347_v40  ;;  %v352_v2 = vadd.f32 %v336_v56, %v282_v55  ;;  %v340_v4 = vmul.f32 %v583_v57, %v323_v42  ;;  %v353_v5 = vadd.f32 %v337_v61, %v283_v60  ;;  %v341_v7 = vmul.f32 %v584_v58, %v323_v42 }
  0x3b   : > { %364 = vst [vmem:[#allocation2 + $0x8] sm:$0xff] %v348_v44  ;;  %v354_v8 = vadd.f32 %v338_v62, %v284_v0  ;;  %v355_v10 = vadd.f32 %v339_v1, %v285_v3 }
  0x3c   : > { %365 = vst [vmem:[#allocation2 + $0x48] sm:$0xff] %v349_v45  ;;  %v356_v11 = vadd.f32 %v340_v4, %v286_v6  ;;  %v357_v12 = vadd.f32 %v341_v7, %v287_v9 }
  0x3d   : > { %366 = vst [vmem:[#allocation2 + $0x40] sm:$0xff] %v350_v59 }
  0x3e   : > { %367 = vst [vmem:[#allocation2 + $0x20] sm:$0xff] %v351_v63 }
  0x3f   : > { %368 = vst [vmem:[#allocation2 + $0x10] sm:$0xff] %v352_v2 }
  0x40   : > { %369 = vst [vmem:[#allocation2 + $0x38] sm:$0xff] %v353_v5  ;;  %377 = sbr.rel (%p548_p9) target bundleno = 80 (0x50), region = 36 }
  0x41   : > { %370 = vst [vmem:[#allocation2 + $0x60] sm:$0xff] %v354_v8 }
  0x42   : > { %371 = vst [vmem:[#allocation2 + $0x70] sm:$0xff] %v355_v10 }
  0x43   : > { %372 = vst [vmem:[#allocation2 + $0x78] sm:$0xff] %v356_v11 }
  0x44   : > { %373 = vst [vmem:[#allocation2 + $0x28] sm:$0xff] %v357_v12 }
  0x45   : > { %v378_v13 = vld [vmem:[#allocation2 + $0x30] sm:$0xff]  ;;  %v379_v14 = vld [vmem:[#allocation2] sm:$0xff]  ;;  %v380_v15 = vld [vmem:[#allocation2 + $0x58] sm:$0xff] }
  0x46   : > { %v588_v16 = vpack.c.bf16 %v379_v14, %v378_v13  ;;  %v381_v17 = vld [vmem:[#allocation2 + $0x18] sm:$0xff]  ;;  %v382_v18 = vld [vmem:[#allocation2 + $0x50] sm:$0xff]  ;;  %v383_v19 = vld [vmem:[#allocation2 + $0x68] sm:$0xff] }
  0x47   : > { %v593_v20 = vpack.c.bf16 %v381_v17, %v380_v15  ;;  %v598_v21 = vpack.c.bf16 %v383_v19, %v382_v18  ;;  %v384_v22 = vld [vmem:[#allocation2 + $0x8] sm:$0xff]  ;;  %v386_v24 = vld [vmem:[#allocation2 + $0x40] sm:$0xff]  ;;  %v388_v27 = vld [vmem:[#allocation2 + $0x10] sm:$0xff] }
  0x48   : > { %v385_v23 = vld [vmem:[#allocation2 + $0x48] sm:$0xff]  ;;  %589 = vst [vmem:[%s799_s30] sm:$0xff] %v588_v16   ;;  %v387_v26 = vld [vmem:[#allocation2 + $0x20] sm:$0xff]  ;;  %v389_v28 = vld [vmem:[#allocation2 + $0x38] sm:$0xff] }
  0x49   : > { %v603_v25 = vpack.c.bf16 %v385_v23, %v384_v22  ;;  %632 = vst [vmem:[%s799_s30 + $0x8] sm:$0xff] %v593_v20   ;;  %v608_v29 = vpack.c.bf16 %v387_v26, %v386_v24  ;;  %v613_v30 = vpack.c.bf16 %v389_v28, %v388_v27  ;;  %v390_v31 = vld [vmem:[#allocation2 + $0x60] sm:$0xff]  ;;  %v391_v32 = vld [vmem:[#allocation2 + $0x70] sm:$0xff] }
  0x4a   : > { %v392_v33 = vld [vmem:[#allocation2 + $0x78] sm:$0xff]  ;;  %633 = vst [vmem:[%s799_s30 + $0x10] sm:$0xff] %v598_v21   ;;  %v618_v34 = vpack.c.bf16 %v391_v32, %v390_v31 }
  0x4b   : > { %v393_v35 = vld [vmem:[#allocation2 + $0x28] sm:$0xff]  ;;  %634 = vst [vmem:[%s799_s30 + $0x18] sm:$0xff] %v603_v25  }
  0x4c   : > { %v623_v36 = vpack.c.bf16 %v393_v35, %v392_v33  ;;  %635 = vst [vmem:[%s799_s30 + $0x20] sm:$0xff] %v608_v29  }
  0x4d   : > { %636 = vst [vmem:[%s799_s30 + $0x28] sm:$0xff] %v613_v30  }
  0x4e   : > { %637 = vst [vmem:[%s799_s30 + $0x30] sm:$0xff] %v618_v34  }
  0x4f   : > { %638 = vst [vmem:[%s799_s30 + $0x38] sm:$0xff] %v623_v36  }
  0x50 PF: > { %s21_s20 = sadd.s32 1, %s734_s20   ;;  %s846_s16 = smov %s726_s18 }
  0x51   : > { %p18_p10 = scmp.ge.s32.totalorder %s21_s20, 11   ;;  %s847_s17 = smov %s730_s19 }
  0x52   : > { %s848_s18 = smov %s851_s0  ;;  %s849_s19 = smov %s855_s21 }
  0x53   :  { %20 = sbr.rel (!%p18_p10) target bundleno = 9 (0x9), region = 69 }

// kernel: forward.17
= control target key start
LH: loop header
LB: loop body
LE: loop exit
PB: predicated region body
PF: predicated region fallthrough
CT: control target
= control target key end

     0   :  { %vm154_vm0 = vcmask 523264   ;;  %s577_s1 = inlined_call_operand.vmem [shape: f32[1,384,64], index: 1, kind: input, shape index: {}]   ;;  %s578_s0 = inlined_call_operand.vmem [shape: f32[2,384], index: 0, kind: input, shape index: {}]   ;;  %s579_s3 = inlined_call_operand.vmem [shape: f32[3,64,128], index: 3, kind: input, shape index: {}]   ;;  %s580_s2 = inlined_call_operand.vmem [shape: f32[1,1,64], index: 2, kind: input, shape index: {}]   ;;  %s581_s4 = inlined_call_operand.vmem [shape: f32[3,1,128], index: 4, kind: input, shape index: {}]   ;;  %s582_s5 = inlined_call_operand.vmem [shape: f32[1,3,2,128], index: 5, kind: output, shape index: {}]  }
   0x1   :  { %v68_v0 = vld [vmem:[%s577_s1 + $0x178] sm:$0xff]  ;;  %v67_v2 = vld [vmem:[%s577_s1 + $0x170] sm:$0xff]  ;;  %v66_v5 = vld [vmem:[%s577_s1 + $0x168] sm:$0xff] }
   0x2   :  { %v36_v1 = vld [vmem:[%s577_s1 + $0x78] sm:$0xff]  ;;  %121 = vmatpush.msra.mxu2 %v68_v0  ;;  %v35_v3 = vld [vmem:[%s577_s1 + $0x70] sm:$0xff]  ;;  %v34_v6 = vld [vmem:[%s577_s1 + $0x68] sm:$0xff] }
   0x3   :  { %81 = vmatpush.msra.mxu0 %v36_v1  ;;  %v52_v4 = vld [vmem:[%s577_s1 + $0xf8] sm:$0xff]  ;;  %v51_v7 = vld [vmem:[%s577_s1 + $0xf0] sm:$0xff]  ;;  %v50_v8 = vld [vmem:[%s577_s1 + $0xe8] sm:$0xff] }
   0x4   :  { %101 = vmatpush.msra.mxu1 %v52_v4  ;;  %122 = vmatpush.msra.mxu2 %v67_v2  ;;  %v65_v9 = vld [vmem:[%s577_s1 + $0x160] sm:$0xff]  ;;  %v64_v12 = vld [vmem:[%s577_s1 + $0x158] sm:$0xff]  ;;  %v63_v15 = vld [vmem:[%s577_s1 + $0x150] sm:$0xff] }
   0x5   :  { %82 = vmatpush.msra.mxu0 %v35_v3  ;;  %v33_v10 = vld [vmem:[%s577_s1 + $0x60] sm:$0xff]  ;;  %v32_v13 = vld [vmem:[%s577_s1 + $0x58] sm:$0xff]  ;;  %v31_v16 = vld [vmem:[%s577_s1 + $0x50] sm:$0xff] }
   0x6   :  { %102 = vmatpush.msra.mxu1 %v51_v7  ;;  %123 = vmatpush.msra.mxu2 %v66_v5  ;;  %v49_v11 = vld [vmem:[%s577_s1 + $0xe0] sm:$0xff]  ;;  %v48_v14 = vld [vmem:[%s577_s1 + $0xd8] sm:$0xff]  ;;  %v47_v17 = vld [vmem:[%s577_s1 + $0xd0] sm:$0xff] }
   0x7   :  { %83 = vmatpush.msra.mxu0 %v34_v6  ;;  %v62_v18 = vld [vmem:[%s577_s1 + $0x148] sm:$0xff]  ;;  %v61_v21 = vld [vmem:[%s577_s1 + $0x140] sm:$0xff]  ;;  %v60_v24 = vld [vmem:[%s577_s1 + $0x138] sm:$0xff] }
   0x8   :  { %103 = vmatpush.msra.mxu1 %v50_v8  ;;  %124 = vmatpush.msra.mxu2 %v65_v9  ;;  %v30_v19 = vld [vmem:[%s577_s1 + $0x48] sm:$0xff]  ;;  %v29_v22 = vld [vmem:[%s577_s1 + $0x40] sm:$0xff]  ;;  %v28_v25 = vld [vmem:[%s577_s1 + $0x38] sm:$0xff] }
   0x9   :  { %84 = vmatpush.msra.mxu0 %v33_v10  ;;  %v46_v20 = vld [vmem:[%s577_s1 + $0xc8] sm:$0xff]  ;;  %v45_v23 = vld [vmem:[%s577_s1 + $0xc0] sm:$0xff]  ;;  %v44_v26 = vld [vmem:[%s577_s1 + $0xb8] sm:$0xff] }
   0xa   :  { %104 = vmatpush.msra.mxu1 %v49_v11  ;;  %125 = vmatpush.msra.mxu2 %v64_v12  ;;  %v20_v27 = vld [vmem:[%s578_s0] sm:$0x3f]  ;;  %v59_v28 = vld [vmem:[%s577_s1 + $0x130] sm:$0xff]  ;;  %v149_v30 = vld [vmem:[%s579_s3 + $0x38] sm:$0xff] }
   0xb   :  { %85 = vmatpush.msra.mxu0 %v32_v13  ;;  %v27_v29 = vld [vmem:[%s577_s1 + $0x30] sm:$0xff]  ;;  %74 = vst [vmem:[#allocation1] ss:$4 sm:$0xff] %v20_v27  ;;  %v58_v33 = vld [vmem:[%s577_s1 + $0x128] sm:$0xff]  ;;  %166 = vmatpush.msra.mxu3 %v149_v30  ;;  %v57_v37 = vld [vmem:[%s577_s1 + $0x120] sm:$0xff] }
   0xc   :  { %105 = vmatpush.msra.mxu1 %v48_v14  ;;  %126 = vmatpush.msra.mxu2 %v63_v15  ;;  %v43_v31 = vld [vmem:[%s577_s1 + $0xb0] sm:$0xff]  ;;  %v26_v34 = vld [vmem:[%s577_s1 + $0x28] sm:$0xff]  ;;  %v25_v38 = vld [vmem:[%s577_s1 + $0x20] sm:$0xff] }
   0xd   :  { %86 = vmatpush.msra.mxu0 %v31_v16  ;;  %v148_v32 = vld [vmem:[%s579_s3 + $0x30] sm:$0xff]  ;;  %v42_v35 = vld [vmem:[%s577_s1 + $0xa8] sm:$0xff]  ;;  %v41_v39 = vld [vmem:[%s577_s1 + $0xa0] sm:$0xff] }
   0xe   :  { %106 = vmatpush.msra.mxu1 %v47_v17  ;;  %127 = vmatpush.msra.mxu2 %v62_v18  ;;  %v147_v36 = vld [vmem:[%s579_s3 + $0x28] sm:$0xff]  ;;  %v146_v40 = vld [vmem:[%s579_s3 + $0x20] sm:$0xff]  ;;  %v56_v41 = vld [vmem:[%s577_s1 + $0x118] sm:$0xff] }
   0xf   :  { %87 = vmatpush.msra.mxu0 %v30_v19  ;;  %167 = vmatpush.msra.mxu3 %v148_v32  ;;  %v24_v42 = vld [vmem:[%s577_s1 + $0x18] sm:$0xff]  ;;  %v55_v45 = vld [vmem:[%s577_s1 + $0x110] sm:$0xff]  ;;  %v54_v49 = vld [vmem:[%s577_s1 + $0x108] sm:$0xff] }
  0x10   :  { %107 = vmatpush.msra.mxu1 %v46_v20  ;;  %128 = vmatpush.msra.mxu2 %v61_v21  ;;  %v40_v43 = vld [vmem:[%s577_s1 + $0x98] sm:$0xff]  ;;  %v23_v46 = vld [vmem:[%s577_s1 + $0x10] sm:$0xff]  ;;  %v22_v50 = vld [vmem:[%s577_s1 + $0x8] sm:$0xff] }
  0x11   :  { %88 = vmatpush.msra.mxu0 %v29_v22  ;;  %168 = vmatpush.msra.mxu3 %v147_v36  ;;  %v145_v44 = vld [vmem:[%s579_s3 + $0x18] sm:$0xff]  ;;  %v39_v47 = vld [vmem:[%s577_s1 + $0x90] sm:$0xff]  ;;  %v38_v51 = vld [vmem:[%s577_s1 + $0x88] sm:$0xff] }
  0x12   :  { %108 = vmatpush.msra.mxu1 %v45_v23  ;;  %129 = vmatpush.msra.mxu2 %v60_v24  ;;  %v144_v48 = vld [vmem:[%s579_s3 + $0x10] sm:$0xff]  ;;  %v143_v52 = vld [vmem:[%s579_s3 + $0x8] sm:$0xff]  ;;  %v53_v53 = vld [vmem:[%s577_s1 + $0x100] sm:$0xff] }
  0x13   :  { %89 = vmatpush.msra.mxu0 %v28_v25  ;;  %169 = vmatpush.msra.mxu3 %v146_v40  ;;  %v21_v54 = vld [vmem:[%s577_s1] sm:$0xff]  ;;  %v77_v55 = vld.sshfl [vmem:[#allocation1 + $0x10] sm:$0xff pattern:$0x73625140]  ;;  %v290_v58 = vld [vmem:[%s579_s3 + $0xb8] sm:$0xff] }
  0x14   :  { %109 = vmatpush.msra.mxu1 %v44_v26  ;;  %130 = vmatpush.msra.mxu2 %v59_v28  ;;  %v75_v56 = vld.sshfl [vmem:[#allocation1] sm:$0xff pattern:$0x73625140]  ;;  %v76_v59 = vld.sshfl [vmem:[#allocation1 + $0x8] sm:$0xff pattern:$0x73625140] }
  0x15   :  { %90 = vmatpush.msra.mxu0 %v27_v29  ;;  %170 = vmatpush.msra.mxu3 %v145_v44  ;;  %v37_v57 = vld [vmem:[%s577_s1 + $0x80] sm:$0xff]  ;;  %v289_v60 = vld [vmem:[%s579_s3 + $0xb0] sm:$0xff]  ;;  %v288_v61 = vld [vmem:[%s579_s3 + $0xa8] sm:$0xff] }
  0x16   :  { %110 = vmatpush.msra.mxu1 %v43_v31  ;;  %131 = vmatpush.msra.mxu2 %v58_v33  ;;  %v287_v62 = vld [vmem:[%s579_s3 + $0xa0] sm:$0xff]  ;;  %v280_v0 = vld [vmem:[%s579_s3 + $0x78] sm:$0xff]  ;;  %v279_v2 = vld [vmem:[%s579_s3 + $0x70] sm:$0xff] }
  0x17   :  { %91 = vmatpush.msra.mxu0 %v26_v34  ;;  %171 = vmatpush.msra.mxu3 %v144_v48  ;;  %v142_v63 = vld [vmem:[%s579_s3] sm:$0xff]  ;;  %v286_v1 = vld [vmem:[%s579_s3 + $0x98] sm:$0xff]  ;;  %v285_v3 = vld [vmem:[%s579_s3 + $0x90] sm:$0xff] }
  0x18   :  { %111 = vmatpush.msra.mxu1 %v42_v35  ;;  %132 = vmatpush.msra.mxu2 %v57_v37  ;;  %v278_v4 = vld [vmem:[%s579_s3 + $0x68] sm:$0xff]  ;;  %v277_v6 = vld [vmem:[%s579_s3 + $0x60] sm:$0xff]  ;;  %v276_v8 = vld [vmem:[%s579_s3 + $0x58] sm:$0xff] }
  0x19   :  { %92 = vmatpush.msra.mxu0 %v25_v38  ;;  %172 = vmatpush.msra.mxu3 %v143_v52  ;;  %v284_v5 = vld [vmem:[%s579_s3 + $0x88] sm:$0xff]  ;;  %v283_v7 = vld [vmem:[%s579_s3 + $0x80] sm:$0xff]  ;;  %v275_v9 = vld [vmem:[%s579_s3 + $0x50] sm:$0xff] }
  0x1a   :  { %112 = vmatpush.msra.mxu1 %v41_v39  ;;  %133 = vmatpush.msra.mxu2 %v56_v41  ;;  %v274_v10 = vld [vmem:[%s579_s3 + $0x48] sm:$0xff]  ;;  %v273_v11 = vld [vmem:[%s579_s3 + $0x40] sm:$0xff] }
  0x1b   :  { %93 = vmatpush.msra.mxu0 %v24_v42  ;;  %173 = vmatpush.msra.mxu3 %v142_v63  ;;  %v295_v12 = vld [vmem:[%s580_s2] ss:$0 sm:$0xff]  ;;  %v298_v22 = vld [vmem:[%s581_s4 + $0x1] ss:$0 sm:$0xff]  ;;  %v296_v23 = vld [vmem:[%s581_s4 + $0x2] ss:$0 sm:$0xff] }
  0x1c   :  { %113 = vmatpush.msra.mxu1 %v40_v43  ;;  %134 = vmatpush.msra.mxu2 %v55_v45  ;;  %v297_v21 = vld [vmem:[%s581_s4] ss:$0 sm:$0xff] }
  0x1d   :  { %94 = vmatpush.msra.mxu0 %v23_v46  ;;  %200 = vmatpush.msrb.mxu3 %v280_v0 }
  0x1e   :  { %114 = vmatpush.msra.mxu1 %v39_v47  ;;  %135 = vmatpush.msra.mxu2 %v54_v49 }
  0x1f   :  { %95 = vmatpush.msra.mxu0 %v22_v50  ;;  %201 = vmatpush.msrb.mxu3 %v279_v2 }
  0x20   :  { %115 = vmatpush.msra.mxu1 %v38_v51  ;;  %136 = vmatpush.msra.mxu2 %v53_v53 }
  0x21   :  { %96 = vmatpush.msra.mxu0 %v21_v54  ;;  %137 = vmatmul.f32.vlgmr.msra.gmra.mxu2 %v77_v55 }
  0x22   :  { %97 = vmatmul.f32.vlgmr.msra.gmra.mxu0 %v75_v56  ;;  %116 = vmatpush.msra.mxu1 %v37_v57 }
  0x23   :  { %234 = vmatpush.msrb.mxu0 %v290_v58  ;;  %117 = vmatmul.f32.vlgmr.msra.gmra.mxu1 %v76_v59 }
  0x24   :  { %202 = vmatpush.msrb.mxu3 %v278_v4 }
  0x25   :  { %235 = vmatpush.msrb.mxu0 %v289_v60 }
  0x26   :  { %203 = vmatpush.msrb.mxu3 %v277_v6 }
  0x27   :  { %236 = vmatpush.msrb.mxu0 %v288_v61 }
  0x28   :  { %204 = vmatpush.msrb.mxu3 %v276_v8 }
  0x29   :  { %237 = vmatpush.msrb.mxu0 %v287_v62 }
  0x2a   :  { %205 = vmatpush.msrb.mxu3 %v275_v9 }
  0x2b   :  { %238 = vmatpush.msrb.mxu0 %v286_v1 }
  0x2c   :  { %206 = vmatpush.msrb.mxu3 %v274_v10 }
  0x2d   :  { %239 = vmatpush.msrb.mxu0 %v285_v3 }
  0x2e   :  { %207 = vmatpush.msrb.mxu3 %v273_v11 }
  0x2f   :  { %240 = vmatpush.msrb.mxu0 %v284_v5 }
  0x31   :  { %241 = vmatpush.msrb.mxu0 %v283_v7 }
  0x9f   :  { %v98_v13 = vpop.f32.mrf.mxu0 }
  0xa0   :  { %v99_v14 = vadd.f32 %v295_v12, %v98_v13  ;;  %v118_v15 = vpop.f32.mrf.mxu1 }
  0xa2   :  { %v119_v16 = vadd.f32 %v118_v15, %v99_v14 }
  0xa4   :  { %v138_v17 = vpop.f32.mrf.mxu2 }
  0xa5   :  { %v139_v18 = vadd.f32 %v138_v17, %v119_v16 }
  0xa7   :  { %v141_v19 = vmax.f32 %v139_v18, 0.0 }
  0xa9   :  { %272 = vmatmul.msk.f32.vlgmr.msra.gmra.mxu3 %vm154_vm0, %v141_v19  ;;  %292 = vmatmul.msk.f32.vlgmr.msrb.gmra.mxu0 %vm154_vm0, %v141_v19 }
  0xb1   :  { %282 = vmatmul.msk.f32.vlgmr.msrb.gmra.mxu3 %vm154_vm0, %v141_v19 }
 0x126   :  { %v243_v24 = vpop.f32.mrf.mxu0 }
 0x127   :  { %v244_v28 = vadd.f32 %v296_v23, %v243_v24 }
 0x12c   :  { %v175_v20 = vpop.f32.mrf.mxu3 }
 0x12d   :  { %v176_v26 = vadd.f32 %v297_v21, %v175_v20 }
 0x134   :  { %v209_v25 = vpop.f32.mrf.mxu3 }
 0x135   :  { %v210_v27 = vadd.f32 %v298_v22, %v209_v25 }
 0x137   :  { %v246_v29 = vmax.f32 %v176_v26, %v210_v27 }
 0x139   :  { %v247_v30 = vmax.f32 %v246_v29, %v244_v28 }
 0x13b   :  { %v248_v31 = vsub.f32 %v176_v26, %v247_v30  ;;  %v251_v32 = vsub.f32 %v210_v27, %v247_v30  ;;  %v254_v33 = vsub.f32 %v244_v28, %v247_v30 }
 0x13d   :  { %v249_v34 = vmul.f32 1.442695, %v248_v31  ;;  %v252_v35 = vmul.f32 1.442695, %v251_v32  ;;  %v255_v36 = vmul.f32 1.442695, %v254_v33 }
 0x13f   :  { %299 = vpow2.f32 %v249_v34 }
 0x140   :  { %301 = vpow2.f32 %v252_v35 }
 0x141   :  { %303 = vpow2.f32 %v255_v36 }
 0x145   :  { %v300_v37 = vpop.eup %299 }
 0x146   :  { %v302_v38 = vpop.eup %301 }
 0x147   :  { %v257_v39 = vadd.f32 %v302_v38, %v300_v37  ;;  %v304_v40 = vpop.eup %303 }
 0x149   :  { %v258_v41 = vadd.f32 %v304_v40, %v257_v39 }
 0x14b   :  { %305 = vrcp.f32 %v258_v41 }
 0x151   :  { %v306_v42 = vpop.eup %305 }
 0x152   :  { %v260_v43 = vmul.f32 %v306_v42, %v300_v37  ;;  %v262_v44 = vmul.f32 %v306_v42, %v302_v38  ;;  %v265_v45 = vmul.f32 %v306_v42, %v304_v40 }
 0x154   :  { %261 = vst [vmem:[%s582_s5] sm:$0x3] %v260_v43 }
 0x155   :  { %293 = vst [vmem:[%s582_s5 + $0x2] sm:$0x3] %v262_v44 }
 0x156   :  { %294 = vst [vmem:[%s582_s5 + $0x4] sm:$0x3] %v265_v45 }

// kernel: forward.18
= control target key start
LH: loop header
LB: loop body
LE: loop exit
PB: predicated region body
PF: predicated region fallthrough
CT: control target
= control target key end

     0   :  { %s695_s15 = smov [#allocation4]   ;;  %s794_s0 = inlined_call_operand.vmem [shape: s32[3], index: 0, kind: input, shape index: {}]   ;;  %s795_s1 = inlined_call_operand.vmem [shape: bf16[3,2,64,128], index: 1, kind: input, shape index: {}]   ;;  %s796_s2 = inlined_call_operand.vmem [shape: f32[1,3,2,128], index: 2, kind: input, shape index: {}]   ;;  %s797_s3 = inlined_call_operand.vmem [shape: bf16[1,2,64,128], index: 3, kind: output, shape index: {}]  }
   0x1   :  { %s9_s14 = sshll.u32 %s794_s0, 4  ;;  %s10_s14 = int_to_ptr.vmem [resolvable:$true] %s9_s14 }
   0x2   :  { %12 = dma.vmem_to_smem %s10_s14, 16, %s695_s15, [#allocation3] }
   0x3   :  { %681 = dma.done.wait [#allocation3], 16 }
   0x4   :  { %682 = vsyncadd [#allocation3], 4294967280 }
   0x5   :  { %15 = sfence }
   0x6   :  { %s720_s16 = smov 0   ;;  %s722_s17 = smov 0  }
   0x7   :  { %s724_s18 = smov 0  }
   0x8 LB: > { %s33_s0 = sadd.s32 1, %s689_s17  ;;  %p534_p0 = scmp.ge.s32.totalorder %s693_s18, 1  ;;  %s693_s18 = sphi %s724_s18, %s21_s18   ;;  %s689_s17 = sphi %s722_s17, %s799_s17   ;;  %s685_s16 = sphi %s720_s16, %s798_s16  }
   0x9   : > { %p34_p1 = scmp.ge.s32.totalorder %s33_s0, 3  ;;  %p176_p2 = scmp.lt.s32.totalorder %s693_s18, 4 }
   0xb   : > { %s801_s0 = smov (%p34_p1, %s33_s0), 0  ;;  %p177_p3 = pnand %p534_p0, %p176_p2 }
   0xc   : > { %s219_s19 = sld [smem:[#allocation4 + %s685_s16]] (!%p177_p3)  ;;  %p235_p4 = scmp.lt.s32.totalorder (!%p177_p3), %s685_s16, 2 }
   0xd   : > { %180 = sbr.rel (%p177_p3) target bundleno = 75 (0x4b), region = 28  ;;  %p538_p6 = scmp.ne.s32.totalorder (!%p177_p3), %s685_s16, 0 }
  0x12   : > { %s236_s20 = scalar_select %p235_p4, %s685_s16, 2 }
  0x13   : > { %p221_p5 = scmp.lt.s32.totalorder %s219_s19, 2  ;;  %254 = sbr.rel (%p538_p6) target bundleno = 41 (0x29), region = 32 }
  0x14   : > { %s537_s21 = sshll.u32 %s236_s20, 1 }
  0x15   : > { %s240_s24 = scalar_lea.vmem %s796_s2, %s537_s21  ;;  %s803_s19 = smov (!%p221_p5, %s219_s19), 2 }
  0x16   : > { %s544_s25 = sshll.u32 %s803_s19, 6 }
  0x17   : > { %s749_s28 = scalar_lea.vmem %s795_s1, %s544_s25 }
  0x18   : > { %v696_v0 = vmov 0.0  }
  0x19   : > { %255 = vst [vmem:[#allocation2 + $0x30] sm:$0xff] %v696_v0 }
  0x1a   : > { %256 = vst [vmem:[#allocation2] sm:$0xff] %v696_v0 }
  0x1b   : > { %257 = vst [vmem:[#allocation2 + $0x58] sm:$0xff] %v696_v0 }
  0x1c   : > { %258 = vst [vmem:[#allocation2 + $0x18] sm:$0xff] %v696_v0 }
  0x1d   : > { %259 = vst [vmem:[#allocation2 + $0x50] sm:$0xff] %v696_v0 }
  0x1e   : > { %260 = vst [vmem:[#allocation2 + $0x68] sm:$0xff] %v696_v0 }
  0x1f   : > { %261 = vst [vmem:[#allocation2 + $0x8] sm:$0xff] %v696_v0 }
  0x20   : > { %262 = vst [vmem:[#allocation2 + $0x48] sm:$0xff] %v696_v0 }
  0x21   : > { %263 = vst [vmem:[#allocation2 + $0x40] sm:$0xff] %v696_v0 }
  0x22   : > { %264 = vst [vmem:[#allocation2 + $0x20] sm:$0xff] %v696_v0 }
  0x23   : > { %265 = vst [vmem:[#allocation2 + $0x10] sm:$0xff] %v696_v0 }
  0x24   : > { %266 = vst [vmem:[#allocation2 + $0x38] sm:$0xff] %v696_v0 }
  0x25   : > { %267 = vst [vmem:[#allocation2 + $0x60] sm:$0xff] %v696_v0 }
  0x26   : > { %268 = vst [vmem:[#allocation2 + $0x70] sm:$0xff] %v696_v0 }
  0x27   : > { %269 = vst [vmem:[#allocation2 + $0x78] sm:$0xff] %v696_v0 }
  0x28   : > { %270 = vst [vmem:[#allocation2 + $0x28] sm:$0xff] %v696_v0 }
  0x29 PF: > { %v271_v1 = vld [vmem:[%s240_s24] sm:$0x3]  ;;  %v617_v6 = vld [vmem:[%s749_s28 + $0x8] sm:$0xff]   ;;  %v272_v7 = vld [vmem:[#allocation2 + $0x30] sm:$0xff]  ;;  %p539_p7 = scmp.ne.s32.totalorder %s685_s16, 2 }
  0x2a   : > { %v546_v2 = vld [vmem:[%s749_s28] sm:$0xff]   ;;  %v322_v4 = vperm.slane %v271_v1, 0  ;;  %v551_v9 = vunpack.c.l.bf16 %v617_v6  ;;  %v552_v10 = vunpack.c.h.bf16 %v617_v6  ;;  %v618_v11 = vld [vmem:[%s749_s28 + $0x10] sm:$0xff]   ;;  %v321_v12 = vrot.slane %v271_v1, 1  ;;  %v274_v15 = vld [vmem:[#allocation2 + $0x58] sm:$0xff] }
  0x2b   : > { %v547_v3 = vunpack.c.l.bf16 %v546_v2  ;;  %v548_v5 = vunpack.c.h.bf16 %v546_v2  ;;  %v273_v8 = vld [vmem:[#allocation2] sm:$0xff]  ;;  %v275_v16 = vld [vmem:[#allocation2 + $0x18] sm:$0xff]  ;;  %v555_v17 = vunpack.c.l.bf16 %v618_v11  ;;  %v556_v18 = vunpack.c.h.bf16 %v618_v11  ;;  %v276_v22 = vld [vmem:[#allocation2 + $0x50] sm:$0xff] }
  0x2c   : > { %v619_v19 = vld [vmem:[%s749_s28 + $0x18] sm:$0xff]   ;;  %v328_v20 = vmul.f32 %v551_v9, %v322_v4  ;;  %v329_v21 = vmul.f32 %v552_v10, %v322_v4  ;;  %v277_v23 = vld [vmem:[#allocation2 + $0x68] sm:$0xff]  ;;  %v620_v26 = vld [vmem:[%s749_s28 + $0x20] sm:$0xff]   ;;  %v323_v42 = vperm.slane %v321_v12, 0 }
  0x2d   : > { %v326_v13 = vmul.f32 %v547_v3, %v322_v4  ;;  %v327_v14 = vmul.f32 %v548_v5, %v322_v4  ;;  %v559_v24 = vunpack.c.l.bf16 %v619_v19  ;;  %v560_v25 = vunpack.c.h.bf16 %v619_v19  ;;  %v278_v31 = vld [vmem:[#allocation2 + $0x8] sm:$0xff]  ;;  %v622_v38 = vld [vmem:[%s749_s28 + $0x30] sm:$0xff]   ;;  %v623_v43 = vld [vmem:[%s749_s28 + $0x38] sm:$0xff]  }
  0x2e   : > { %v330_v29 = vmul.f32 %v555_v17, %v322_v4  ;;  %v331_v30 = vmul.f32 %v556_v18, %v322_v4  ;;  %v279_v32 = vld [vmem:[#allocation2 + $0x48] sm:$0xff]  ;;  %v344_v34 = vadd.f32 %v328_v20, %v274_v15  ;;  %v345_v35 = vadd.f32 %v329_v21, %v275_v16  ;;  %v280_v46 = vld [vmem:[#allocation2 + $0x40] sm:$0xff]  ;;  %v282_v55 = vld [vmem:[#allocation2 + $0x10] sm:$0xff] }
  0x2f   : > { %v342_v27 = vadd.f32 %v326_v13, %v272_v7  ;;  %v343_v28 = vadd.f32 %v327_v14, %v273_v8  ;;  %v621_v33 = vld [vmem:[%s749_s28 + $0x28] sm:$0xff]   ;;  %v332_v36 = vmul.f32 %v559_v24, %v322_v4  ;;  %v333_v37 = vmul.f32 %v560_v25, %v322_v4  ;;  %v281_v50 = vld [vmem:[#allocation2 + $0x20] sm:$0xff]  ;;  %v283_v60 = vld [vmem:[#allocation2 + $0x38] sm:$0xff] }
  0x30   : > { %v346_v39 = vadd.f32 %v330_v29, %v276_v22  ;;  %v347_v40 = vadd.f32 %v331_v30, %v277_v23  ;;  %v563_v41 = vunpack.c.l.bf16 %v620_v26  ;;  %v564_v47 = vunpack.c.h.bf16 %v620_v26  ;;  %360 = vst [vmem:[#allocation2 + $0x58] sm:$0xff] %v344_v34  ;;  %v284_v0 = vld [vmem:[#allocation2 + $0x60] sm:$0xff]  ;;  %v285_v3 = vld [vmem:[#allocation2 + $0x70] sm:$0xff]  ;;  %v286_v6 = vld [vmem:[#allocation2 + $0x78] sm:$0xff] }
  0x31   : > { %358 = vst [vmem:[#allocation2 + $0x30] sm:$0xff] %v342_v27  ;;  %v348_v44 = vadd.f32 %v332_v36, %v278_v31  ;;  %v349_v45 = vadd.f32 %v333_v37, %v279_v32  ;;  %v567_v48 = vunpack.c.l.bf16 %v621_v33  ;;  %v568_v51 = vunpack.c.h.bf16 %v621_v33  ;;  %v287_v9 = vld [vmem:[#allocation2 + $0x28] sm:$0xff] }
  0x32   : > { %359 = vst [vmem:[#allocation2] sm:$0xff] %v343_v28  ;;  %v334_v49 = vmul.f32 %v563_v41, %v323_v42  ;;  %v571_v52 = vunpack.c.l.bf16 %v622_v38  ;;  %v572_v53 = vunpack.c.h.bf16 %v622_v38  ;;  %v335_v54 = vmul.f32 %v564_v47, %v323_v42 }
  0x33   : > { %361 = vst [vmem:[#allocation2 + $0x18] sm:$0xff] %v345_v35  ;;  %v336_v56 = vmul.f32 %v567_v48, %v323_v42  ;;  %v575_v57 = vunpack.c.l.bf16 %v623_v43  ;;  %v576_v58 = vunpack.c.h.bf16 %v623_v43  ;;  %v337_v61 = vmul.f32 %v568_v51, %v323_v42 }
  0x34   : > { %362 = vst [vmem:[#allocation2 + $0x50] sm:$0xff] %v346_v39  ;;  %v350_v59 = vadd.f32 %v334_v49, %v280_v46  ;;  %v338_v62 = vmul.f32 %v571_v52, %v323_v42  ;;  %v351_v63 = vadd.f32 %v335_v54, %v281_v50  ;;  %v339_v1 = vmul.f32 %v572_v53, %v323_v42 }
  0x35   : > { %363 = vst [vmem:[#allocation2 + $0x68] sm:$0xff] %v347_v40  ;;  %v352_v2 = vadd.f32 %v336_v56, %v282_v55  ;;  %v340_v4 = vmul.f32 %v575_v57, %v323_v42  ;;  %v353_v5 = vadd.f32 %v337_v61, %v283_v60  ;;  %v341_v7 = vmul.f32 %v576_v58, %v323_v42 }
  0x36   : > { %364 = vst [vmem:[#allocation2 + $0x8] sm:$0xff] %v348_v44  ;;  %v354_v8 = vadd.f32 %v338_v62, %v284_v0  ;;  %v355_v10 = vadd.f32 %v339_v1, %v285_v3 }
  0x37   : > { %365 = vst [vmem:[#allocation2 + $0x48] sm:$0xff] %v349_v45  ;;  %v356_v11 = vadd.f32 %v340_v4, %v286_v6  ;;  %v357_v12 = vadd.f32 %v341_v7, %v287_v9 }
  0x38   : > { %366 = vst [vmem:[#allocation2 + $0x40] sm:$0xff] %v350_v59 }
  0x39   : > { %367 = vst [vmem:[#allocation2 + $0x20] sm:$0xff] %v351_v63 }
  0x3a   : > { %368 = vst [vmem:[#allocation2 + $0x10] sm:$0xff] %v352_v2 }
  0x3b   : > { %369 = vst [vmem:[#allocation2 + $0x38] sm:$0xff] %v353_v5  ;;  %377 = sbr.rel (%p539_p7) target bundleno = 75 (0x4b), region = 36 }
  0x3c   : > { %370 = vst [vmem:[#allocation2 + $0x60] sm:$0xff] %v354_v8 }
  0x3d   : > { %371 = vst [vmem:[#allocation2 + $0x70] sm:$0xff] %v355_v10 }
  0x3e   : > { %372 = vst [vmem:[#allocation2 + $0x78] sm:$0xff] %v356_v11 }
  0x3f   : > { %373 = vst [vmem:[#allocation2 + $0x28] sm:$0xff] %v357_v12 }
  0x40   : > { %v378_v13 = vld [vmem:[#allocation2 + $0x30] sm:$0xff]  ;;  %v379_v14 = vld [vmem:[#allocation2] sm:$0xff]  ;;  %v380_v15 = vld [vmem:[#allocation2 + $0x58] sm:$0xff] }
  0x41   : > { %v580_v16 = vpack.c.bf16 %v379_v14, %v378_v13  ;;  %v381_v17 = vld [vmem:[#allocation2 + $0x18] sm:$0xff]  ;;  %v382_v18 = vld [vmem:[#allocation2 + $0x50] sm:$0xff]  ;;  %v383_v19 = vld [vmem:[#allocation2 + $0x68] sm:$0xff] }
  0x42   : > { %v585_v20 = vpack.c.bf16 %v381_v17, %v380_v15  ;;  %v590_v21 = vpack.c.bf16 %v383_v19, %v382_v18  ;;  %v384_v22 = vld [vmem:[#allocation2 + $0x8] sm:$0xff]  ;;  %v386_v24 = vld [vmem:[#allocation2 + $0x40] sm:$0xff]  ;;  %v388_v27 = vld [vmem:[#allocation2 + $0x10] sm:$0xff] }
  0x43   : > { %v385_v23 = vld [vmem:[#allocation2 + $0x48] sm:$0xff]  ;;  %581 = vst [vmem:[%s797_s3] sm:$0xff] %v580_v16   ;;  %v387_v26 = vld [vmem:[#allocation2 + $0x20] sm:$0xff]  ;;  %v389_v28 = vld [vmem:[#allocation2 + $0x38] sm:$0xff] }
  0x44   : > { %v595_v25 = vpack.c.bf16 %v385_v23, %v384_v22  ;;  %624 = vst [vmem:[%s797_s3 + $0x8] sm:$0xff] %v585_v20   ;;  %v600_v29 = vpack.c.bf16 %v387_v26, %v386_v24  ;;  %v605_v30 = vpack.c.bf16 %v389_v28, %v388_v27  ;;  %v390_v31 = vld [vmem:[#allocation2 + $0x60] sm:$0xff]  ;;  %v391_v32 = vld [vmem:[#allocation2 + $0x70] sm:$0xff] }
  0x45   : > { %v392_v33 = vld [vmem:[#allocation2 + $0x78] sm:$0xff]  ;;  %625 = vst [vmem:[%s797_s3 + $0x10] sm:$0xff] %v590_v21   ;;  %v610_v34 = vpack.c.bf16 %v391_v32, %v390_v31 }
  0x46   : > { %v393_v35 = vld [vmem:[#allocation2 + $0x28] sm:$0xff]  ;;  %626 = vst [vmem:[%s797_s3 + $0x18] sm:$0xff] %v595_v25  }
  0x47   : > { %v615_v36 = vpack.c.bf16 %v393_v35, %v392_v33  ;;  %627 = vst [vmem:[%s797_s3 + $0x20] sm:$0xff] %v600_v29  }
  0x48   : > { %628 = vst [vmem:[%s797_s3 + $0x28] sm:$0xff] %v605_v30  }
  0x49   : > { %629 = vst [vmem:[%s797_s3 + $0x30] sm:$0xff] %v610_v34  }
  0x4a   : > { %630 = vst [vmem:[%s797_s3 + $0x38] sm:$0xff] %v615_v36  }
  0x4b PF: > { %s21_s18 = sadd.s32 1, %s693_s18   ;;  %s798_s16 = smov %s689_s17 }
  0x4c   : > { %p18_p8 = scmp.ge.s32.totalorder %s21_s18, 5   ;;  %s799_s17 = smov %s801_s0 }
  0x4e   :  { %20 = sbr.rel (!%p18_p8) target bundleno = 8 (0x8), region = 69 }

// kernel: forward.19
= control target key start
LH: loop header
LB: loop body
LE: loop exit
PB: predicated region body
PF: predicated region fallthrough
CT: control target
= control target key end

     0   :  { %s478_s1 = inlined_call_operand.vmem [shape: bf16[1,128,128], index: 1, kind: input, shape index: {}]   ;;  %s479_s2 = inlined_call_operand.vmem [shape: f32[1,128], index: 2, kind: input, shape index: {}]   ;;  %s480_s0 = inlined_call_operand.vmem [shape: bf16[1,128,128], index: 0, kind: input, shape index: {}]   ;;  %s481_s3 = inlined_call_operand.vmem [shape: bf16[128,128], index: 3, kind: output, shape index: {}]  }
   0x1   :  { %v310_v0 = vld [vmem:[%s478_s1 + $0x38] sm:$0xff]  ;;  %v309_v1 = vld [vmem:[%s478_s1 + $0x30] sm:$0xff]  ;;  %v308_v2 = vld [vmem:[%s478_s1 + $0x28] sm:$0xff] }
   0x2   :  { %146 = vmatpush.bf16.msra.mxu0 %v310_v0  ;;  %358 = vmatpush.bf16.msra.mxu1 %v310_v0  ;;  %v307_v3 = vld [vmem:[%s478_s1 + $0x20] sm:$0xff]  ;;  %v306_v4 = vld [vmem:[%s478_s1 + $0x18] sm:$0xff]  ;;  %v305_v5 = vld [vmem:[%s478_s1 + $0x10] sm:$0xff] }
   0x3   :  { %359 = vmatpush.bf16.msra.mxu2 %v310_v0  ;;  %360 = vmatpush.bf16.msra.mxu3 %v310_v0  ;;  %v304_v6 = vld [vmem:[%s478_s1 + $0x8] sm:$0xff]  ;;  %v303_v7 = vld [vmem:[%s478_s1] sm:$0xff]  ;;  %v297_v9 = vld [vmem:[%s480_s0 + $0x10] sm:$0xff] }
   0x4   :  { %v295_v8 = vld [vmem:[%s480_s0] sm:$0xff]  ;;  %v301_v11 = vld [vmem:[%s480_s0 + $0x30] sm:$0xff]  ;;  %v296_v12 = vld [vmem:[%s480_s0 + $0x8] sm:$0xff] }
   0x5   :  { %v299_v10 = vld [vmem:[%s480_s0 + $0x20] sm:$0xff]  ;;  %v298_v13 = vld [vmem:[%s480_s0 + $0x18] sm:$0xff]  ;;  %v300_v14 = vld [vmem:[%s480_s0 + $0x28] sm:$0xff] }
   0x6   :  { %147 = vmatpush.bf16.msra.mxu0 %v309_v1  ;;  %361 = vmatpush.bf16.msra.mxu1 %v309_v1  ;;  %v302_v15 = vld [vmem:[%s480_s0 + $0x38] sm:$0xff]  ;;  %v382_v18 = vld [vmem:[%s479_s2] ss:$0 sm:$0xff] }
   0x7   :  { %362 = vmatpush.bf16.msra.mxu2 %v309_v1  ;;  %363 = vmatpush.bf16.msra.mxu3 %v309_v1 }
   0xa   :  { %148 = vmatpush.bf16.msra.mxu0 %v308_v2  ;;  %364 = vmatpush.bf16.msra.mxu1 %v308_v2 }
   0xb   :  { %365 = vmatpush.bf16.msra.mxu2 %v308_v2  ;;  %366 = vmatpush.bf16.msra.mxu3 %v308_v2 }
   0xe   :  { %149 = vmatpush.bf16.msra.mxu0 %v307_v3  ;;  %367 = vmatpush.bf16.msra.mxu1 %v307_v3 }
   0xf   :  { %368 = vmatpush.bf16.msra.mxu2 %v307_v3  ;;  %369 = vmatpush.bf16.msra.mxu3 %v307_v3 }
  0x12   :  { %150 = vmatpush.bf16.msra.mxu0 %v306_v4  ;;  %370 = vmatpush.bf16.msra.mxu1 %v306_v4 }
  0x13   :  { %371 = vmatpush.bf16.msra.mxu2 %v306_v4  ;;  %372 = vmatpush.bf16.msra.mxu3 %v306_v4 }
  0x16   :  { %151 = vmatpush.bf16.msra.mxu0 %v305_v5  ;;  %373 = vmatpush.bf16.msra.mxu1 %v305_v5 }
  0x17   :  { %374 = vmatpush.bf16.msra.mxu2 %v305_v5  ;;  %375 = vmatpush.bf16.msra.mxu3 %v305_v5 }
  0x1a   :  { %152 = vmatpush.bf16.msra.mxu0 %v304_v6  ;;  %376 = vmatpush.bf16.msra.mxu1 %v304_v6 }
  0x1b   :  { %377 = vmatpush.bf16.msra.mxu2 %v304_v6  ;;  %378 = vmatpush.bf16.msra.mxu3 %v304_v6 }
  0x1e   :  { %153 = vmatpush.bf16.msra.mxu0 %v303_v7  ;;  %379 = vmatpush.bf16.msra.mxu1 %v303_v7 }
  0x1f   :  { %380 = vmatpush.bf16.msra.mxu2 %v303_v7  ;;  %381 = vmatpush.bf16.msra.mxu3 %v303_v7 }
  0x21   :  { %154 = vmatmul.bf16.vlgmr.msra.gmra.mxu0 %v295_v8  ;;  %164 = vmatmul.bf16.vlgmr.msra.gmra.mxu1 %v297_v9 }
  0x22   :  { %174 = vmatmul.bf16.vlgmr.msra.gmra.mxu2 %v299_v10  ;;  %184 = vmatmul.bf16.vlgmr.msra.gmra.mxu3 %v301_v11 }
  0x31   :  { %159 = vmatmul.bf16.gmra.mxu0 %v296_v12  ;;  %169 = vmatmul.bf16.gmra.mxu1 %v298_v13 }
  0x32   :  { %179 = vmatmul.bf16.gmra.mxu2 %v300_v14  ;;  %189 = vmatmul.bf16.gmra.mxu3 %v302_v15 }
  0x9e   :  { %v155_v16 = vpop.f32.mrf.mxu0  ;;  %v165_v17 = vpop.f32.mrf.mxu1 }
  0x9f   :  { %v156_v23 = vadd.f32 %v382_v18, %v155_v16  ;;  %v166_v24 = vadd.f32 %v382_v18, %v165_v17 }
  0xa5   :  { %v175_v19 = vpop.f32.mrf.mxu2  ;;  %v185_v20 = vpop.f32.mrf.mxu3 }
  0xa6   :  { %v157_v21 = vpop.f32.mrf.mxu0  ;;  %v167_v22 = vpop.f32.mrf.mxu1  ;;  %v176_v31 = vadd.f32 %v382_v18, %v175_v19  ;;  %v186_v32 = vadd.f32 %v382_v18, %v185_v20 }
  0xa7   :  { %v158_v25 = vadd.f32 %v382_v18, %v157_v21  ;;  %v168_v26 = vadd.f32 %v382_v18, %v167_v22 }
  0xa9   :  { %v314_v27 = vpack.c.bf16 %v158_v25, %v156_v23  ;;  %v324_v28 = vpack.c.bf16 %v168_v26, %v166_v24 }
  0xab   :  { %315 = vst [vmem:[%s481_s3] sm:$0xff] %v314_v27  }
  0xac   :  { %352 = vst [vmem:[%s481_s3 + $0x10] sm:$0xff] %v324_v28  }
  0xad   :  { %v177_v29 = vpop.f32.mrf.mxu2  ;;  %v187_v30 = vpop.f32.mrf.mxu3 }
  0xae   :  { %v178_v33 = vadd.f32 %v382_v18, %v177_v29  ;;  %v188_v34 = vadd.f32 %v382_v18, %v187_v30  ;;  %v160_v35 = vpop.f32.mrf.mxu0  ;;  %v170_v36 = vpop.f32.mrf.mxu1 }
  0xaf   :  { %v161_v43 = vadd.f32 %v382_v18, %v160_v35  ;;  %v171_v44 = vadd.f32 %v382_v18, %v170_v36 }
  0xb0   :  { %v334_v37 = vpack.c.bf16 %v178_v33, %v176_v31  ;;  %v344_v38 = vpack.c.bf16 %v188_v34, %v186_v32 }
  0xb2   :  { %354 = vst [vmem:[%s481_s3 + $0x20] sm:$0xff] %v334_v37  }
  0xb3   :  { %356 = vst [vmem:[%s481_s3 + $0x30] sm:$0xff] %v344_v38  }
  0xb5   :  { %v180_v39 = vpop.f32.mrf.mxu2  ;;  %v190_v40 = vpop.f32.mrf.mxu3 }
  0xb6   :  { %v162_v41 = vpop.f32.mrf.mxu0  ;;  %v172_v42 = vpop.f32.mrf.mxu1  ;;  %v181_v51 = vadd.f32 %v382_v18, %v180_v39  ;;  %v191_v52 = vadd.f32 %v382_v18, %v190_v40 }
  0xb7   :  { %v163_v45 = vadd.f32 %v382_v18, %v162_v41  ;;  %v173_v46 = vadd.f32 %v382_v18, %v172_v42 }
  0xb9   :  { %v319_v47 = vpack.c.bf16 %v163_v45, %v161_v43  ;;  %v329_v48 = vpack.c.bf16 %v173_v46, %v171_v44 }
  0xbb   :  { %351 = vst [vmem:[%s481_s3 + $0x8] sm:$0xff] %v319_v47  }
  0xbc   :  { %353 = vst [vmem:[%s481_s3 + $0x18] sm:$0xff] %v329_v48  }
  0xbd   :  { %v182_v49 = vpop.f32.mrf.mxu2  ;;  %v192_v50 = vpop.f32.mrf.mxu3 }
  0xbe   :  { %v183_v53 = vadd.f32 %v382_v18, %v182_v49  ;;  %v193_v54 = vadd.f32 %v382_v18, %v192_v50 }
  0xc0   :  { %v339_v55 = vpack.c.bf16 %v183_v53, %v181_v51  ;;  %v349_v56 = vpack.c.bf16 %v193_v54, %v191_v52 }
  0xc2   :  { %355 = vst [vmem:[%s481_s3 + $0x28] sm:$0xff] %v339_v55  }
  0xc3   :  { %357 = vst [vmem:[%s481_s3 + $0x38] sm:$0xff] %v349_v56  }

// kernel: forward.15
= control target key start
LH: loop header
LB: loop body
LE: loop exit
PB: predicated region body
PF: predicated region fallthrough
CT: control target
= control target key end

     0   :  { %s1242_s1 = inlined_call_operand.vmem [shape: bf16[3,128,128], index: 1, kind: input, shape index: {}]   ;;  %s1243_s0 = inlined_call_operand.vmem [shape: bf16[3,128,128], index: 0, kind: input, shape index: {}]   ;;  %s1244_s2 = inlined_call_operand.vmem [shape: f32[1,128], index: 2, kind: input, shape index: {}]   ;;  %s1245_s3 = inlined_call_operand.vmem [shape: bf16[128,128], index: 3, kind: output, shape index: {}]  }
   0x1   :  { %v908_v0 = vld [vmem:[%s1242_s1 + $0x78] sm:$0xff]  ;;  %v907_v3 = vld [vmem:[%s1242_s1 + $0x70] sm:$0xff]  ;;  %v906_v6 = vld [vmem:[%s1242_s1 + $0x68] sm:$0xff] }
   0x2   :  { %v892_v1 = vld [vmem:[%s1242_s1 + $0x38] sm:$0xff]  ;;  %176 = vmatpush.bf16.msra.mxu0 %v908_v0  ;;  %972 = vmatpush.bf16.msra.mxu3 %v908_v0  ;;  %v891_v4 = vld [vmem:[%s1242_s1 + $0x30] sm:$0xff]  ;;  %v890_v7 = vld [vmem:[%s1242_s1 + $0x28] sm:$0xff] }
   0x3   :  { %v1026_v2 = vld [vmem:[%s1242_s1 + $0xb8] sm:$0xff]  ;;  %321 = vmatpush.bf16.msra.mxu1 %v892_v1  ;;  %v1038_v5 = vld [vmem:[%s1242_s1 + $0xb0] sm:$0xff]  ;;  %v1050_v8 = vld [vmem:[%s1242_s1 + $0xa8] sm:$0xff] }
   0x4   :  { %500 = vmatpush.bf16.msra.mxu2 %v1026_v2  ;;  %v905_v9 = vld [vmem:[%s1242_s1 + $0x60] sm:$0xff]  ;;  %v904_v12 = vld [vmem:[%s1242_s1 + $0x58] sm:$0xff]  ;;  %v903_v15 = vld [vmem:[%s1242_s1 + $0x50] sm:$0xff] }
   0x5   :  { %v889_v10 = vld [vmem:[%s1242_s1 + $0x20] sm:$0xff]  ;;  %v888_v13 = vld [vmem:[%s1242_s1 + $0x18] sm:$0xff]  ;;  %v887_v16 = vld [vmem:[%s1242_s1 + $0x10] sm:$0xff] }
   0x6   :  { %177 = vmatpush.bf16.msra.mxu0 %v907_v3  ;;  %973 = vmatpush.bf16.msra.mxu3 %v907_v3  ;;  %v1062_v11 = vld [vmem:[%s1242_s1 + $0xa0] sm:$0xff]  ;;  %v1074_v14 = vld [vmem:[%s1242_s1 + $0x98] sm:$0xff]  ;;  %v1086_v17 = vld [vmem:[%s1242_s1 + $0x90] sm:$0xff] }
   0x7   :  { %322 = vmatpush.bf16.msra.mxu1 %v891_v4  ;;  %v902_v18 = vld [vmem:[%s1242_s1 + $0x48] sm:$0xff]  ;;  %v901_v21 = vld [vmem:[%s1242_s1 + $0x40] sm:$0xff]  ;;  %v899_v25 = vld [vmem:[%s1243_s0 + $0x70] sm:$0xff] }
   0x8   :  { %501 = vmatpush.bf16.msra.mxu2 %v1038_v5  ;;  %v886_v19 = vld [vmem:[%s1242_s1 + $0x8] sm:$0xff]  ;;  %v885_v22 = vld [vmem:[%s1242_s1] sm:$0xff]  ;;  %v900_v29 = vld [vmem:[%s1243_s0 + $0x78] sm:$0xff] }
   0x9   :  { %v918_v20 = vld [vmem:[%s1242_s1 + $0x88] sm:$0xff]  ;;  %v917_v23 = vld [vmem:[%s1242_s1 + $0x80] sm:$0xff]  ;;  %v895_v32 = vld [vmem:[%s1243_s0 + $0x50] sm:$0xff] }
   0xa   :  { %178 = vmatpush.bf16.msra.mxu0 %v906_v6  ;;  %974 = vmatpush.bf16.msra.mxu3 %v906_v6  ;;  %v893_v24 = vld [vmem:[%s1243_s0 + $0x40] sm:$0xff]  ;;  %v894_v28 = vld [vmem:[%s1243_s0 + $0x48] sm:$0xff]  ;;  %v883_v33 = vld [vmem:[%s1243_s0 + $0x30] sm:$0xff] }
   0xb   :  { %323 = vmatpush.bf16.msra.mxu1 %v890_v7  ;;  %v877_v26 = vld [vmem:[%s1243_s0] sm:$0xff]  ;;  %v878_v30 = vld [vmem:[%s1243_s0 + $0x8] sm:$0xff]  ;;  %v879_v34 = vld [vmem:[%s1243_s0 + $0x10] sm:$0xff] }
   0xc   :  { %502 = vmatpush.bf16.msra.mxu2 %v1050_v8  ;;  %v909_v27 = vld [vmem:[%s1243_s0 + $0x80] sm:$0xff]  ;;  %v910_v31 = vld [vmem:[%s1243_s0 + $0x88] sm:$0xff]  ;;  %v911_v35 = vld [vmem:[%s1243_s0 + $0x90] sm:$0xff] }
   0xd   :  { %v896_v36 = vld [vmem:[%s1243_s0 + $0x58] sm:$0xff]  ;;  %v897_v40 = vld [vmem:[%s1243_s0 + $0x60] sm:$0xff]  ;;  %v915_v41 = vld [vmem:[%s1243_s0 + $0xb0] sm:$0xff] }
   0xe   :  { %179 = vmatpush.bf16.msra.mxu0 %v905_v9  ;;  %975 = vmatpush.bf16.msra.mxu3 %v905_v9  ;;  %v884_v37 = vld [vmem:[%s1243_s0 + $0x38] sm:$0xff]  ;;  %v881_v42 = vld [vmem:[%s1243_s0 + $0x20] sm:$0xff]  ;;  %v898_v44 = vld [vmem:[%s1243_s0 + $0x68] sm:$0xff] }
   0xf   :  { %324 = vmatpush.bf16.msra.mxu1 %v889_v10  ;;  %v880_v38 = vld [vmem:[%s1243_s0 + $0x18] sm:$0xff]  ;;  %v913_v43 = vld [vmem:[%s1243_s0 + $0xa0] sm:$0xff]  ;;  %v882_v46 = vld [vmem:[%s1243_s0 + $0x28] sm:$0xff] }
  0x10   :  { %503 = vmatpush.bf16.msra.mxu2 %v1062_v11  ;;  %v912_v39 = vld [vmem:[%s1243_s0 + $0x98] sm:$0xff]  ;;  %v914_v47 = vld [vmem:[%s1243_s0 + $0xa8] sm:$0xff]  ;;  %v1190_v56 = vld [vmem:[%s1244_s2] ss:$0 sm:$0xff] }
  0x11   :  { %v916_v45 = vld [vmem:[%s1243_s0 + $0xb8] sm:$0xff] }
  0x12   :  { %180 = vmatpush.bf16.msra.mxu0 %v904_v12  ;;  %976 = vmatpush.bf16.msra.mxu3 %v904_v12 }
  0x13   :  { %325 = vmatpush.bf16.msra.mxu1 %v888_v13 }
  0x14   :  { %504 = vmatpush.bf16.msra.mxu2 %v1074_v14 }
  0x16   :  { %181 = vmatpush.bf16.msra.mxu0 %v903_v15  ;;  %977 = vmatpush.bf16.msra.mxu3 %v903_v15 }
  0x17   :  { %326 = vmatpush.bf16.msra.mxu1 %v887_v16 }
  0x18   :  { %505 = vmatpush.bf16.msra.mxu2 %v1086_v17 }
  0x1a   :  { %182 = vmatpush.bf16.msra.mxu0 %v902_v18  ;;  %978 = vmatpush.bf16.msra.mxu3 %v902_v18 }
  0x1b   :  { %327 = vmatpush.bf16.msra.mxu1 %v886_v19 }
  0x1c   :  { %506 = vmatpush.bf16.msra.mxu2 %v918_v20 }
  0x1e   :  { %183 = vmatpush.bf16.msra.mxu0 %v901_v21  ;;  %979 = vmatpush.bf16.msra.mxu3 %v901_v21 }
  0x1f   :  { %328 = vmatpush.bf16.msra.mxu1 %v885_v22 }
  0x20   :  { %507 = vmatpush.bf16.msra.mxu2 %v917_v23 }
  0x21   :  { %184 = vmatmul.bf16.vlgmr.msra.gmra.mxu0 %v893_v24  ;;  %214 = vmatmul.bf16.vlgmr.msra.gmra.mxu3 %v899_v25 }
  0x22   :  { %980 = vmatpush.bf16.msrb.mxu3 %v892_v1  ;;  %329 = vmatmul.bf16.vlgmr.msra.gmra.mxu1 %v877_v26 }
  0x23   :  { %508 = vmatmul.bf16.vlgmr.msra.gmra.mxu2 %v909_v27 }
  0x26   :  { %981 = vmatpush.bf16.msrb.mxu3 %v891_v4 }
  0x2a   :  { %982 = vmatpush.bf16.msrb.mxu3 %v890_v7 }
  0x2e   :  { %983 = vmatpush.bf16.msrb.mxu3 %v889_v10 }
  0x31   :  { %189 = vmatmul.bf16.gmra.mxu0 %v894_v28  ;;  %219 = vmatmul.bf16.gmra.mxu3 %v900_v29 }
  0x32   :  { %984 = vmatpush.bf16.msrb.mxu3 %v888_v13  ;;  %334 = vmatmul.bf16.gmra.mxu1 %v878_v30 }
  0x33   :  { %513 = vmatmul.bf16.gmra.mxu2 %v910_v31 }
  0x36   :  { %985 = vmatpush.bf16.msrb.mxu3 %v887_v16 }
  0x3a   :  { %986 = vmatpush.bf16.msrb.mxu3 %v886_v19 }
  0x3e   :  { %987 = vmatpush.bf16.msrb.mxu3 %v885_v22 }
  0x41   :  { %194 = vmatmul.bf16.gmra.mxu0 %v895_v32  ;;  %359 = vmatmul.bf16.vlgmr.msrb.gmra.mxu3 %v883_v33 }
  0x42   :  { %988 = vmatpush.bf16.msra.mxu3 %v1026_v2  ;;  %339 = vmatmul.bf16.gmra.mxu1 %v879_v34 }
  0x43   :  { %518 = vmatmul.bf16.gmra.mxu2 %v911_v35 }
  0x46   :  { %989 = vmatpush.bf16.msra.mxu3 %v1038_v5 }
  0x4a   :  { %990 = vmatpush.bf16.msra.mxu3 %v1050_v8 }
  0x4e   :  { %991 = vmatpush.bf16.msra.mxu3 %v1062_v11 }
  0x51   :  { %199 = vmatmul.bf16.gmra.mxu0 %v896_v36  ;;  %364 = vmatmul.bf16.gmra.mxu3 %v884_v37 }
  0x52   :  { %992 = vmatpush.bf16.msra.mxu3 %v1074_v14  ;;  %344 = vmatmul.bf16.gmra.mxu1 %v880_v38 }
  0x53   :  { %523 = vmatmul.bf16.gmra.mxu2 %v912_v39 }
  0x56   :  { %993 = vmatpush.bf16.msra.mxu3 %v1086_v17 }
  0x5a   :  { %994 = vmatpush.bf16.msra.mxu3 %v918_v20 }
  0x5e   :  { %995 = vmatpush.bf16.msra.mxu3 %v917_v23 }
  0x61   :  { %204 = vmatmul.bf16.gmra.mxu0 %v897_v40  ;;  %538 = vmatmul.bf16.vlgmr.msra.gmra.mxu3 %v915_v41 }
  0x62   :  { %349 = vmatmul.bf16.gmra.mxu1 %v881_v42 }
  0x63   :  { %528 = vmatmul.bf16.gmra.mxu2 %v913_v43 }
  0x71   :  { %209 = vmatmul.bf16.gmra.mxu0 %v898_v44  ;;  %543 = vmatmul.bf16.gmra.mxu3 %v916_v45 }
  0x72   :  { %354 = vmatmul.bf16.gmra.mxu1 %v882_v46 }
  0x73   :  { %533 = vmatmul.bf16.gmra.mxu2 %v914_v47 }
  0x9e   :  { %v185_v48 = vpop.f32.mrf.mxu0 }
  0x9f   :  { %v330_v49 = vpop.f32.mrf.mxu1 }
  0xa0   :  { %v331_v54 = vadd.f32 %v330_v49, %v185_v48 }
  0xa4   :  { %v1185_v50 = vpop.f32.mrf.mxu3 }
  0xa6   :  { %v509_v51 = vpop.f32.mrf.mxu2  ;;  %v187_v52 = vpop.f32.mrf.mxu0 }
  0xa7   :  { %v332_v53 = vpop.f32.mrf.mxu1  ;;  %v549_v55 = vadd.f32 %v509_v51, %v331_v54 }
  0xa8   :  { %v333_v57 = vadd.f32 %v332_v53, %v187_v52 }
  0xa9   :  { %v569_v63 = vadd.f32 %v1190_v56, %v549_v55 }
  0xac   :  { %v1192_v58 = vpop.f32.mrf.mxu3 }
  0xae   :  { %v511_v59 = vpop.f32.mrf.mxu2  ;;  %v190_v61 = vpop.f32.mrf.mxu0 }
  0xaf   :  { %v550_v60 = vadd.f32 %v511_v59, %v333_v57  ;;  %v335_v62 = vpop.f32.mrf.mxu1 }
  0xb0   :  { %v336_v6 = vadd.f32 %v335_v62, %v190_v61 }
  0xb1   :  { %v570_v0 = vadd.f32 %v1190_v56, %v550_v60 }
  0xb3   :  { %v928_v1 = vpack.c.bf16 %v570_v0, %v569_v63 }
  0xb4   :  { %v1199_v2 = vpop.f32.mrf.mxu3 }
  0xb5   :  { %929 = vst [vmem:[%s1245_s3] sm:$0xff] %v928_v1  }
  0xb6   :  { %v514_v3 = vpop.f32.mrf.mxu2  ;;  %v192_v4 = vpop.f32.mrf.mxu0 }
  0xb7   :  { %v337_v5 = vpop.f32.mrf.mxu1  ;;  %v551_v7 = vadd.f32 %v514_v3, %v336_v6 }
  0xb8   :  { %v338_v8 = vadd.f32 %v337_v5, %v192_v4 }
  0xb9   :  { %v571_v14 = vadd.f32 %v1190_v56, %v551_v7 }
  0xbc   :  { %v1201_v9 = vpop.f32.mrf.mxu3 }
  0xbe   :  { %v516_v10 = vpop.f32.mrf.mxu2  ;;  %v195_v12 = vpop.f32.mrf.mxu0 }
  0xbf   :  { %v552_v11 = vadd.f32 %v516_v10, %v338_v8  ;;  %v340_v13 = vpop.f32.mrf.mxu1 }
  0xc0   :  { %v341_v21 = vadd.f32 %v340_v13, %v195_v12 }
  0xc1   :  { %v572_v15 = vadd.f32 %v1190_v56, %v552_v11 }
  0xc3   :  { %v933_v16 = vpack.c.bf16 %v572_v15, %v571_v14 }
  0xc4   :  { %v360_v17 = vpop.f32.mrf.mxu3 }
  0xc5   :  { %965 = vst [vmem:[%s1245_s3 + $0x8] sm:$0xff] %v933_v16   ;;  %v361_v53 = vadd.f32 %v360_v17, %v1185_v50 }
  0xc6   :  { %v519_v18 = vpop.f32.mrf.mxu2  ;;  %v197_v19 = vpop.f32.mrf.mxu0 }
  0xc7   :  { %v342_v20 = vpop.f32.mrf.mxu1  ;;  %v553_v22 = vadd.f32 %v519_v18, %v341_v21 }
  0xc8   :  { %v343_v23 = vadd.f32 %v342_v20, %v197_v19 }
  0xc9   :  { %v573_v29 = vadd.f32 %v1190_v56, %v553_v22 }
  0xcc   :  { %v362_v24 = vpop.f32.mrf.mxu3 }
  0xcd   :  { %v363_v54 = vadd.f32 %v362_v24, %v1192_v58 }
  0xce   :  { %v521_v25 = vpop.f32.mrf.mxu2  ;;  %v200_v27 = vpop.f32.mrf.mxu0 }
  0xcf   :  { %v554_v26 = vadd.f32 %v521_v25, %v343_v23  ;;  %v345_v28 = vpop.f32.mrf.mxu1 }
  0xd0   :  { %v346_v36 = vadd.f32 %v345_v28, %v200_v27 }
  0xd1   :  { %v574_v30 = vadd.f32 %v1190_v56, %v554_v26 }
  0xd3   :  { %v938_v31 = vpack.c.bf16 %v574_v30, %v573_v29 }
  0xd4   :  { %v365_v32 = vpop.f32.mrf.mxu3 }
  0xd5   :  { %966 = vst [vmem:[%s1245_s3 + $0x10] sm:$0xff] %v938_v31   ;;  %v366_v11 = vadd.f32 %v365_v32, %v1199_v2 }
  0xd6   :  { %v524_v33 = vpop.f32.mrf.mxu2  ;;  %v202_v34 = vpop.f32.mrf.mxu0 }
  0xd7   :  { %v347_v35 = vpop.f32.mrf.mxu1  ;;  %v555_v37 = vadd.f32 %v524_v33, %v346_v36 }
  0xd8   :  { %v348_v38 = vadd.f32 %v347_v35, %v202_v34 }
  0xd9   :  { %v575_v44 = vadd.f32 %v1190_v56, %v555_v37 }
  0xdc   :  { %v367_v39 = vpop.f32.mrf.mxu3 }
  0xdd   :  { %v368_v14 = vadd.f32 %v367_v39, %v1201_v9 }
  0xde   :  { %v526_v40 = vpop.f32.mrf.mxu2  ;;  %v205_v42 = vpop.f32.mrf.mxu0 }
  0xdf   :  { %v556_v41 = vadd.f32 %v526_v40, %v348_v38  ;;  %v350_v43 = vpop.f32.mrf.mxu1 }
  0xe0   :  { %v351_v52 = vadd.f32 %v350_v43, %v205_v42 }
  0xe1   :  { %v576_v45 = vadd.f32 %v1190_v56, %v556_v41 }
  0xe3   :  { %v943_v46 = vpack.c.bf16 %v576_v45, %v575_v44 }
  0xe4   :  { %v539_v47 = vpop.f32.mrf.mxu3 }
  0xe5   :  { %967 = vst [vmem:[%s1245_s3 + $0x18] sm:$0xff] %v943_v46   ;;  %v561_v55 = vadd.f32 %v539_v47, %v361_v53 }
  0xe6   :  { %v529_v48 = vpop.f32.mrf.mxu2  ;;  %v207_v49 = vpop.f32.mrf.mxu0 }
  0xe7   :  { %v352_v51 = vpop.f32.mrf.mxu1  ;;  %v557_v57 = vadd.f32 %v529_v48, %v351_v52  ;;  %v581_v0 = vadd.f32 %v1190_v56, %v561_v55 }
  0xe8   :  { %v353_v59 = vadd.f32 %v352_v51, %v207_v49 }
  0xe9   :  { %v577_v5 = vadd.f32 %v1190_v56, %v557_v57 }
  0xec   :  { %v541_v60 = vpop.f32.mrf.mxu3 }
  0xed   :  { %v562_v62 = vadd.f32 %v541_v60, %v363_v54 }
  0xee   :  { %v531_v61 = vpop.f32.mrf.mxu2  ;;  %v210_v3 = vpop.f32.mrf.mxu0 }
  0xef   :  { %v558_v63 = vadd.f32 %v531_v61, %v353_v59  ;;  %v582_v1 = vadd.f32 %v1190_v56, %v562_v62  ;;  %v355_v4 = vpop.f32.mrf.mxu1 }
  0xf0   :  { %v356_v10 = vadd.f32 %v355_v4, %v210_v3 }
  0xf1   :  { %v578_v6 = vadd.f32 %v1190_v56, %v558_v63  ;;  %v958_v50 = vpack.c.bf16 %v582_v1, %v581_v0 }
  0xf3   :  { %v948_v7 = vpack.c.bf16 %v578_v6, %v577_v5  ;;  %970 = vst [vmem:[%s1245_s3 + $0x30] sm:$0xff] %v958_v50  }
  0xf4   :  { %v544_v58 = vpop.f32.mrf.mxu3 }
  0xf5   :  { %968 = vst [vmem:[%s1245_s3 + $0x20] sm:$0xff] %v948_v7   ;;  %v563_v15 = vadd.f32 %v544_v58, %v366_v11 }
  0xf6   :  { %v534_v8 = vpop.f32.mrf.mxu2  ;;  %v212_v12 = vpop.f32.mrf.mxu0 }
  0xf7   :  { %v357_v13 = vpop.f32.mrf.mxu1  ;;  %v559_v16 = vadd.f32 %v534_v8, %v356_v10  ;;  %v583_v22 = vadd.f32 %v1190_v56, %v563_v15 }
  0xf8   :  { %v358_v17 = vadd.f32 %v357_v13, %v212_v12 }
  0xf9   :  { %v579_v24 = vadd.f32 %v1190_v56, %v559_v16 }
  0xfc   :  { %v546_v18 = vpop.f32.mrf.mxu3 }
  0xfd   :  { %v564_v20 = vadd.f32 %v546_v18, %v368_v14 }
  0xfe   :  { %v536_v19 = vpop.f32.mrf.mxu2 }
  0xff   :  { %v560_v21 = vadd.f32 %v536_v19, %v358_v17  ;;  %v584_v23 = vadd.f32 %v1190_v56, %v564_v20 }
 0x101   :  { %v580_v25 = vadd.f32 %v1190_v56, %v560_v21  ;;  %v963_v2 = vpack.c.bf16 %v584_v23, %v583_v22 }
 0x103   :  { %v953_v26 = vpack.c.bf16 %v580_v25, %v579_v24  ;;  %971 = vst [vmem:[%s1245_s3 + $0x38] sm:$0xff] %v963_v2  }
 0x105   :  { %969 = vst [vmem:[%s1245_s3 + $0x28] sm:$0xff] %v953_v26  }

</bundles_post_ra>
